<compile_context>
chip_gen: v6e
topology: v6e:2x2x1
jax: 0.10.0
libtpu: 0.0.40
codegen_flags: <defaults>
</compile_context>

<pallas_src>
import functools

import jax
import jax.numpy as jnp
import numpy as np
from jax import lax
from jax.experimental import pallas as pl
from jax.experimental.pallas import tpu as pltpu

EPS = 1e-5  # PyTorch InstanceNorm2d default eps


def _pick_row_tile(H, W, Cout):
    """Largest TR dividing H with the f32 acc tile (TR*W, Cout) <= ~64 KiB,
    preferring TR*W to be a multiple of 8 (full-sublane tiles)."""
    max_pixels = max(8, (64 * 1024) // (4 * max(Cout, 1)))
    best, best_aligned = 1, None
    for tr in range(1, H + 1):
        if H % tr == 0 and tr * W <= max_pixels:
            best = tr
            if (tr * W) % 8 == 0:
                best_aligned = tr
    return best_aligned if best_aligned is not None else best


def residual_block_kernel(x_ref, w1_ref, w2_ref, o_ref,
                          xw_ref, y_ref,
                          *, H, W, C, TR, n_strips, mm_dtype, unroll):
    """x_ref/o_ref: (H, W, C) (batch dim squeezed).  w*_ref: (3, 3C, C).
    xw_ref: (H+2, W, 3C) mm_dtype width-folded conv input (zero border).
    y_ref: (H, W, C) mm_dtype raw conv output."""
    HW = H * W
    inv_hw = 1.0 / float(HW)

    # ---- zero the border of the folded buffer (rows 0 / H+1 and the pad
    #      columns of the kw=0 / kw=2 slabs); interior is overwritten below.
    zrow = jnp.zeros((1, W, 3 * C), mm_dtype)
    xw_ref[0:1, :, :] = zrow
    xw_ref[H + 1:H + 2, :, :] = zrow
    zcol = jnp.zeros((H, 1, C), mm_dtype)
    xw_ref[1:H + 1, 0:1, 0:C] = zcol                   # left pad col  (kw=0 slab)
    xw_ref[1:H + 1, W - 1:W, 2 * C:3 * C] = zcol       # right pad col (kw=2 slab)

    def store_slabs(r0, val):
        """Write a (TR, W, C) mm_dtype strip into the three kw-shifted channel
        slabs of xw_ref at padded rows [1+r0, 1+r0+TR)."""
        xw_ref[pl.ds(1 + r0, TR), 1:W, 0:C] = val[:, 0:W - 1, :]
        xw_ref[pl.ds(1 + r0, TR), :, C:2 * C] = val
        xw_ref[pl.ds(1 + r0, TR), 0:W - 1, 2 * C:3 * C] = val[:, 1:W, :]

    def conv3x3_pass(w_ref):
        """3x3 'same' conv of the folded input with w_ref (3, 3C, C).
        Stores the raw conv output into y_ref; returns (mean, var) as (1,1,C)
        f32 (stats accumulated in f32 inside the strip loop)."""
        def strip_body(s, carry):
            ssum, ssq = carry
            r0 = s * TR
            acc = jnp.zeros((TR * W, C), jnp.float32)
            for kh in range(3):                      # static tap loop
                tap = xw_ref[pl.ds(r0 + kh, TR), :, :].reshape(TR * W, 3 * C)
                acc = acc + jnp.dot(tap, w_ref[kh],
                                    preferred_element_type=jnp.float32)
            y_ref[pl.ds(r0, TR), :, :] = acc.reshape(TR, W, C).astype(y_ref.dtype)
            ssum = ssum + jnp.sum(acc, axis=0, keepdims=True)
            ssq = ssq + jnp.sum(acc * acc, axis=0, keepdims=True)
            return ssum, ssq

        init = (jnp.zeros((1, C), jnp.float32), jnp.zeros((1, C), jnp.float32))
        ssum, ssq = lax.fori_loop(0, n_strips, strip_body, init, unroll=unroll)
        mean = ssum * inv_hw
        # Biased variance via E[x^2] - E[x]^2 in f32 (fine for GAN activations).
        var = jnp.maximum(ssq * inv_hw - mean * mean, 0.0)
        return mean.reshape(1, 1, C), var.reshape(1, 1, C)

    # ---- fold x into the conv1 input (strip-chunked; no pad buffer) ----
    def fold_x_body(s, _):
        r0 = s * TR
        xs = x_ref[pl.ds(r0, TR), :, :].astype(mm_dtype)
        store_slabs(r0, xs)
        return 0
    lax.fori_loop(0, n_strips, fold_x_body, 0, unroll=unroll)

    # ---- conv1 + fused InstanceNorm statistics ----
    mean1, var1 = conv3x3_pass(w1_ref)
    rs1 = lax.rsqrt(var1 + EPS)

    # ---- IN1 + ReLU, strip-wise, written directly as conv2's folded input ----
    def apply1_body(s, _):
        r0 = s * TR
        y = y_ref[pl.ds(r0, TR), :, :].astype(jnp.float32)
        yn = jnp.maximum((y - mean1) * rs1, 0.0).astype(mm_dtype)
        store_slabs(r0, yn)
        return 0
    lax.fori_loop(0, n_strips, apply1_body, 0, unroll=unroll)

    # ---- conv2 + fused InstanceNorm statistics ----
    mean2, var2 = conv3x3_pass(w2_ref)
    rs2 = lax.rsqrt(var2 + EPS)

    # ---- IN2 + residual add + output store, strip-wise (f32 math) ----
    def epilogue_body(s, _):
        r0 = s * TR
        y = y_ref[pl.ds(r0, TR), :, :].astype(jnp.float32)
        yn = (y - mean2) * rs2
        xs = x_ref[pl.ds(r0, TR), :, :].astype(jnp.float32)
        o_ref[pl.ds(r0, TR), :, :] = (xs + yn).astype(o_ref.dtype)
        return 0
    lax.fori_loop(0, n_strips, epilogue_body, 0, unroll=unroll)


@functools.partial(jax.jit, static_argnames=("matmul_dtype",))
def residual_block(x_nchw, w1, w2, matmul_dtype=None):
    """x_nchw: (N, C, H, W). w1: (Cout, Cin, 3, 3). w2: (Cout, Cout, 3, 3).
    matmul_dtype: MXU matmul dtype; default bf16 (f32 accumulation). Pass
    jnp.float32 for a bit-faithful (slow) path used in correctness tests."""
    N, C, H, W = x_nchw.shape
    Cout = w1.shape[0]
    assert C == Cout, "residual add requires dim_in == dim_out"

    mm_dtype = jnp.dtype(jnp.bfloat16 if matmul_dtype is None else matmul_dtype)

    x_nhwc = jnp.transpose(x_nchw, (0, 2, 3, 1))
    # (Cout, Cin, kh, kw) -> (kh, kw*Cin + ci, co): kw folded into channels.
    w1_taps = jnp.transpose(w1, (2, 3, 1, 0)).reshape(3, 3 * C, Cout).astype(mm_dtype)
    w2_taps = jnp.transpose(w2, (2, 3, 1, 0)).reshape(3, 3 * Cout, Cout).astype(mm_dtype)

    TR = _pick_row_tile(H, W, Cout)
    n_strips = H // TR
    unroll = n_strips if n_strips <= 4 else 2

    kernel = functools.partial(
        residual_block_kernel,
        H=H, W=W, C=C, TR=TR, n_strips=n_strips, mm_dtype=mm_dtype,
        unroll=unroll)

    # --- VMEM budget / compiler params (generation-aware cap) ---
    isz_x = jnp.dtype(x_nchw.dtype).itemsize
    isz_mm = mm_dtype.itemsize
    blk = H * W * C
    est = (2 * 2 * blk * isz_x                       # double-buffered in/out blocks
           + 2 * 2 * 9 * C * Cout * isz_mm           # weights (double-buffered)
           + (H + 2) * W * 3 * C * isz_mm            # width-folded conv input
           + blk * isz_mm                            # raw conv output scratch
           + 16 * TR * W * C * 4 + (2 << 20))        # strip temporaries + headroom
    comp_kwargs = {"dimension_semantics": ("parallel",)}
    if est > 16 * 1024 * 1024:
        try:
            vmem_cap = int(pltpu.get_tpu_info().vmem_capacity_bytes)
        except Exception:
            vmem_cap = 64 * 1024 * 1024              # v7x (smallest) physical VMEM
        comp_kwargs["vmem_limit_bytes"] = int(
            min(max(est, 32 * 1024 * 1024), vmem_cap - (8 << 20)))
    compiler_params = pltpu.CompilerParams(**comp_kwargs)

    cost = pl.CostEstimate(
        flops=int(2 * 2 * 9 * N * H * W * C * Cout),
        transcendentals=int(4 * N * Cout),
        bytes_accessed=int(2 * N * blk * isz_x + 2 * 9 * C * Cout * isz_mm),
    )

    out_nhwc = pl.pallas_call(
        kernel,
        out_shape=jax.ShapeDtypeStruct((N, H, W, C), x_nchw.dtype),
        grid_spec=pltpu.PrefetchScalarGridSpec(
            num_scalar_prefetch=0,
            grid=(N,),
            in_specs=[
                pl.BlockSpec((None, H, W, C), lambda n: (n, 0, 0, 0)),
                pl.BlockSpec((3, 3 * C, Cout), lambda n: (0, 0, 0)),
                pl.BlockSpec((3, 3 * Cout, Cout), lambda n: (0, 0, 0)),
            ],
            out_specs=pl.BlockSpec((None, H, W, C), lambda n: (n, 0, 0, 0)),
            scratch_shapes=[
                pltpu.VMEM((H + 2, W, 3 * C), mm_dtype),   # width-folded input
                pltpu.VMEM((H, W, C), mm_dtype),           # raw conv output
            ],
        ),
        compiler_params=compiler_params,
        cost_estimate=cost,
    )(x_nhwc, w1_taps, w2_taps)
    return jnp.transpose(out_nhwc, (0, 3, 1, 2))


def _reference(x_nchw, w1, w2):
    """Pure-JAX reference (NCHW, matches PyTorch semantics)."""
    def conv(x, w):
        return lax.conv_general_dilated(
            x, w, window_strides=(1, 1), padding=((1, 1), (1, 1)),
            dimension_numbers=("NCHW", "OIHW", "NCHW"))

    def inorm(y):
        m = jnp.mean(y, axis=(2, 3), keepdims=True)
        v = jnp.mean((y - m) ** 2, axis=(2, 3), keepdims=True)
        return (y - m) / jnp.sqrt(v + EPS)

    y = conv(x_nchw, w1)
    y = jnp.maximum(inorm(y), 0.0)
    y = inorm(conv(y, w2))
    return x_nchw + y


if __name__ == "__main__":
    N, C, H, W = 2, 4, 16, 16
    dim_in = dim_out = C

    key = jax.random.PRNGKey(0)
    kx, k1, k2 = jax.random.split(key, 3)
    x = jax.random.normal(kx, (N, C, H, W), dtype=jnp.float32)
    w1 = 0.1 * jax.random.normal(k1, (dim_out, dim_in, 3, 3), dtype=jnp.float32)
    w2 = 0.1 * jax.random.normal(k2, (dim_out, dim_out, 3, 3), dtype=jnp.float32)

    ref = jax.block_until_ready(_reference(x, w1, w2))

    # f32 matmul path: strict check against the reference.
    out_f32 = jax.block_until_ready(
        residual_block(x, w1, w2, matmul_dtype=jnp.float32))
    np.testing.assert_allclose(np.asarray(out_f32), np.asarray(ref),
                               rtol=1e-4, atol=1e-5)

    # Default path (bf16 matmuls, f32 accumulation): production mode,
    # checked with a looser tolerance.
    out = jax.block_until_ready(residual_block(x, w1, w2))
    np.testing.assert_allclose(np.asarray(out), np.asarray(ref),
                               rtol=1e-1, atol=1e-1)

    print("KERNEL_OK")
</pallas_src>

<mosaic_0001>
module attributes {stable_mosaic.version = 11 : i64} {
  func.func @residual_block_kernel(%arg0: i32, %arg1: memref<1x16x16x4xf32, #tpu.memory_space<vmem>>, %arg2: memref<3x12x4xf32, #tpu.memory_space<vmem>>, %arg3: memref<3x12x4xf32, #tpu.memory_space<vmem>>, %arg4: memref<1x16x16x4xf32, #tpu.memory_space<vmem>>, %arg5: memref<18x16x12xf32, #tpu.memory_space<vmem>>, %arg6: memref<16x16x4xf32, #tpu.memory_space<vmem>>) attributes {dimension_semantics = [#tpu.dimension_semantics<parallel>], iteration_bounds = array<i64: 2>, scalar_prefetch = 0 : i64, scratch_operands = 2 : i64, tpu.core_type = #tpu.core_type<tc>, window_params = [{transform_indices = @transform_0, window_bounds = array<i64: 1, 16, 16, 4>}, {pipeline_mode = #tpu.pipeline_mode<synchronous>, transform_indices = @transform_1, window_bounds = array<i64: 3, 12, 4>}, {pipeline_mode = #tpu.pipeline_mode<synchronous>, transform_indices = @transform_2, window_bounds = array<i64: 3, 12, 4>}, {transform_indices = @transform_3, window_bounds = array<i64: 1, 16, 16, 4>}]} {
    %cst = arith.constant 0.000000e+00 : f32
    %0 = vector.broadcast %cst : f32 to vector<1x16x12xf32>
    %c0 = arith.constant 0 : index
    %c0_0 = arith.constant 0 : index
    %c0_1 = arith.constant 0 : index
    %1 = vector.load %arg5[%c0, %c0_0, %c0_1] : memref<18x16x12xf32, #tpu.memory_space<vmem>>, vector<1x16x12xf32>
    tpu.vector_store %arg5[%c0, %c0_0, %c0_1], %0 {strides = array<i32>} : memref<18x16x12xf32, #tpu.memory_space<vmem>>, vector<1x16x12xf32>,
    %c17 = arith.constant 17 : index
    %c0_2 = arith.constant 0 : index
    %c0_3 = arith.constant 0 : index
    %2 = vector.load %arg5[%c17, %c0_2, %c0_3] : memref<18x16x12xf32, #tpu.memory_space<vmem>>, vector<1x16x12xf32>
    tpu.vector_store %arg5[%c17, %c0_2, %c0_3], %0 {strides = array<i32>} : memref<18x16x12xf32, #tpu.memory_space<vmem>>, vector<1x16x12xf32>,
    %cst_4 = arith.constant 0.000000e+00 : f32
    %3 = vector.broadcast %cst_4 : f32 to vector<16x1x4xf32>
    %c1 = arith.constant 1 : index
    %c0_5 = arith.constant 0 : index
    %c0_6 = arith.constant 0 : index
    %4 = vector.load %arg5[%c1, %c0_5, %c0_6] : memref<18x16x12xf32, #tpu.memory_space<vmem>>, vector<16x1x4xf32>
    tpu.vector_store %arg5[%c1, %c0_5, %c0_6], %3 {strides = array<i32>} : memref<18x16x12xf32, #tpu.memory_space<vmem>>, vector<16x1x4xf32>,
    %c1_7 = arith.constant 1 : index
    %c15 = arith.constant 15 : index
    %c8 = arith.constant 8 : index
    %5 = vector.load %arg5[%c1_7, %c15, %c8] : memref<18x16x12xf32, #tpu.memory_space<vmem>>, vector<16x1x4xf32>
    tpu.vector_store %arg5[%c1_7, %c15, %c8], %3 {strides = array<i32>} : memref<18x16x12xf32, #tpu.memory_space<vmem>>, vector<16x1x4xf32>,
    %c0_i32 = arith.constant 0 : i32
    %c16_i32 = arith.constant 16 : i32
    %6 = arith.muli %c0_i32, %c16_i32 : i32
    %c0_8 = arith.constant 0 : index
    %7 = arith.index_cast %6 : i32 to index
    %c0_9 = arith.constant 0 : index
    %c0_10 = arith.constant 0 : index
    %8 = vector.load %arg1[%c0_8, %7, %c0_9, %c0_10] : memref<1x16x16x4xf32, #tpu.memory_space<vmem>>, vector<1x16x16x4xf32>
    %9 = vector.shape_cast %8 : vector<1x16x16x4xf32> to vector<16x16x4xf32>
    %10 = vector.extract_strided_slice %9 {offsets = [0, 0, 0], sizes = [16, 15, 4], strides = [1, 1, 1]} : vector<16x16x4xf32> to vector<16x15x4xf32>
    %c1_i32 = arith.constant 1 : i32
    %11 = arith.addi %c1_i32, %6 : i32
    %12 = arith.index_cast %11 : i32 to index
    %c1_11 = arith.constant 1 : index
    %c0_12 = arith.constant 0 : index
    %13 = vector.load %arg5[%12, %c1_11, %c0_12] : memref<18x16x12xf32, #tpu.memory_space<vmem>>, vector<16x15x4xf32>
    tpu.vector_store %arg5[%12, %c1_11, %c0_12], %10 {strides = array<i32>} : memref<18x16x12xf32, #tpu.memory_space<vmem>>, vector<16x15x4xf32>,
    %c1_i32_13 = arith.constant 1 : i32
    %14 = arith.addi %c1_i32_13, %6 : i32
    %15 = arith.index_cast %14 : i32 to index
    %c0_14 = arith.constant 0 : index
    %c4 = arith.constant 4 : index
    %16 = vector.load %arg5[%15, %c0_14, %c4] : memref<18x16x12xf32, #tpu.memory_space<vmem>>, vector<16x16x4xf32>
    tpu.vector_store %arg5[%15, %c0_14, %c4], %9 {strides = array<i32>} : memref<18x16x12xf32, #tpu.memory_space<vmem>>, vector<16x16x4xf32>,
    %17 = vector.extract_strided_slice %9 {offsets = [0, 1, 0], sizes = [16, 15, 4], strides = [1, 1, 1]} : vector<16x16x4xf32> to vector<16x15x4xf32>
    %c1_i32_15 = arith.constant 1 : i32
    %18 = arith.addi %c1_i32_15, %6 : i32
    %19 = arith.index_cast %18 : i32 to index
    %c0_16 = arith.constant 0 : index
    %c8_17 = arith.constant 8 : index
    %20 = vector.load %arg5[%19, %c0_16, %c8_17] : memref<18x16x12xf32, #tpu.memory_space<vmem>>, vector<16x15x4xf32>
    tpu.vector_store %arg5[%19, %c0_16, %c8_17], %17 {strides = array<i32>} : memref<18x16x12xf32, #tpu.memory_space<vmem>>, vector<16x15x4xf32>,
    %c1_i32_18 = arith.constant 1 : i32
    %cst_19 = arith.constant 0.000000e+00 : f32
    %21 = vector.broadcast %cst_19 : f32 to vector<1x4xf32>
    %cst_20 = arith.constant 0.000000e+00 : f32
    %22 = vector.broadcast %cst_20 : f32 to vector<1x4xf32>
    %c0_i32_21 = arith.constant 0 : i32
    %c16_i32_22 = arith.constant 16 : i32
    %23 = arith.muli %c0_i32_21, %c16_i32_22 : i32
    %cst_23 = arith.constant 0.000000e+00 : f32
    %24 = vector.broadcast %cst_23 : f32 to vector<256x4xf32>
    %c0_i32_24 = arith.constant 0 : i32
    %25 = arith.addi %23, %c0_i32_24 : i32
    %26 = arith.index_cast %25 : i32 to index
    %c0_25 = arith.constant 0 : index
    %c0_26 = arith.constant 0 : index
    %27 = vector.load %arg5[%26, %c0_25, %c0_26] : memref<18x16x12xf32, #tpu.memory_space<vmem>>, vector<16x16x12xf32>
    %28 = vector.shape_cast %27 : vector<16x16x12xf32> to vector<256x12xf32>
    %c0_27 = arith.constant 0 : index
    %c0_28 = arith.constant 0 : index
    %c0_29 = arith.constant 0 : index
    %29 = vector.load %arg2[%c0_27, %c0_28, %c0_29] : memref<3x12x4xf32, #tpu.memory_space<vmem>>, vector<1x12x4xf32>
    %30 = vector.shape_cast %29 : vector<1x12x4xf32> to vector<12x4xf32>
    %cst_30 = arith.constant dense<0.000000e+00> : vector<256x4xf32>
    %31 = tpu.matmul %28, %30, %cst_30 {dimension_numbers = #tpu.dot_dimension_numbers<[1], [0], [0], [1], [0, 0, 1, 1], [], []>} : vector<256x12xf32>, vector<12x4xf32>, vector<256x4xf32> -> vector<256x4xf32>
    %32 = arith.addf %24, %31 : vector<256x4xf32>
    %c1_i32_31 = arith.constant 1 : i32
    %33 = arith.addi %23, %c1_i32_31 : i32
    %34 = arith.index_cast %33 : i32 to index
    %c0_32 = arith.constant 0 : index
    %c0_33 = arith.constant 0 : index
    %35 = vector.load %arg5[%34, %c0_32, %c0_33] : memref<18x16x12xf32, #tpu.memory_space<vmem>>, vector<16x16x12xf32>
    %36 = vector.shape_cast %35 : vector<16x16x12xf32> to vector<256x12xf32>
    %c1_34 = arith.constant 1 : index
    %c0_35 = arith.constant 0 : index
    %c0_36 = arith.constant 0 : index
    %37 = vector.load %arg2[%c1_34, %c0_35, %c0_36] : memref<3x12x4xf32, #tpu.memory_space<vmem>>, vector<1x12x4xf32>
    %38 = vector.shape_cast %37 : vector<1x12x4xf32> to vector<12x4xf32>
    %cst_37 = arith.constant dense<0.000000e+00> : vector<256x4xf32>
    %39 = tpu.matmul %36, %38, %cst_37 {dimension_numbers = #tpu.dot_dimension_numbers<[1], [0], [0], [1], [0, 0, 1, 1], [], []>} : vector<256x12xf32>, vector<12x4xf32>, vector<256x4xf32> -> vector<256x4xf32>
    %40 = arith.addf %32, %39 : vector<256x4xf32>
    %c2_i32 = arith.constant 2 : i32
    %41 = arith.addi %23, %c2_i32 : i32
    %42 = arith.index_cast %41 : i32 to index
    %c0_38 = arith.constant 0 : index
    %c0_39 = arith.constant 0 : index
    %43 = vector.load %arg5[%42, %c0_38, %c0_39] : memref<18x16x12xf32, #tpu.memory_space<vmem>>, vector<16x16x12xf32>
    %44 = vector.shape_cast %43 : vector<16x16x12xf32> to vector<256x12xf32>
    %c2 = arith.constant 2 : index
    %c0_40 = arith.constant 0 : index
    %c0_41 = arith.constant 0 : index
    %45 = vector.load %arg2[%c2, %c0_40, %c0_41] : memref<3x12x4xf32, #tpu.memory_space<vmem>>, vector<1x12x4xf32>
    %46 = vector.shape_cast %45 : vector<1x12x4xf32> to vector<12x4xf32>
    %cst_42 = arith.constant dense<0.000000e+00> : vector<256x4xf32>
    %47 = tpu.matmul %44, %46, %cst_42 {dimension_numbers = #tpu.dot_dimension_numbers<[1], [0], [0], [1], [0, 0, 1, 1], [], []>} : vector<256x12xf32>, vector<12x4xf32>, vector<256x4xf32> -> vector<256x4xf32>
    %48 = arith.addf %40, %47 : vector<256x4xf32>
    %49 = vector.shape_cast %48 : vector<256x4xf32> to vector<16x16x4xf32>
    %50 = arith.index_cast %23 : i32 to index
    %c0_43 = arith.constant 0 : index
    %c0_44 = arith.constant 0 : index
    %51 = vector.load %arg6[%50, %c0_43, %c0_44] : memref<16x16x4xf32, #tpu.memory_space<vmem>>, vector<16x16x4xf32>
    tpu.vector_store %arg6[%50, %c0_43, %c0_44], %49 {strides = array<i32>} : memref<16x16x4xf32, #tpu.memory_space<vmem>>, vector<16x16x4xf32>,
    %cst_45 = arith.constant dense<0.000000e+00> : vector<4xf32>
    %52 = vector.multi_reduction <add>, %48, %cst_45 [0] : vector<256x4xf32> to vector<4xf32>
    %53 = vector.shape_cast %52 : vector<4xf32> to vector<1x4xf32>
    %54 = arith.addf %21, %53 : vector<1x4xf32>
    %55 = arith.mulf %48, %48 : vector<256x4xf32>
    %cst_46 = arith.constant dense<0.000000e+00> : vector<4xf32>
    %56 = vector.multi_reduction <add>, %55, %cst_46 [0] : vector<256x4xf32> to vector<4xf32>
    %57 = vector.shape_cast %56 : vector<4xf32> to vector<1x4xf32>
    %58 = arith.addf %22, %57 : vector<1x4xf32>
    %c1_i32_47 = arith.constant 1 : i32
    %cst_48 = arith.constant 3.906250e-03 : f32
    %59 = vector.broadcast %cst_48 : f32 to vector<1x4xf32>
    %60 = arith.mulf %54, %59 : vector<1x4xf32>
    %cst_49 = arith.constant 3.906250e-03 : f32
    %61 = vector.broadcast %cst_49 : f32 to vector<1x4xf32>
    %62 = arith.mulf %58, %61 : vector<1x4xf32>
    %63 = arith.mulf %60, %60 : vector<1x4xf32>
    %64 = arith.subf %62, %63 : vector<1x4xf32>
    %cst_50 = arith.constant 0.000000e+00 : f32
    %65 = vector.broadcast %cst_50 : f32 to vector<1x4xf32>
    %66 = arith.maximumf %64, %65 : vector<1x4xf32>
    %67 = vector.shape_cast %60 : vector<1x4xf32> to vector<1x1x4xf32>
    %68 = vector.shape_cast %66 : vector<1x4xf32> to vector<1x1x4xf32>
    %cst_51 = arith.constant 9.99999974E-6 : f32
    %69 = vector.broadcast %cst_51 : f32 to vector<1x1x4xf32>
    %70 = arith.addf %68, %69 : vector<1x1x4xf32>
    %71 = math.rsqrt %70 : vector<1x1x4xf32>
    %c0_i32_52 = arith.constant 0 : i32
    %c16_i32_53 = arith.constant 16 : i32
    %72 = arith.muli %c0_i32_52, %c16_i32_53 : i32
    %73 = arith.index_cast %72 : i32 to index
    %c0_54 = arith.constant 0 : index
    %c0_55 = arith.constant 0 : index
    %74 = vector.load %arg6[%73, %c0_54, %c0_55] : memref<16x16x4xf32, #tpu.memory_space<vmem>>, vector<16x16x4xf32>
    %75 = vector.broadcast %67 : vector<1x1x4xf32> to vector<16x16x4xf32>
    %76 = arith.subf %74, %75 : vector<16x16x4xf32>
    %77 = vector.broadcast %71 : vector<1x1x4xf32> to vector<16x16x4xf32>
    %78 = arith.mulf %76, %77 : vector<16x16x4xf32>
    %cst_56 = arith.constant 0.000000e+00 : f32
    %79 = vector.broadcast %cst_56 : f32 to vector<16x16x4xf32>
    %80 = arith.maximumf %78, %79 : vector<16x16x4xf32>
    %81 = vector.extract_strided_slice %80 {offsets = [0, 0, 0], sizes = [16, 15, 4], strides = [1, 1, 1]} : vector<16x16x4xf32> to vector<16x15x4xf32>
    %c1_i32_57 = arith.constant 1 : i32
    %82 = arith.addi %c1_i32_57, %72 : i32
    %83 = arith.index_cast %82 : i32 to index
    %c1_58 = arith.constant 1 : index
    %c0_59 = arith.constant 0 : index
    %84 = vector.load %arg5[%83, %c1_58, %c0_59] : memref<18x16x12xf32, #tpu.memory_space<vmem>>, vector<16x15x4xf32>
    tpu.vector_store %arg5[%83, %c1_58, %c0_59], %81 {strides = array<i32>} : memref<18x16x12xf32, #tpu.memory_space<vmem>>, vector<16x15x4xf32>,
    %c1_i32_60 = arith.constant 1 : i32
    %85 = arith.addi %c1_i32_60, %72 : i32
    %86 = arith.index_cast %85 : i32 to index
    %c0_61 = arith.constant 0 : index
    %c4_62 = arith.constant 4 : index
    %87 = vector.load %arg5[%86, %c0_61, %c4_62] : memref<18x16x12xf32, #tpu.memory_space<vmem>>, vector<16x16x4xf32>
    tpu.vector_store %arg5[%86, %c0_61, %c4_62], %80 {strides = array<i32>} : memref<18x16x12xf32, #tpu.memory_space<vmem>>, vector<16x16x4xf32>,
    %88 = vector.extract_strided_slice %80 {offsets = [0, 1, 0], sizes = [16, 15, 4], strides = [1, 1, 1]} : vector<16x16x4xf32> to vector<16x15x4xf32>
    %c1_i32_63 = arith.constant 1 : i32
    %89 = arith.addi %c1_i32_63, %72 : i32
    %90 = arith.index_cast %89 : i32 to index
    %c0_64 = arith.constant 0 : index
    %c8_65 = arith.constant 8 : index
    %91 = vector.load %arg5[%90, %c0_64, %c8_65] : memref<18x16x12xf32, #tpu.memory_space<vmem>>, vector<16x15x4xf32>
    tpu.vector_store %arg5[%90, %c0_64, %c8_65], %88 {strides = array<i32>} : memref<18x16x12xf32, #tpu.memory_space<vmem>>, vector<16x15x4xf32>,
    %c1_i32_66 = arith.constant 1 : i32
    %cst_67 = arith.constant 0.000000e+00 : f32
    %92 = vector.broadcast %cst_67 : f32 to vector<1x4xf32>
    %cst_68 = arith.constant 0.000000e+00 : f32
    %93 = vector.broadcast %cst_68 : f32 to vector<1x4xf32>
    %c0_i32_69 = arith.constant 0 : i32
    %c16_i32_70 = arith.constant 16 : i32
    %94 = arith.muli %c0_i32_69, %c16_i32_70 : i32
    %cst_71 = arith.constant 0.000000e+00 : f32
    %95 = vector.broadcast %cst_71 : f32 to vector<256x4xf32>
    %c0_i32_72 = arith.constant 0 : i32
    %96 = arith.addi %94, %c0_i32_72 : i32
    %97 = arith.index_cast %96 : i32 to index
    %c0_73 = arith.constant 0 : index
    %c0_74 = arith.constant 0 : index
    %98 = vector.load %arg5[%97, %c0_73, %c0_74] : memref<18x16x12xf32, #tpu.memory_space<vmem>>, vector<16x16x12xf32>
    %99 = vector.shape_cast %98 : vector<16x16x12xf32> to vector<256x12xf32>
    %c0_75 = arith.constant 0 : index
    %c0_76 = arith.constant 0 : index
    %c0_77 = arith.constant 0 : index
    %100 = vector.load %arg3[%c0_75, %c0_76, %c0_77] : memref<3x12x4xf32, #tpu.memory_space<vmem>>, vector<1x12x4xf32>
    %101 = vector.shape_cast %100 : vector<1x12x4xf32> to vector<12x4xf32>
    %cst_78 = arith.constant dense<0.000000e+00> : vector<256x4xf32>
    %102 = tpu.matmul %99, %101, %cst_78 {dimension_numbers = #tpu.dot_dimension_numbers<[1], [0], [0], [1], [0, 0, 1, 1], [], []>} : vector<256x12xf32>, vector<12x4xf32>, vector<256x4xf32> -> vector<256x4xf32>
    %103 = arith.addf %95, %102 : vector<256x4xf32>
    %c1_i32_79 = arith.constant 1 : i32
    %104 = arith.addi %94, %c1_i32_79 : i32
    %105 = arith.index_cast %104 : i32 to index
    %c0_80 = arith.constant 0 : index
    %c0_81 = arith.constant 0 : index
    %106 = vector.load %arg5[%105, %c0_80, %c0_81] : memref<18x16x12xf32, #tpu.memory_space<vmem>>, vector<16x16x12xf32>
    %107 = vector.shape_cast %106 : vector<16x16x12xf32> to vector<256x12xf32>
    %c1_82 = arith.constant 1 : index
    %c0_83 = arith.constant 0 : index
    %c0_84 = arith.constant 0 : index
    %108 = vector.load %arg3[%c1_82, %c0_83, %c0_84] : memref<3x12x4xf32, #tpu.memory_space<vmem>>, vector<1x12x4xf32>
    %109 = vector.shape_cast %108 : vector<1x12x4xf32> to vector<12x4xf32>
    %cst_85 = arith.constant dense<0.000000e+00> : vector<256x4xf32>
    %110 = tpu.matmul %107, %109, %cst_85 {dimension_numbers = #tpu.dot_dimension_numbers<[1], [0], [0], [1], [0, 0, 1, 1], [], []>} : vector<256x12xf32>, vector<12x4xf32>, vector<256x4xf32> -> vector<256x4xf32>
    %111 = arith.addf %103, %110 : vector<256x4xf32>
    %c2_i32_86 = arith.constant 2 : i32
    %112 = arith.addi %94, %c2_i32_86 : i32
    %113 = arith.index_cast %112 : i32 to index
    %c0_87 = arith.constant 0 : index
    %c0_88 = arith.constant 0 : index
    %114 = vector.load %arg5[%113, %c0_87, %c0_88] : memref<18x16x12xf32, #tpu.memory_space<vmem>>, vector<16x16x12xf32>
    %115 = vector.shape_cast %114 : vector<16x16x12xf32> to vector<256x12xf32>
    %c2_89 = arith.constant 2 : index
    %c0_90 = arith.constant 0 : index
    %c0_91 = arith.constant 0 : index
    %116 = vector.load %arg3[%c2_89, %c0_90, %c0_91] : memref<3x12x4xf32, #tpu.memory_space<vmem>>, vector<1x12x4xf32>
    %117 = vector.shape_cast %116 : vector<1x12x4xf32> to vector<12x4xf32>
    %cst_92 = arith.constant dense<0.000000e+00> : vector<256x4xf32>
    %118 = tpu.matmul %115, %117, %cst_92 {dimension_numbers = #tpu.dot_dimension_numbers<[1], [0], [0], [1], [0, 0, 1, 1], [], []>} : vector<256x12xf32>, vector<12x4xf32>, vector<256x4xf32> -> vector<256x4xf32>
    %119 = arith.addf %111, %118 : vector<256x4xf32>
    %120 = vector.shape_cast %119 : vector<256x4xf32> to vector<16x16x4xf32>
    %121 = arith.index_cast %94 : i32 to index
    %c0_93 = arith.constant 0 : index
    %c0_94 = arith.constant 0 : index
    %122 = vector.load %arg6[%121, %c0_93, %c0_94] : memref<16x16x4xf32, #tpu.memory_space<vmem>>, vector<16x16x4xf32>
    tpu.vector_store %arg6[%121, %c0_93, %c0_94], %120 {strides = array<i32>} : memref<16x16x4xf32, #tpu.memory_space<vmem>>, vector<16x16x4xf32>,
    %cst_95 = arith.constant dense<0.000000e+00> : vector<4xf32>
    %123 = vector.multi_reduction <add>, %119, %cst_95 [0] : vector<256x4xf32> to vector<4xf32>
    %124 = vector.shape_cast %123 : vector<4xf32> to vector<1x4xf32>
    %125 = arith.addf %92, %124 : vector<1x4xf32>
    %126 = arith.mulf %119, %119 : vector<256x4xf32>
    %cst_96 = arith.constant dense<0.000000e+00> : vector<4xf32>
    %127 = vector.multi_reduction <add>, %126, %cst_96 [0] : vector<256x4xf32> to vector<4xf32>
    %128 = vector.shape_cast %127 : vector<4xf32> to vector<1x4xf32>
    %129 = arith.addf %93, %128 : vector<1x4xf32>
    %c1_i32_97 = arith.constant 1 : i32
    %cst_98 = arith.constant 3.906250e-03 : f32
    %130 = vector.broadcast %cst_98 : f32 to vector<1x4xf32>
    %131 = arith.mulf %125, %130 : vector<1x4xf32>
    %cst_99 = arith.constant 3.906250e-03 : f32
    %132 = vector.broadcast %cst_99 : f32 to vector<1x4xf32>
    %133 = arith.mulf %129, %132 : vector<1x4xf32>
    %134 = arith.mulf %131, %131 : vector<1x4xf32>
    %135 = arith.subf %133, %134 : vector<1x4xf32>
    %cst_100 = arith.constant 0.000000e+00 : f32
    %136 = vector.broadcast %cst_100 : f32 to vector<1x4xf32>
    %137 = arith.maximumf %135, %136 : vector<1x4xf32>
    %138 = vector.shape_cast %131 : vector<1x4xf32> to vector<1x1x4xf32>
    %139 = vector.shape_cast %137 : vector<1x4xf32> to vector<1x1x4xf32>
    %cst_101 = arith.constant 9.99999974E-6 : f32
    %140 = vector.broadcast %cst_101 : f32 to vector<1x1x4xf32>
    %141 = arith.addf %139, %140 : vector<1x1x4xf32>
    %142 = math.rsqrt %141 : vector<1x1x4xf32>
    %c0_i32_102 = arith.constant 0 : i32
    %c16_i32_103 = arith.constant 16 : i32
    %143 = arith.muli %c0_i32_102, %c16_i32_103 : i32
    %144 = arith.index_cast %143 : i32 to index
    %c0_104 = arith.constant 0 : index
    %c0_105 = arith.constant 0 : index
    %145 = vector.load %arg6[%144, %c0_104, %c0_105] : memref<16x16x4xf32, #tpu.memory_space<vmem>>, vector<16x16x4xf32>
    %146 = vector.broadcast %138 : vector<1x1x4xf32> to vector<16x16x4xf32>
    %147 = arith.subf %145, %146 : vector<16x16x4xf32>
    %148 = vector.broadcast %142 : vector<1x1x4xf32> to vector<16x16x4xf32>
    %149 = arith.mulf %147, %148 : vector<16x16x4xf32>
    %c0_106 = arith.constant 0 : index
    %150 = arith.index_cast %143 : i32 to index
    %c0_107 = arith.constant 0 : index
    %c0_108 = arith.constant 0 : index
    %151 = vector.load %arg1[%c0_106, %150, %c0_107, %c0_108] : memref<1x16x16x4xf32, #tpu.memory_space<vmem>>, vector<1x16x16x4xf32>
    %152 = vector.shape_cast %151 : vector<1x16x16x4xf32> to vector<16x16x4xf32>
    %153 = arith.addf %152, %149 : vector<16x16x4xf32>
    %c0_109 = arith.constant 0 : index
    %154 = arith.index_cast %143 : i32 to index
    %c0_110 = arith.constant 0 : index
    %c0_111 = arith.constant 0 : index
    %155 = vector.load %arg4[%c0_109, %154, %c0_110, %c0_111] : memref<1x16x16x4xf32, #tpu.memory_space<vmem>>, vector<1x16x16x4xf32>
    %156 = vector.shape_cast %155 : vector<1x16x16x4xf32> to vector<16x16x4xf32>
    %157 = vector.shape_cast %153 : vector<16x16x4xf32> to vector<1x16x16x4xf32>
    tpu.vector_store %arg4[%c0_109, %154, %c0_110, %c0_111], %157 {strides = array<i32>} : memref<1x16x16x4xf32, #tpu.memory_space<vmem>>, vector<1x16x16x4xf32>,
    %c1_i32_112 = arith.constant 1 : i32
    return
  }
  func.func @transform_0(%arg0: i32) -> (i32, i32, i32, i32) {
    %c0_i32 = arith.constant 0 : i32
    %c0_i32_0 = arith.constant 0 : i32
    %c0_i32_1 = arith.constant 0 : i32
    %c0_i32_2 = arith.constant 0 : i32
    return %arg0, %c0_i32, %c0_i32_0, %c0_i32_1 : i32, i32, i32, i32
  }
  func.func @transform_1(%arg0: i32) -> (i32, i32, i32) {
    %c0_i32 = arith.constant 0 : i32
    %c0_i32_0 = arith.constant 0 : i32
    %c0_i32_1 = arith.constant 0 : i32
    %c0_i32_2 = arith.constant 0 : i32
    return %c0_i32, %c0_i32_0, %c0_i32_1 : i32, i32, i32
  }
  func.func @transform_2(%arg0: i32) -> (i32, i32, i32) {
    %c0_i32 = arith.constant 0 : i32
    %c0_i32_0 = arith.constant 0 : i32
    %c0_i32_1 = arith.constant 0 : i32
    %c0_i32_2 = arith.constant 0 : i32
    return %c0_i32, %c0_i32_0, %c0_i32_1 : i32, i32, i32
  }
  func.func @transform_3(%arg0: i32) -> (i32, i32, i32, i32) {
    %c0_i32 = arith.constant 0 : i32
    %c0_i32_0 = arith.constant 0 : i32
    %c0_i32_1 = arith.constant 0 : i32
    %c0_i32_2 = arith.constant 0 : i32
    return %arg0, %c0_i32, %c0_i32_0, %c0_i32_1 : i32, i32, i32, i32
  }
}

</mosaic_0001>

<bundles_post_ra>
// kernel: residual_block.1
= control target key start
LH: loop header
LB: loop body
LE: loop exit
PB: predicated region body
PF: predicated region fallthrough
CT: control target
= control target key end

     0   :  { %s4685_s12 = smov 0   ;;  %s6770_s0 = inlined_call_operand.vmem [shape: f32[2,16,16,4], index: 0, kind: input, shape index: {}]   ;;  %s6771_s1 = inlined_call_operand.vmem [shape: f32[3,12,4], index: 1, kind: input, shape index: {}]   ;;  %s6772_s2 = inlined_call_operand.vmem [shape: f32[3,12,4], index: 2, kind: input, shape index: {}]   ;;  %s6773_s3 = inlined_call_operand.vmem [shape: f32[2,16,16,4], index: 3, kind: output, shape index: {}]  }
   0x1 LB: > { %s3904_s13 = sadd.s32 4294967295, %s4660_s12   ;;  %p3908_p0 = scmp.ge.s32.totalorder %s4660_s12, 1  ;;  %s4660_s12 = sphi %s4685_s12, %s13_s12  }
   0x2   : > { %p137_p1 = scmp.lt.s32.totalorder %s4660_s12, 3 }
   0x4   : > { %p138_p2 = pnand %p3908_p0, %p137_p1 }
   0x6   : > { %141 = sbr.rel (%p138_p2) target bundleno = 1152 (0x480), region = 32 }
   0xb   : > { %p4693_p3 = scmp.lt.s32.totalorder %s3904_s13, 1  ;;  %vm195_vm0 = vcmask 90176   ;;  %v4662_v0 = vmov 0.0   ;;  %vm178_vm1 = vcmask 24576   ;;  %v602_v1 = vld [vmem:[%s6771_s1 + $0x8] sm:$0xf] }
   0xc   : > { %196 = vst.msk [vmem:[#allocation2 + $0x1f] sm:$0x1] %vm195_vm0, %v4662_v0  ;;  %197 = vst.msk [vmem:[#allocation2 + $0x2f] sm:$0x1] %vm195_vm0, %v4662_v0  ;;  %vm734_vm2 = vcmask 1043456   ;;  %v601_v2 = vld [vmem:[%s6771_s1] sm:$0xff] }
   0xd   : > { %198 = vst.msk [vmem:[#allocation2 + $0x3f] sm:$0x1] %vm195_vm0, %v4662_v0  ;;  %199 = vst.msk [vmem:[#allocation2 + $0x4f] sm:$0x1] %vm195_vm0, %v4662_v0  ;;  %s6785_s13 = smov (!%p4693_p3, %s3904_s13), 1  ;;  %vm171_vm3 = vcmask 97280   ;;  %4379 = vmatprep.subr.msk.mxu1 %vm734_vm2, %v602_v1 }
   0xe   : > { %200 = vst.msk [vmem:[#allocation2 + $0x5f] sm:$0x1] %vm195_vm0, %v4662_v0  ;;  %201 = vst.msk [vmem:[#allocation2 + $0x6f] sm:$0x1] %vm195_vm0, %v4662_v0  ;;  %v3914_v3 = vld [vmem:[%s6771_s1 + $0x18] sm:$0xf]  ;;  %4380 = vmatpush3.msk.msra.mxu1 %vm734_vm2, %v602_v1 }
   0xf   : > { %202 = vst.msk [vmem:[#allocation2 + $0x7f] sm:$0x1] %vm195_vm0, %v4662_v0  ;;  %203 = vst.msk [vmem:[#allocation2 + $0x8f] sm:$0x1] %vm195_vm0, %v4662_v0  ;;  %s4121_s21 = sshll.u32 %s6785_s13, 8  ;;  %vm244_vm4 = vcmask 31744   ;;  %4327 = vmatprep.subr.msk.mxu0 %vm734_vm2, %v3914_v3  ;;  %4381 = vmatprep.subr.mxu1 %v601_v2 }
  0x10   : > { %204 = vst.msk [vmem:[#allocation2 + $0x9f] sm:$0x1] %vm195_vm0, %v4662_v0  ;;  %205 = vst.msk [vmem:[#allocation2 + $0xaf] sm:$0x1] %vm195_vm0, %v4662_v0  ;;  %vm246_vm5 = vcmask 30720   ;;  %s4755_s24 = scalar_lea.vmem %s6770_s0, %s4121_s21  ;;  %4328 = vmatpush3.msk.msra.mxu0 %vm734_vm2, %v3914_v3  ;;  %v3913_v4 = vld [vmem:[%s6771_s1 + $0x10] sm:$0xff]  ;;  %4382 = vmatpush3.msra.mxu1 %v601_v2  ;;  %s6655_s23 = scalar_lea.vmem %s6773_s3, %s4121_s21 }
  0x11   : > { %206 = vst.msk [vmem:[#allocation2 + $0xbf] sm:$0x1] %vm195_vm0, %v4662_v0  ;;  %207 = vst.msk [vmem:[#allocation2 + $0xcf] sm:$0x1] %vm195_vm0, %v4662_v0  ;;  %v212_v5 = vld [vmem:[%s4755_s24] sm:$0xff]  ;;  %v213_v6 = vld [vmem:[%s4755_s24 + $0x8] sm:$0xff]  ;;  %4329 = vmatprep.subr.mxu0 %v3913_v4 }
  0x12   : > { %208 = vst.msk [vmem:[#allocation2 + $0xdf] sm:$0x1] %vm195_vm0, %v4662_v0  ;;  %209 = vst.msk [vmem:[#allocation2 + $0xef] sm:$0x1] %vm195_vm0, %v4662_v0  ;;  %v4764_v7 = vld [vmem:[%s4755_s24 + $0x18] sm:$0xff]  ;;  %s4663_s27 = smov 8   ;;  %4330 = vmatpush3.msra.mxu0 %v3913_v4 }
  0x13   : > { %210 = vst.msk [vmem:[#allocation2 + $0xff] sm:$0x1] %vm195_vm0, %v4662_v0  ;;  %211 = vst.msk [vmem:[#allocation2 + $0x10f] sm:$0x1] %vm195_vm0, %v4662_v0  ;;  %439 = vrot.lane.b32.xlu1 %v212_v5, %s4663_s27  ;;  %s4664_s28 = smov 4   ;;  %v4773_v8 = vld [vmem:[%s4755_s24 + $0x10] sm:$0xff] }
  0x14   : > { %179 = vst.msk [vmem:[#allocation2 + $0x10] sm:$0x1] %vm178_vm1, %v4662_v0  ;;  %180 = vst.msk [vmem:[#allocation2 + $0x20] sm:$0x1] %vm178_vm1, %v4662_v0  ;;  %310 = vrot.lane.b32.xlu0 %v212_v5, %s4664_s28  ;;  %v4776_v9 = vld [vmem:[%s4755_s24 + $0x28] sm:$0xff]  ;;  %v4783_v10 = vld [vmem:[%s4755_s24 + $0x20] sm:$0xff] }
  0x15   : > { %181 = vst.msk [vmem:[#allocation2 + $0x30] sm:$0x1] %vm178_vm1, %v4662_v0  ;;  %182 = vst.msk [vmem:[#allocation2 + $0x40] sm:$0x1] %vm178_vm1, %v4662_v0  ;;  %v4786_v11 = vld [vmem:[%s4755_s24 + $0x38] sm:$0xff]  ;;  %v4789_v12 = vld [vmem:[%s4755_s24 + $0x30] sm:$0xff] }
  0x16   : > { %183 = vst.msk [vmem:[#allocation2 + $0x50] sm:$0x1] %vm178_vm1, %v4662_v0  ;;  %184 = vst.msk [vmem:[#allocation2 + $0x60] sm:$0x1] %vm178_vm1, %v4662_v0  ;;  %v4798_v13 = vld [vmem:[%s4755_s24 + $0x48] sm:$0xff]  ;;  %v4801_v14 = vld [vmem:[%s4755_s24 + $0x40] sm:$0xff] }
  0x17   : > { %185 = vst.msk [vmem:[#allocation2 + $0x70] sm:$0x1] %vm178_vm1, %v4662_v0  ;;  %186 = vst.msk [vmem:[#allocation2 + $0x80] sm:$0x1] %vm178_vm1, %v4662_v0  ;;  %v4804_v15 = vld [vmem:[%s4755_s24 + $0x58] sm:$0xff]  ;;  %v4813_v16 = vld [vmem:[%s4755_s24 + $0x50] sm:$0xff]  ;;  %441 = vrot.lane.b32.xlu1 %v213_v6, %s4663_s27 }
  0x18   : > { %187 = vst.msk [vmem:[#allocation2 + $0x90] sm:$0x1] %vm178_vm1, %v4662_v0  ;;  %188 = vst.msk [vmem:[#allocation2 + $0xa0] sm:$0x1] %vm178_vm1, %v4662_v0  ;;  %v4816_v17 = vld [vmem:[%s4755_s24 + $0x68] sm:$0xff]  ;;  %v4819_v18 = vld [vmem:[%s4755_s24 + $0x60] sm:$0xff]  ;;  %312 = vrot.lane.b32.xlu0 %v213_v6, %s4664_s28 }
  0x19   : > { %189 = vst.msk [vmem:[#allocation2 + $0xb0] sm:$0x1] %vm178_vm1, %v4662_v0  ;;  %190 = vst.msk [vmem:[#allocation2 + $0xc0] sm:$0x1] %vm178_vm1, %v4662_v0  ;;  %v4830_v19 = vld [vmem:[%s4755_s24 + $0x78] sm:$0xff]  ;;  %v4833_v20 = vld [vmem:[%s4755_s24 + $0x70] sm:$0xff] }
  0x1a   : > { %191 = vst.msk [vmem:[#allocation2 + $0xd0] sm:$0x1] %vm178_vm1, %v4662_v0  ;;  %192 = vst.msk [vmem:[#allocation2 + $0xe0] sm:$0x1] %vm178_vm1, %v4662_v0  ;;  %v4840_v22 = vld [vmem:[%s4755_s24 + $0x88] sm:$0xff]  ;;  %v4843_v23 = vld [vmem:[%s4755_s24 + $0x80] sm:$0xff] }
  0x1b   : > { %193 = vst.msk [vmem:[#allocation2 + $0xf0] sm:$0x1] %vm178_vm1, %v4662_v0  ;;  %194 = vst.msk [vmem:[#allocation2 + $0x100] sm:$0x1] %vm178_vm1, %v4662_v0  ;;  %v4846_v24 = vld [vmem:[%s4755_s24 + $0x98] sm:$0xff]  ;;  %v4856_v25 = vld [vmem:[%s4755_s24 + $0x90] sm:$0xff]  ;;  %316 = vrot.lane.b32.xlu1 %v4764_v7, %s4664_s28 }
  0x1c   : > { %172 = vst.msk [vmem:[#allocation2] sm:$0xff] %vm171_vm3, %v4662_v0  ;;  %173 = vst.msk [vmem:[#allocation2 + $0x8] sm:$0xff] %vm171_vm3, %v4662_v0  ;;  %v4859_v26 = vld [vmem:[%s4755_s24 + $0xa8] sm:$0xff]  ;;  %v4862_v27 = vld [vmem:[%s4755_s24 + $0xa0] sm:$0xff]  ;;  %314 = vrot.lane.b32.xlu0 %v4773_v8, %s4664_s28  ;;  %vm406_vm6 = vcmask 64544   ;;  %vm535_vm7 = vcmask 97345  }
  0x1d   : > { %175 = vst.msk [vmem:[#allocation2 + $0x110] sm:$0xff] %vm171_vm3, %v4662_v0  ;;  %176 = vst.msk [vmem:[#allocation2 + $0x118] sm:$0xff] %vm171_vm3, %v4662_v0  ;;  %v4871_v28 = vld [vmem:[%s4755_s24 + $0xb8] sm:$0xff]  ;;  %v4874_v29 = vld [vmem:[%s4755_s24 + $0xb0] sm:$0xff]  ;;  %vm537_vm8 = vcmask 97344  }
  0x1e   : > { %245 = vst.msk [vmem:[#allocation2 + $0x11] sm:$0xff] %vm244_vm4, %v212_v5  ;;  %248 = vst.msk [vmem:[#allocation2 + $0x21] sm:$0xff] %vm244_vm4, %v4773_v8  ;;  %v4877_v30 = vld [vmem:[%s4755_s24 + $0xc8] sm:$0xff]  ;;  %v236_v31 = vld [vmem:[%s4755_s24 + $0xc0] sm:$0xff] }
  0x1f   : > { %247 = vst.msk [vmem:[#allocation2 + $0x19] sm:$0x7f] %vm246_vm5, %v213_v6  ;;  %249 = vst.msk [vmem:[#allocation2 + $0x29] sm:$0x7f] %vm246_vm5, %v4764_v7  ;;  %v4891_v32 = vld [vmem:[%s4755_s24 + $0xd8] sm:$0xff]  ;;  %v238_v34 = vld [vmem:[%s4755_s24 + $0xd0] sm:$0xff]  ;;  %445 = vrot.lane.b32.xlu1 %v4764_v7, %s4663_s27 }
  0x20   : > { %251 = vst.msk [vmem:[#allocation2 + $0x39] sm:$0x7f] %vm246_vm5, %v4776_v9  ;;  %253 = vst.msk [vmem:[#allocation2 + $0x49] sm:$0x7f] %vm246_vm5, %v4786_v11  ;;  %v4898_v35 = vld [vmem:[%s4755_s24 + $0xe8] sm:$0xff]  ;;  %v4901_v36 = vld [vmem:[%s4755_s24 + $0xe0] sm:$0xff]  ;;  %443 = vrot.lane.b32.xlu0 %v4773_v8, %s4663_s27 }
  0x21   : > { %250 = vst.msk [vmem:[#allocation2 + $0x31] sm:$0xff] %vm244_vm4, %v4783_v10  ;;  %252 = vst.msk [vmem:[#allocation2 + $0x41] sm:$0xff] %vm244_vm4, %v4789_v12  ;;  %v4910_v37 = vld [vmem:[%s4755_s24 + $0xf8] sm:$0xff]  ;;  %v4913_v38 = vld [vmem:[%s4755_s24 + $0xf0] sm:$0xff] }
  0x22   : > { %255 = vst.msk [vmem:[#allocation2 + $0x59] sm:$0x7f] %vm246_vm5, %v4798_v13  ;;  %257 = vst.msk [vmem:[#allocation2 + $0x69] sm:$0x7f] %vm246_vm5, %v4804_v15  ;;  %v4970_v39 = vld [vmem:[%s6771_s1 + $0x28] sm:$0xf] }
  0x23   : > { %254 = vst.msk [vmem:[#allocation2 + $0x51] sm:$0xff] %vm244_vm4, %v4801_v14  ;;  %256 = vst.msk [vmem:[#allocation2 + $0x61] sm:$0xff] %vm244_vm4, %v4813_v16  ;;  %v569_v21 = vld [vmem:[#allocation2] sm:$0xff]  ;;  %v570_v33 = vld [vmem:[#allocation2 + $0x8] sm:$0xff]  ;;  %320 = vrot.lane.b32.xlu1 %v4776_v9, %s4664_s28  ;;  %4431 = vmatprep.subr.msk.mxu0 %vm734_vm2, %v4970_v39 }
  0x24   : > { %259 = vst.msk [vmem:[#allocation2 + $0x79] sm:$0x7f] %vm246_vm5, %v4816_v17  ;;  %261 = vst.msk [vmem:[#allocation2 + $0x89] sm:$0x7f] %vm246_vm5, %v4830_v19  ;;  %4383 = vmatprep.mubr.msk.f32.mxu1 %vm171_vm3, %v569_v21  ;;  %318 = vrot.lane.b32.xlu0 %v4783_v10, %s4664_s28  ;;  %v3981_v50 = vld [vmem:[%s6771_s1 + $0x20] sm:$0xff] }
  0x25   : > { %258 = vst.msk [vmem:[#allocation2 + $0x71] sm:$0xff] %vm244_vm4, %v4819_v18  ;;  %260 = vst.msk [vmem:[#allocation2 + $0x81] sm:$0xff] %vm244_vm4, %v4833_v20  ;;  %4384 = vmatmul.mubr.msk.f32.vlgmr.msra.gmra.mxu1 %vm171_vm3, %v570_v33 }
  0x26   : > { %263 = vst.msk [vmem:[#allocation2 + $0x99] sm:$0x7f] %vm246_vm5, %v4840_v22  ;;  %265 = vst.msk [vmem:[#allocation2 + $0xa9] sm:$0x7f] %vm246_vm5, %v4846_v24 }
  0x27   : > { %262 = vst.msk [vmem:[#allocation2 + $0x91] sm:$0xff] %vm244_vm4, %v4843_v23  ;;  %264 = vst.msk [vmem:[#allocation2 + $0xa1] sm:$0xff] %vm244_vm4, %v4856_v25  ;;  %449 = vrot.lane.b32.xlu1 %v4776_v9, %s4663_s27 }
  0x28   : > { %267 = vst.msk [vmem:[#allocation2 + $0xb9] sm:$0x7f] %vm246_vm5, %v4859_v26  ;;  %269 = vst.msk [vmem:[#allocation2 + $0xc9] sm:$0x7f] %vm246_vm5, %v4871_v28  ;;  %447 = vrot.lane.b32.xlu0 %v4783_v10, %s4663_s27 }
  0x29   : > { %266 = vst.msk [vmem:[#allocation2 + $0xb1] sm:$0xff] %vm244_vm4, %v4862_v27  ;;  %268 = vst.msk [vmem:[#allocation2 + $0xc1] sm:$0xff] %vm244_vm4, %v4874_v29 }
  0x2a   : > { %271 = vst.msk [vmem:[#allocation2 + $0xd9] sm:$0x7f] %vm246_vm5, %v4877_v30  ;;  %273 = vst.msk [vmem:[#allocation2 + $0xe9] sm:$0x7f] %vm246_vm5, %v4891_v32 }
  0x2b   : > { %270 = vst.msk [vmem:[#allocation2 + $0xd1] sm:$0xff] %vm244_vm4, %v236_v31  ;;  %272 = vst.msk [vmem:[#allocation2 + $0xe1] sm:$0xff] %vm244_vm4, %v238_v34  ;;  %324 = vrot.lane.b32.xlu1 %v4786_v11, %s4664_s28 }
  0x2c   : > { %275 = vst.msk [vmem:[#allocation2 + $0xf9] sm:$0x7f] %vm246_vm5, %v4898_v35  ;;  %277 = vst.msk [vmem:[#allocation2 + $0x109] sm:$0x7f] %vm246_vm5, %v4910_v37  ;;  %322 = vrot.lane.b32.xlu0 %v4789_v12, %s4664_s28 }
  0x2d   : > { %274 = vst.msk [vmem:[#allocation2 + $0xf1] sm:$0xff] %vm244_vm4, %v4901_v36  ;;  %276 = vst.msk [vmem:[#allocation2 + $0x101] sm:$0xff] %vm244_vm4, %v4913_v38 }
  0x2f   : > { %453 = vrot.lane.b32.xlu1 %v4786_v11, %s4663_s27 }
  0x30   : > { %451 = vrot.lane.b32.xlu0 %v4789_v12, %s4663_s27 }
  0x33   : > { %328 = vrot.lane.b32.xlu1 %v4798_v13, %s4664_s28 }
  0x34   : > { %326 = vrot.lane.b32.xlu0 %v4801_v14, %s4664_s28 }
  0x37   : > { %457 = vrot.lane.b32.xlu1 %v4798_v13, %s4663_s27 }
  0x38   : > { %455 = vrot.lane.b32.xlu0 %v4801_v14, %s4663_s27 }
  0x3b   : > { %332 = vrot.lane.b32.xlu1 %v4804_v15, %s4664_s28 }
  0x3c   : > { %330 = vrot.lane.b32.xlu0 %v4813_v16, %s4664_s28 }
  0x3f   : > { %461 = vrot.lane.b32.xlu1 %v4804_v15, %s4663_s27 }
  0x40   : > { %459 = vrot.lane.b32.xlu0 %v4813_v16, %s4663_s27 }
  0x43   : > { %336 = vrot.lane.b32.xlu1 %v4816_v17, %s4664_s28 }
  0x44   : > { %334 = vrot.lane.b32.xlu0 %v4819_v18, %s4664_s28 }
  0x47   : > { %465 = vrot.lane.b32.xlu1 %v4816_v17, %s4663_s27 }
  0x48   : > { %463 = vrot.lane.b32.xlu0 %v4819_v18, %s4663_s27 }
  0x4b   : > { %340 = vrot.lane.b32.xlu1 %v4830_v19, %s4664_s28 }
  0x4c   : > { %338 = vrot.lane.b32.xlu0 %v4833_v20, %s4664_s28 }
  0x4f   : > { %469 = vrot.lane.b32.xlu1 %v4830_v19, %s4663_s27 }
  0x50   : > { %467 = vrot.lane.b32.xlu0 %v4833_v20, %s4663_s27 }
  0x53   : > { %344 = vrot.lane.b32.xlu1 %v4840_v22, %s4664_s28 }
  0x54   : > { %342 = vrot.lane.b32.xlu0 %v4843_v23, %s4664_s28 }
  0x57   : > { %473 = vrot.lane.b32.xlu1 %v4840_v22, %s4663_s27 }
  0x58   : > { %471 = vrot.lane.b32.xlu0 %v4843_v23, %s4663_s27 }
  0x5b   : > { %348 = vrot.lane.b32.xlu1 %v4846_v24, %s4664_s28 }
  0x5c   : > { %346 = vrot.lane.b32.xlu0 %v4856_v25, %s4664_s28 }
  0x5f   : > { %477 = vrot.lane.b32.xlu1 %v4846_v24, %s4663_s27 }
  0x60   : > { %475 = vrot.lane.b32.xlu0 %v4856_v25, %s4663_s27 }
  0x63   : > { %352 = vrot.lane.b32.xlu1 %v4859_v26, %s4664_s28 }
  0x64   : > { %350 = vrot.lane.b32.xlu0 %v4862_v27, %s4664_s28 }
  0x67   : > { %481 = vrot.lane.b32.xlu1 %v4859_v26, %s4663_s27 }
  0x68   : > { %479 = vrot.lane.b32.xlu0 %v4862_v27, %s4663_s27 }
  0x6b   : > { %356 = vrot.lane.b32.xlu1 %v4871_v28, %s4664_s28 }
  0x6c   : > { %354 = vrot.lane.b32.xlu0 %v4874_v29, %s4664_s28 }
  0x6f   : > { %485 = vrot.lane.b32.xlu1 %v4871_v28, %s4663_s27 }
  0x70   : > { %483 = vrot.lane.b32.xlu0 %v4874_v29, %s4663_s27 }
  0x73   : > { %360 = vrot.lane.b32.xlu1 %v4877_v30, %s4664_s28 }
  0x74   : > { %358 = vrot.lane.b32.xlu0 %v236_v31, %s4664_s28 }
  0x77   : > { %489 = vrot.lane.b32.xlu1 %v4877_v30, %s4663_s27 }
  0x78   : > { %487 = vrot.lane.b32.xlu0 %v236_v31, %s4663_s27 }
  0x7b   : > { %364 = vrot.lane.b32.xlu1 %v4891_v32, %s4664_s28 }
  0x7c   : > { %362 = vrot.lane.b32.xlu0 %v238_v34, %s4664_s28 }
  0x7f   : > { %493 = vrot.lane.b32.xlu1 %v4891_v32, %s4663_s27 }
  0x80   : > { %491 = vrot.lane.b32.xlu0 %v238_v34, %s4663_s27 }
  0x83   : > { %368 = vrot.lane.b32.xlu1 %v4898_v35, %s4664_s28 }
  0x84   : > { %366 = vrot.lane.b32.xlu0 %v4901_v36, %s4664_s28 }
  0x85   : > { %v440_v40 = vpop.permute.xlu1 %439 }
  0x86   : > { %v311_v41 = vpop.permute.xlu0 %310 }
  0x87   : > { %407 = vst.msk [vmem:[#allocation2 + $0x10] sm:$0xff] %vm406_vm6, %v311_v41  ;;  %497 = vrot.lane.b32.xlu1 %v4898_v35, %s4663_s27 }
  0x88   : > { %536 = vst.msk [vmem:[#allocation2 + $0xf] sm:$0xfe] %vm535_vm7, %v440_v40  ;;  %495 = vrot.lane.b32.xlu0 %v4901_v36, %s4663_s27 }
  0x89   : > { %v442_v42 = vpop.permute.xlu1 %441 }
  0x8a   : > { %v313_v43 = vpop.permute.xlu0 %312 }
  0x8b   : > { %408 = vst.msk [vmem:[#allocation2 + $0x18] sm:$0xff] %vm406_vm6, %v313_v43  ;;  %372 = vrot.lane.b32.xlu1 %v4910_v37, %s4664_s28 }
  0x8c   : > { %538 = vst.msk [vmem:[#allocation2 + $0x17] sm:$0xff] %vm537_vm8, %v442_v42  ;;  %370 = vrot.lane.b32.xlu0 %v4913_v38, %s4664_s28 }
  0x8d   : > { %v317_v44 = vpop.permute.xlu1 %316 }
  0x8e   : > { %v315_v45 = vpop.permute.xlu0 %314  ;;  %410 = vst.msk [vmem:[#allocation2 + $0x28] sm:$0xff] %vm406_vm6, %v317_v44 }
  0x8f   : > { %409 = vst.msk [vmem:[#allocation2 + $0x20] sm:$0xff] %vm406_vm6, %v315_v45  ;;  %501 = vrot.lane.b32.xlu1 %v4910_v37, %s4663_s27 }
  0x90   : > { %499 = vrot.lane.b32.xlu0 %v4913_v38, %s4663_s27 }
  0x91   : > { %v446_v46 = vpop.permute.xlu1 %445 }
  0x92   : > { %v444_v47 = vpop.permute.xlu0 %443  ;;  %540 = vst.msk [vmem:[#allocation2 + $0x27] sm:$0xff] %vm537_vm8, %v446_v46 }
  0x93   : > { %539 = vst.msk [vmem:[#allocation2 + $0x1f] sm:$0xfe] %vm535_vm7, %v444_v47  ;;  %v603_v48 = vld [vmem:[#allocation2 + $0x10] sm:$0xff]  ;;  %v604_v49 = vld [vmem:[#allocation2 + $0x18] sm:$0xff] }
  0x94   : > { %4331 = vmatprep.mubr.msk.f32.mxu0 %vm171_vm3, %v603_v48  ;;  %4386 = vmatprep.mubr.msk.f32.mxu1 %vm171_vm3, %v603_v48 }
  0x95   : > { %4332 = vmatmul.mubr.msk.f32.vlgmr.msra.gmra.mxu0 %vm171_vm3, %v604_v49  ;;  %4387 = vmatmul.mubr.msk.f32.gmra.mxu1 %vm171_vm3, %v604_v49  ;;  %v321_v51 = vpop.permute.xlu1 %320 }
  0x96   : > { %v319_v52 = vpop.permute.xlu0 %318  ;;  %4432 = vmatpush3.msk.msra.mxu0 %vm734_vm2, %v4970_v39  ;;  %412 = vst.msk [vmem:[#allocation2 + $0x38] sm:$0xff] %vm406_vm6, %v321_v51 }
  0x97   : > { %411 = vst.msk [vmem:[#allocation2 + $0x30] sm:$0xff] %vm406_vm6, %v319_v52  ;;  %4433 = vmatprep.subr.mxu0 %v3981_v50 }
  0x98   : > { %4434 = vmatpush3.msra.mxu0 %v3981_v50 }
  0x99   : > { %v450_v53 = vpop.permute.xlu1 %449  ;;  %v5059_v56 = vld [vmem:[#allocation2 + $0x28] sm:$0xff] }
  0x9a   : > { %v448_v54 = vpop.permute.xlu0 %447  ;;  %v5057_v55 = vld [vmem:[#allocation2 + $0x20] sm:$0xff]  ;;  %542 = vst.msk [vmem:[#allocation2 + $0x37] sm:$0xff] %vm537_vm8, %v450_v53 }
  0x9b   : > { %541 = vst.msk [vmem:[#allocation2 + $0x2f] sm:$0xfe] %vm535_vm7, %v448_v54  ;;  %4334 = vmatprep.mubr.msk.f32.mxu0 %vm171_vm3, %v5057_v55  ;;  %4389 = vmatprep.mubr.msk.f32.mxu1 %vm171_vm3, %v5057_v55 }
  0x9c   : > { %4335 = vmatmul.mubr.msk.f32.gmra.mxu0 %vm171_vm3, %v5059_v56  ;;  %4390 = vmatmul.mubr.msk.f32.gmra.mxu1 %vm171_vm3, %v5059_v56 }
  0x9d   : > { %v325_v57 = vpop.permute.xlu1 %324 }
  0x9e   : > { %v323_v58 = vpop.permute.xlu0 %322  ;;  %414 = vst.msk [vmem:[#allocation2 + $0x48] sm:$0xff] %vm406_vm6, %v325_v57 }
  0x9f   : > { %413 = vst.msk [vmem:[#allocation2 + $0x40] sm:$0xff] %vm406_vm6, %v323_v58 }
  0xa1   : > { %v454_v59 = vpop.permute.xlu1 %453  ;;  %v5075_v62 = vld [vmem:[#allocation2 + $0x38] sm:$0xff] }
  0xa2   : > { %v452_v60 = vpop.permute.xlu0 %451  ;;  %v5073_v61 = vld [vmem:[#allocation2 + $0x30] sm:$0xff]  ;;  %544 = vst.msk [vmem:[#allocation2 + $0x47] sm:$0xff] %vm537_vm8, %v454_v59 }
  0xa3   : > { %543 = vst.msk [vmem:[#allocation2 + $0x3f] sm:$0xfe] %vm535_vm7, %v452_v60  ;;  %4337 = vmatprep.mubr.msk.f32.mxu0 %vm171_vm3, %v5073_v61  ;;  %4392 = vmatprep.mubr.msk.f32.mxu1 %vm171_vm3, %v5073_v61 }
  0xa4   : > { %4338 = vmatmul.mubr.msk.f32.gmra.mxu0 %vm171_vm3, %v5075_v62  ;;  %4393 = vmatmul.mubr.msk.f32.gmra.mxu1 %vm171_vm3, %v5075_v62 }
  0xa5   : > { %v329_v63 = vpop.permute.xlu1 %328 }
  0xa6   : > { %v327_v0 = vpop.permute.xlu0 %326  ;;  %416 = vst.msk [vmem:[#allocation2 + $0x58] sm:$0xff] %vm406_vm6, %v329_v63 }
  0xa7   : > { %415 = vst.msk [vmem:[#allocation2 + $0x50] sm:$0xff] %vm406_vm6, %v327_v0 }
  0xa9   : > { %v458_v1 = vpop.permute.xlu1 %457  ;;  %v5091_v4 = vld [vmem:[#allocation2 + $0x48] sm:$0xff] }
  0xaa   : > { %v456_v2 = vpop.permute.xlu0 %455  ;;  %v5089_v3 = vld [vmem:[#allocation2 + $0x40] sm:$0xff]  ;;  %546 = vst.msk [vmem:[#allocation2 + $0x57] sm:$0xff] %vm537_vm8, %v458_v1 }
  0xab   : > { %545 = vst.msk [vmem:[#allocation2 + $0x4f] sm:$0xfe] %vm535_vm7, %v456_v2  ;;  %4340 = vmatprep.mubr.msk.f32.mxu0 %vm171_vm3, %v5089_v3  ;;  %4395 = vmatprep.mubr.msk.f32.mxu1 %vm171_vm3, %v5089_v3 }
  0xac   : > { %4341 = vmatmul.mubr.msk.f32.gmra.mxu0 %vm171_vm3, %v5091_v4  ;;  %4396 = vmatmul.mubr.msk.f32.gmra.mxu1 %vm171_vm3, %v5091_v4 }
  0xad   : > { %v333_v5 = vpop.permute.xlu1 %332 }
  0xae   : > { %v331_v6 = vpop.permute.xlu0 %330  ;;  %418 = vst.msk [vmem:[#allocation2 + $0x68] sm:$0xff] %vm406_vm6, %v333_v5 }
  0xaf   : > { %417 = vst.msk [vmem:[#allocation2 + $0x60] sm:$0xff] %vm406_vm6, %v331_v6 }
  0xb1   : > { %v462_v7 = vpop.permute.xlu1 %461  ;;  %v5107_v10 = vld [vmem:[#allocation2 + $0x58] sm:$0xff] }
  0xb2   : > { %v460_v8 = vpop.permute.xlu0 %459  ;;  %v5105_v9 = vld [vmem:[#allocation2 + $0x50] sm:$0xff]  ;;  %548 = vst.msk [vmem:[#allocation2 + $0x67] sm:$0xff] %vm537_vm8, %v462_v7 }
  0xb3   : > { %547 = vst.msk [vmem:[#allocation2 + $0x5f] sm:$0xfe] %vm535_vm7, %v460_v8  ;;  %4343 = vmatprep.mubr.msk.f32.mxu0 %vm171_vm3, %v5105_v9  ;;  %4398 = vmatprep.mubr.msk.f32.mxu1 %vm171_vm3, %v5105_v9 }
  0xb4   : > { %4344 = vmatmul.mubr.msk.f32.gmra.mxu0 %vm171_vm3, %v5107_v10  ;;  %4399 = vmatmul.mubr.msk.f32.gmra.mxu1 %vm171_vm3, %v5107_v10 }
  0xb5   : > { %v337_v11 = vpop.permute.xlu1 %336 }
  0xb6   : > { %v335_v12 = vpop.permute.xlu0 %334  ;;  %420 = vst.msk [vmem:[#allocation2 + $0x78] sm:$0xff] %vm406_vm6, %v337_v11 }
  0xb7   : > { %419 = vst.msk [vmem:[#allocation2 + $0x70] sm:$0xff] %vm406_vm6, %v335_v12 }
  0xb9   : > { %v466_v13 = vpop.permute.xlu1 %465  ;;  %v5123_v16 = vld [vmem:[#allocation2 + $0x68] sm:$0xff] }
  0xba   : > { %v464_v14 = vpop.permute.xlu0 %463  ;;  %v5121_v15 = vld [vmem:[#allocation2 + $0x60] sm:$0xff]  ;;  %550 = vst.msk [vmem:[#allocation2 + $0x77] sm:$0xff] %vm537_vm8, %v466_v13 }
  0xbb   : > { %549 = vst.msk [vmem:[#allocation2 + $0x6f] sm:$0xfe] %vm535_vm7, %v464_v14  ;;  %4346 = vmatprep.mubr.msk.f32.mxu0 %vm171_vm3, %v5121_v15  ;;  %4401 = vmatprep.mubr.msk.f32.mxu1 %vm171_vm3, %v5121_v15 }
  0xbc   : > { %4347 = vmatmul.mubr.msk.f32.gmra.mxu0 %vm171_vm3, %v5123_v16  ;;  %4402 = vmatmul.mubr.msk.f32.gmra.mxu1 %vm171_vm3, %v5123_v16 }
  0xbd   : > { %v341_v17 = vpop.permute.xlu1 %340 }
  0xbe   : > { %v339_v18 = vpop.permute.xlu0 %338  ;;  %422 = vst.msk [vmem:[#allocation2 + $0x88] sm:$0xff] %vm406_vm6, %v341_v17 }
  0xbf   : > { %421 = vst.msk [vmem:[#allocation2 + $0x80] sm:$0xff] %vm406_vm6, %v339_v18 }
  0xc1   : > { %v470_v19 = vpop.permute.xlu1 %469  ;;  %v5139_v22 = vld [vmem:[#allocation2 + $0x78] sm:$0xff] }
  0xc2   : > { %v468_v20 = vpop.permute.xlu0 %467  ;;  %v5137_v21 = vld [vmem:[#allocation2 + $0x70] sm:$0xff]  ;;  %552 = vst.msk [vmem:[#allocation2 + $0x87] sm:$0xff] %vm537_vm8, %v470_v19 }
  0xc3   : > { %551 = vst.msk [vmem:[#allocation2 + $0x7f] sm:$0xfe] %vm535_vm7, %v468_v20  ;;  %4349 = vmatprep.mubr.msk.f32.mxu0 %vm171_vm3, %v5137_v21  ;;  %4404 = vmatprep.mubr.msk.f32.mxu1 %vm171_vm3, %v5137_v21 }
  0xc4   : > { %4350 = vmatmul.mubr.msk.f32.gmra.mxu0 %vm171_vm3, %v5139_v22  ;;  %4405 = vmatmul.mubr.msk.f32.gmra.mxu1 %vm171_vm3, %v5139_v22 }
  0xc5   : > { %v345_v23 = vpop.permute.xlu1 %344 }
  0xc6   : > { %v343_v24 = vpop.permute.xlu0 %342  ;;  %424 = vst.msk [vmem:[#allocation2 + $0x98] sm:$0xff] %vm406_vm6, %v345_v23 }
  0xc7   : > { %423 = vst.msk [vmem:[#allocation2 + $0x90] sm:$0xff] %vm406_vm6, %v343_v24 }
  0xc9   : > { %v474_v25 = vpop.permute.xlu1 %473  ;;  %v5155_v28 = vld [vmem:[#allocation2 + $0x88] sm:$0xff] }
  0xca   : > { %v472_v26 = vpop.permute.xlu0 %471  ;;  %v5153_v27 = vld [vmem:[#allocation2 + $0x80] sm:$0xff]  ;;  %554 = vst.msk [vmem:[#allocation2 + $0x97] sm:$0xff] %vm537_vm8, %v474_v25 }
  0xcb   : > { %553 = vst.msk [vmem:[#allocation2 + $0x8f] sm:$0xfe] %vm535_vm7, %v472_v26  ;;  %4352 = vmatprep.mubr.msk.f32.mxu0 %vm171_vm3, %v5153_v27  ;;  %4407 = vmatprep.mubr.msk.f32.mxu1 %vm171_vm3, %v5153_v27 }
  0xcc   : > { %4353 = vmatmul.mubr.msk.f32.gmra.mxu0 %vm171_vm3, %v5155_v28  ;;  %4408 = vmatmul.mubr.msk.f32.gmra.mxu1 %vm171_vm3, %v5155_v28 }
  0xcd   : > { %v349_v29 = vpop.permute.xlu1 %348 }
  0xce   : > { %v347_v30 = vpop.permute.xlu0 %346  ;;  %426 = vst.msk [vmem:[#allocation2 + $0xa8] sm:$0xff] %vm406_vm6, %v349_v29 }
  0xcf   : > { %425 = vst.msk [vmem:[#allocation2 + $0xa0] sm:$0xff] %vm406_vm6, %v347_v30 }
  0xd1   : > { %v478_v31 = vpop.permute.xlu1 %477  ;;  %v5171_v34 = vld [vmem:[#allocation2 + $0x98] sm:$0xff] }
  0xd2   : > { %v476_v32 = vpop.permute.xlu0 %475  ;;  %v5169_v33 = vld [vmem:[#allocation2 + $0x90] sm:$0xff]  ;;  %556 = vst.msk [vmem:[#allocation2 + $0xa7] sm:$0xff] %vm537_vm8, %v478_v31 }
  0xd3   : > { %555 = vst.msk [vmem:[#allocation2 + $0x9f] sm:$0xfe] %vm535_vm7, %v476_v32  ;;  %4355 = vmatprep.mubr.msk.f32.mxu0 %vm171_vm3, %v5169_v33  ;;  %4410 = vmatprep.mubr.msk.f32.mxu1 %vm171_vm3, %v5169_v33 }
  0xd4   : > { %4356 = vmatmul.mubr.msk.f32.gmra.mxu0 %vm171_vm3, %v5171_v34  ;;  %4411 = vmatmul.mubr.msk.f32.gmra.mxu1 %vm171_vm3, %v5171_v34 }
  0xd5   : > { %v353_v35 = vpop.permute.xlu1 %352 }
  0xd6   : > { %v351_v36 = vpop.permute.xlu0 %350  ;;  %428 = vst.msk [vmem:[#allocation2 + $0xb8] sm:$0xff] %vm406_vm6, %v353_v35 }
  0xd7   : > { %427 = vst.msk [vmem:[#allocation2 + $0xb0] sm:$0xff] %vm406_vm6, %v351_v36 }
  0xd9   : > { %v482_v37 = vpop.permute.xlu1 %481  ;;  %v5187_v40 = vld [vmem:[#allocation2 + $0xa8] sm:$0xff] }
  0xda   : > { %v480_v38 = vpop.permute.xlu0 %479  ;;  %v5185_v39 = vld [vmem:[#allocation2 + $0xa0] sm:$0xff]  ;;  %558 = vst.msk [vmem:[#allocation2 + $0xb7] sm:$0xff] %vm537_vm8, %v482_v37 }
  0xdb   : > { %557 = vst.msk [vmem:[#allocation2 + $0xaf] sm:$0xfe] %vm535_vm7, %v480_v38  ;;  %4358 = vmatprep.mubr.msk.f32.mxu0 %vm171_vm3, %v5185_v39  ;;  %4413 = vmatprep.mubr.msk.f32.mxu1 %vm171_vm3, %v5185_v39 }
  0xdc   : > { %4359 = vmatmul.mubr.msk.f32.gmra.mxu0 %vm171_vm3, %v5187_v40  ;;  %4414 = vmatmul.mubr.msk.f32.gmra.mxu1 %vm171_vm3, %v5187_v40 }
  0xdd   : > { %v357_v41 = vpop.permute.xlu1 %356 }
  0xde   : > { %v355_v42 = vpop.permute.xlu0 %354  ;;  %430 = vst.msk [vmem:[#allocation2 + $0xc8] sm:$0xff] %vm406_vm6, %v357_v41 }
  0xdf   : > { %429 = vst.msk [vmem:[#allocation2 + $0xc0] sm:$0xff] %vm406_vm6, %v355_v42 }
  0xe1   : > { %v486_v43 = vpop.permute.xlu1 %485  ;;  %v5203_v46 = vld [vmem:[#allocation2 + $0xb8] sm:$0xff] }
  0xe2   : > { %v484_v44 = vpop.permute.xlu0 %483  ;;  %v5201_v45 = vld [vmem:[#allocation2 + $0xb0] sm:$0xff]  ;;  %560 = vst.msk [vmem:[#allocation2 + $0xc7] sm:$0xff] %vm537_vm8, %v486_v43 }
  0xe3   : > { %559 = vst.msk [vmem:[#allocation2 + $0xbf] sm:$0xfe] %vm535_vm7, %v484_v44  ;;  %4361 = vmatprep.mubr.msk.f32.mxu0 %vm171_vm3, %v5201_v45  ;;  %4416 = vmatprep.mubr.msk.f32.mxu1 %vm171_vm3, %v5201_v45 }
  0xe4   : > { %4362 = vmatmul.mubr.msk.f32.gmra.mxu0 %vm171_vm3, %v5203_v46  ;;  %4417 = vmatmul.mubr.msk.f32.gmra.mxu1 %vm171_vm3, %v5203_v46 }
  0xe5   : > { %v361_v47 = vpop.permute.xlu1 %360  ;;  %v4385_v30 = vpop.f32.mrf.mxu1 }
  0xe6   : > { %v359_v48 = vpop.permute.xlu0 %358  ;;  %432 = vst.msk [vmem:[#allocation2 + $0xd8] sm:$0xff] %vm406_vm6, %v361_v47 }
  0xe7   : > { %431 = vst.msk [vmem:[#allocation2 + $0xd0] sm:$0xff] %vm406_vm6, %v359_v48 }
  0xe9   : > { %v490_v49 = vpop.permute.xlu1 %489  ;;  %v5219_v52 = vld [vmem:[#allocation2 + $0xc8] sm:$0xff] }
  0xea   : > { %v488_v50 = vpop.permute.xlu0 %487  ;;  %v5217_v51 = vld [vmem:[#allocation2 + $0xc0] sm:$0xff]  ;;  %562 = vst.msk [vmem:[#allocation2 + $0xd7] sm:$0xff] %vm537_vm8, %v490_v49 }
  0xeb   : > { %561 = vst.msk [vmem:[#allocation2 + $0xcf] sm:$0xfe] %vm535_vm7, %v488_v50  ;;  %4364 = vmatprep.mubr.msk.f32.mxu0 %vm171_vm3, %v5217_v51  ;;  %4419 = vmatprep.mubr.msk.f32.mxu1 %vm171_vm3, %v5217_v51 }
  0xec   : > { %4365 = vmatmul.mubr.msk.f32.gmra.mxu0 %vm171_vm3, %v5219_v52  ;;  %4420 = vmatmul.mubr.msk.f32.gmra.mxu1 %vm171_vm3, %v5219_v52 }
  0xed   : > { %v365_v53 = vpop.permute.xlu1 %364 }
  0xee   : > { %v363_v54 = vpop.permute.xlu0 %362  ;;  %434 = vst.msk [vmem:[#allocation2 + $0xe8] sm:$0xff] %vm406_vm6, %v365_v53 }
  0xef   : > { %433 = vst.msk [vmem:[#allocation2 + $0xe0] sm:$0xff] %vm406_vm6, %v363_v54 }
  0xf1   : > { %v494_v57 = vpop.permute.xlu1 %493  ;;  %v628_v60 = vld [vmem:[#allocation2 + $0xd8] sm:$0xff] }
  0xf2   : > { %v492_v58 = vpop.permute.xlu0 %491  ;;  %v627_v59 = vld [vmem:[#allocation2 + $0xd0] sm:$0xff]  ;;  %564 = vst.msk [vmem:[#allocation2 + $0xe7] sm:$0xff] %vm537_vm8, %v494_v57 }
  0xf3   : > { %563 = vst.msk [vmem:[#allocation2 + $0xdf] sm:$0xfe] %vm535_vm7, %v492_v58  ;;  %4367 = vmatprep.mubr.msk.f32.mxu0 %vm171_vm3, %v627_v59  ;;  %4422 = vmatprep.mubr.msk.f32.mxu1 %vm171_vm3, %v627_v59 }
  0xf4   : > { %4368 = vmatmul.mubr.msk.f32.gmra.mxu0 %vm171_vm3, %v628_v60  ;;  %4423 = vmatmul.mubr.msk.f32.gmra.mxu1 %vm171_vm3, %v628_v60 }
  0xf5   : > { %v369_v63 = vpop.permute.xlu1 %368 }
  0xf6   : > { %v367_v0 = vpop.permute.xlu0 %366  ;;  %436 = vst.msk [vmem:[#allocation2 + $0xf8] sm:$0xff] %vm406_vm6, %v369_v63 }
  0xf7   : > { %435 = vst.msk [vmem:[#allocation2 + $0xf0] sm:$0xff] %vm406_vm6, %v367_v0 }
  0xf9   : > { %v498_v1 = vpop.permute.xlu1 %497  ;;  %v630_v6 = vld [vmem:[#allocation2 + $0xe8] sm:$0xff] }
  0xfa   : > { %v496_v2 = vpop.permute.xlu0 %495  ;;  %v629_v5 = vld [vmem:[#allocation2 + $0xe0] sm:$0xff]  ;;  %566 = vst.msk [vmem:[#allocation2 + $0xf7] sm:$0xff] %vm537_vm8, %v498_v1 }
  0xfb   : > { %565 = vst.msk [vmem:[#allocation2 + $0xef] sm:$0xfe] %vm535_vm7, %v496_v2  ;;  %4370 = vmatprep.mubr.msk.f32.mxu0 %vm171_vm3, %v629_v5  ;;  %4425 = vmatprep.mubr.msk.f32.mxu1 %vm171_vm3, %v629_v5 }
  0xfc   : > { %4371 = vmatmul.mubr.msk.f32.gmra.mxu0 %vm171_vm3, %v630_v6  ;;  %4426 = vmatmul.mubr.msk.f32.gmra.mxu1 %vm171_vm3, %v630_v6 }
  0xfd   : > { %v373_v7 = vpop.permute.xlu1 %372 }
  0xfe   : > { %v371_v8 = vpop.permute.xlu0 %370  ;;  %438 = vst.msk [vmem:[#allocation2 + $0x108] sm:$0xff] %vm406_vm6, %v373_v7 }
  0xff   : > { %437 = vst.msk [vmem:[#allocation2 + $0x100] sm:$0xff] %vm406_vm6, %v371_v8 }
 0x101   : > { %v502_v11 = vpop.permute.xlu1 %501  ;;  %v632_v14 = vld [vmem:[#allocation2 + $0xf8] sm:$0xff] }
 0x102   : > { %v500_v12 = vpop.permute.xlu0 %499  ;;  %v631_v13 = vld [vmem:[#allocation2 + $0xf0] sm:$0xff]  ;;  %568 = vst.msk [vmem:[#allocation2 + $0x107] sm:$0xff] %vm537_vm8, %v502_v11 }
 0x103   : > { %567 = vst.msk [vmem:[#allocation2 + $0xff] sm:$0xfe] %vm535_vm7, %v500_v12  ;;  %4373 = vmatprep.mubr.msk.f32.mxu0 %vm171_vm3, %v631_v13  ;;  %4428 = vmatprep.mubr.msk.f32.mxu1 %vm171_vm3, %v631_v13 }
 0x104   : > { %4374 = vmatmul.mubr.msk.f32.gmra.mxu0 %vm171_vm3, %v632_v14  ;;  %4429 = vmatmul.mubr.msk.f32.gmra.mxu1 %vm171_vm3, %v632_v14 }
 0x109   : > { %v634_v18 = vld [vmem:[#allocation2 + $0x108] sm:$0xff] }
 0x10a   : > { %v633_v17 = vld [vmem:[#allocation2 + $0x100] sm:$0xff] }
 0x10b   : > { %4376 = vmatprep.mubr.msk.f32.mxu0 %vm171_vm3, %v633_v17 }
 0x10c   : > { %4377 = vmatmul.mubr.msk.f32.gmra.mxu0 %vm171_vm3, %v634_v18 }
 0x10d   : > { %4435 = vmatprep.mubr.msk.f32.mxu0 %vm171_vm3, %v5057_v55  ;;  %v1318_v55 = vld [vmem:[#allocation2 + $0x110] sm:$0xff] }
 0x110   : > { %4436 = vmatmul.mubr.msk.f32.vlgmr.msra.gmra.mxu0 %vm171_vm3, %v5059_v56  ;;  %v1319_v56 = vld [vmem:[#allocation2 + $0x118] sm:$0xff] }
 0x111   : > { %4438 = vmatprep.mubr.msk.f32.mxu0 %vm171_vm3, %v5073_v61 }
 0x114   : > { %4439 = vmatmul.mubr.msk.f32.gmra.mxu0 %vm171_vm3, %v5075_v62 }
 0x115   : > { %4441 = vmatprep.mubr.msk.f32.mxu0 %vm171_vm3, %v5089_v3 }
 0x118   : > { %4442 = vmatmul.mubr.msk.f32.gmra.mxu0 %vm171_vm3, %v5091_v4 }
 0x119   : > { %4444 = vmatprep.mubr.msk.f32.mxu0 %vm171_vm3, %v5105_v9 }
 0x11c   : > { %4445 = vmatmul.mubr.msk.f32.gmra.mxu0 %vm171_vm3, %v5107_v10 }
 0x11d   : > { %4447 = vmatprep.mubr.msk.f32.mxu0 %vm171_vm3, %v5121_v15 }
 0x120   : > { %4448 = vmatmul.mubr.msk.f32.gmra.mxu0 %vm171_vm3, %v5123_v16 }
 0x121   : > { %4450 = vmatprep.mubr.msk.f32.mxu0 %vm171_vm3, %v5137_v21 }
 0x124   : > { %4451 = vmatmul.mubr.msk.f32.gmra.mxu0 %vm171_vm3, %v5139_v22 }
 0x125   : > { %4453 = vmatprep.mubr.msk.f32.mxu0 %vm171_vm3, %v5153_v27 }
 0x128   : > { %4454 = vmatmul.mubr.msk.f32.gmra.mxu0 %vm171_vm3, %v5155_v28 }
 0x129   : > { %4456 = vmatprep.mubr.msk.f32.mxu0 %vm171_vm3, %v5169_v33  ;;  %v1128_v33 = vpop.f32.mrf.mxu1 }
 0x12c   : > { %4457 = vmatmul.mubr.msk.f32.gmra.mxu0 %vm171_vm3, %v5171_v34 }
 0x12d   : > { %4459 = vmatprep.mubr.msk.f32.mxu0 %vm171_vm3, %v5185_v39 }
 0x130   : > { %4460 = vmatmul.mubr.msk.f32.gmra.mxu0 %vm171_vm3, %v5187_v40 }
 0x131   : > { %4462 = vmatprep.mubr.msk.f32.mxu0 %vm171_vm3, %v5201_v45 }
 0x134   : > { %4463 = vmatmul.mubr.msk.f32.gmra.mxu0 %vm171_vm3, %v5203_v46 }
 0x135   : > { %4465 = vmatprep.mubr.msk.f32.mxu0 %vm171_vm3, %v5217_v51 }
 0x138   : > { %4466 = vmatmul.mubr.msk.f32.gmra.mxu0 %vm171_vm3, %v5219_v52 }
 0x139   : > { %4468 = vmatprep.mubr.msk.f32.mxu0 %vm171_vm3, %v627_v59 }
 0x13c   : > { %4469 = vmatmul.mubr.msk.f32.gmra.mxu0 %vm171_vm3, %v628_v60 }
 0x13d   : > { %4471 = vmatprep.mubr.msk.f32.mxu0 %vm171_vm3, %v629_v5 }
 0x140   : > { %4472 = vmatmul.mubr.msk.f32.gmra.mxu0 %vm171_vm3, %v630_v6 }
 0x141   : > { %4474 = vmatprep.mubr.msk.f32.mxu0 %vm171_vm3, %v631_v13 }
 0x144   : > { %4475 = vmatmul.mubr.msk.f32.gmra.mxu0 %vm171_vm3, %v632_v14 }
 0x145   : > { %4477 = vmatprep.mubr.msk.f32.mxu0 %vm171_vm3, %v633_v17 }
 0x148   : > { %4478 = vmatmul.mubr.msk.f32.gmra.mxu0 %vm171_vm3, %v634_v18 }
 0x149   : > { %4480 = vmatprep.mubr.msk.f32.mxu0 %vm171_vm3, %v1318_v55 }
 0x14c   : > { %4481 = vmatmul.mubr.msk.f32.gmra.mxu0 %vm171_vm3, %v1319_v56 }
 0x155   : > { %v4333_v61 = vpop.f32.mrf.mxu0  ;;  %v4388_v35 = vpop.f32.mrf.mxu1 }
 0x156   : > { %v1134_v54 = vadd.f32 %v4385_v30, %v4333_v61 }
 0x157   : > { %v804_v62 = vpop.f32.mrf.mxu0  ;;  %v1138_v37 = vpop.f32.mrf.mxu1 }
 0x158   : > { %v1129_v59 = vadd.f32 %v1128_v33, %v804_v62 }
 0x15c   : > { %v4336_v3 = vpop.f32.mrf.mxu0  ;;  %v4391_v39 = vpop.f32.mrf.mxu1 }
 0x15d   : > { %v1144_v1 = vadd.f32 %v4388_v35, %v4336_v3 }
 0x15e   : > { %v814_v4 = vpop.f32.mrf.mxu0  ;;  %v1148_v41 = vpop.f32.mrf.mxu1 }
 0x15f   : > { %v1139_v5 = vadd.f32 %v1138_v37, %v814_v4 }
 0x164   : > { %v4339_v9 = vpop.f32.mrf.mxu0  ;;  %v4394_v43 = vpop.f32.mrf.mxu1 }
 0x165   : > { %v1154_v17 = vadd.f32 %v4391_v39, %v4339_v9 }
 0x166   : > { %v5311_v10 = vpop.f32.mrf.mxu0  ;;  %v1158_v45 = vpop.f32.mrf.mxu1 }
 0x167   : > { %v1149_v62 = vadd.f32 %v1148_v41, %v5311_v10 }
 0x16c   : > { %v5313_v15 = vpop.f32.mrf.mxu0  ;;  %v5357_v47 = vpop.f32.mrf.mxu1 }
 0x16e   : > { %v5315_v16 = vpop.f32.mrf.mxu0  ;;  %v5361_v49 = vpop.f32.mrf.mxu1 }
 0x174   : > { %v5317_v19 = vpop.f32.mrf.mxu0  ;;  %v5365_v51 = vpop.f32.mrf.mxu1 }
 0x176   : > { %v5319_v20 = vpop.f32.mrf.mxu0  ;;  %v5371_v57 = vpop.f32.mrf.mxu1 }
 0x17c   : > { %v5321_v21 = vpop.f32.mrf.mxu0  ;;  %v5373_v60 = vpop.f32.mrf.mxu1 }
 0x17e   : > { %v5323_v22 = vpop.f32.mrf.mxu0  ;;  %v5376_v7 = vpop.f32.mrf.mxu1 }
 0x184   : > { %v5325_v23 = vpop.f32.mrf.mxu0  ;;  %v5380_v18 = vpop.f32.mrf.mxu1 }
 0x186   : > { %v5327_v24 = vpop.f32.mrf.mxu0 }
 0x18c   : > { %v5329_v25 = vpop.f32.mrf.mxu0 }
 0x18e   : > { %v5331_v26 = vpop.f32.mrf.mxu0 }
 0x194   : > { %v5333_v27 = vpop.f32.mrf.mxu0 }
 0x196   : > { %v5335_v28 = vpop.f32.mrf.mxu0 }
 0x19c   : > { %v5337_v29 = vpop.f32.mrf.mxu0 }
 0x19e   : > { %v5339_v31 = vpop.f32.mrf.mxu0 }
 0x1a4   : > { %v5341_v32 = vpop.f32.mrf.mxu0 }
 0x1a6   : > { %v5343_v34 = vpop.f32.mrf.mxu0 }
 0x1ac   : > { %v5345_v36 = vpop.f32.mrf.mxu0 }
 0x1ae   : > { %v5347_v38 = vpop.f32.mrf.mxu0 }
 0x1b4   : > { %v5349_v40 = vpop.f32.mrf.mxu0 }
 0x1b6   : > { %v5351_v42 = vpop.f32.mrf.mxu0 }
 0x1bc   : > { %v5353_v44 = vpop.f32.mrf.mxu0 }
 0x1be   : > { %v5355_v46 = vpop.f32.mrf.mxu0 }
 0x1c4   : > { %v5359_v48 = vpop.f32.mrf.mxu0 }
 0x1c6   : > { %v5363_v50 = vpop.f32.mrf.mxu0 }
 0x1cc   : > { %v5367_v52 = vpop.f32.mrf.mxu0 }
 0x1ce   : > { %v5369_v53 = vpop.f32.mrf.mxu0 }
 0x1d0   : > { %v4437_v58 = vpop.f32.mrf.mxu0 }
 0x1d1   : > { %v1648_v63 = vadd.f32 %v4437_v58, %v1134_v54 }
 0x1d2   : > { %v1488_v0 = vpop.f32.mrf.mxu0 }
 0x1d3   : > { %1680 = vst.msk [vmem:[#allocation3 + $0x8] sm:$0xff] %vm244_vm4, %v1648_v63  ;;  %v1647_v2 = vadd.f32 %v1488_v0, %v1129_v59  ;;  %v1782_v8 = vmul.f32 %v1648_v63, %v1648_v63  ;;  %v1712_v55 = vsel %vm244_vm4, %v1648_v63, 0.0  ;;  %v1164_v59 = vadd.f32 %v4394_v43, %v5313_v15  ;;  %v5390_v63 = vpop.f32.mrf.mxu1 }
 0x1d4   : > { %v4440_v6 = vpop.f32.mrf.mxu0 }
 0x1d5   : > { %1679 = vst.msk [vmem:[#allocation3] sm:$0xff] %vm244_vm4, %v1647_v2  ;;  %v1711_v11 = vsel %vm244_vm4, %v1647_v2, 0.0  ;;  %v1781_v12 = vmul.f32 %v1647_v2, %v1647_v2  ;;  %v1650_v13 = vadd.f32 %v4440_v6, %v1144_v1  ;;  %v1814_v33 = vsel %vm244_vm4, %v1782_v8, 0.0 }
 0x1d6   : > { %v1498_v14 = vpop.f32.mrf.mxu0  ;;  %v1713_v3 = vadd.f32 %v1712_v55, %v1711_v11  ;;  %v1159_v1 = vadd.f32 %v1158_v45, %v5315_v16  ;;  %v5397_v11 = vpop.f32.mrf.mxu1  ;;  %v1174_v16 = vadd.f32 %v5357_v47, %v5317_v19 }
 0x1d7   : > { %v1813_v56 = vsel %vm244_vm4, %v1781_v12, 0.0  ;;  %1682 = vst.msk [vmem:[#allocation3 + $0x18] sm:$0xff] %vm244_vm4, %v1650_v13  ;;  %v1649_v61 = vadd.f32 %v1498_v14, %v1139_v5  ;;  %v1784_v4 = vmul.f32 %v1650_v13, %v1650_v13  ;;  %v1716_v10 = vsel %vm244_vm4, %v1650_v13, 0.0 }
 0x1d8   : > { %v4443_v30 = vpop.f32.mrf.mxu0  ;;  %v1815_v39 = vadd.f32 %v1814_v33, %v1813_v56 }
 0x1d9   : > { %1681 = vst.msk [vmem:[#allocation3 + $0x10] sm:$0xff] %vm244_vm4, %v1649_v61  ;;  %v1714_v9 = vsel %vm244_vm4, %v1649_v61, 0.0  ;;  %v1783_v35 = vmul.f32 %v1649_v61, %v1649_v61  ;;  %v1652_v37 = vadd.f32 %v4443_v30, %v1154_v17  ;;  %v1818_v2 = vsel %vm244_vm4, %v1784_v4, 0.0 }
 0x1da   : > { %v1715_v54 = vadd.f32 %v1714_v9, %v1713_v3  ;;  %v1508_v58 = vpop.f32.mrf.mxu0  ;;  %v5408_v9 = vpop.f32.mrf.mxu1 }
 0x1db   : > { %v1816_v41 = vsel %vm244_vm4, %v1783_v35, 0.0  ;;  %1684 = vst.msk [vmem:[#allocation3 + $0x28] sm:$0xff] %vm244_vm4, %v1652_v37  ;;  %v1651_v0 = vadd.f32 %v1508_v58, %v1149_v62  ;;  %v1786_v12 = vmul.f32 %v1652_v37, %v1652_v37  ;;  %v1720_v45 = vsel %vm244_vm4, %v1652_v37, 0.0 }
 0x1dc   : > { %v1817_v5 = vadd.f32 %v1816_v41, %v1815_v39  ;;  %v1717_v6 = vadd.f32 %v1716_v10, %v1715_v54  ;;  %v4446_v8 = vpop.f32.mrf.mxu0  ;;  %v1169_v62 = vadd.f32 %v5361_v49, %v5319_v20  ;;  %v1184_v20 = vadd.f32 %v5365_v51, %v5321_v21  ;;  %v5415_v49 = vpop.f32.mrf.mxu1 }
 0x1dd   : > { %1683 = vst.msk [vmem:[#allocation3 + $0x20] sm:$0xff] %vm244_vm4, %v1651_v0  ;;  %v1718_v15 = vsel %vm244_vm4, %v1651_v0, 0.0  ;;  %v1785_v43 = vmul.f32 %v1651_v0, %v1651_v0  ;;  %v1654_v13 = vadd.f32 %v4446_v8, %v1164_v59  ;;  %v1822_v35 = vsel %vm244_vm4, %v1786_v12, 0.0 }
 0x1de   : > { %v1719_v14 = vadd.f32 %v1718_v15, %v1717_v6  ;;  %v1819_v17 = vadd.f32 %v1818_v2, %v1817_v5  ;;  %v1518_v55 = vpop.f32.mrf.mxu0  ;;  %v1179_v0 = vadd.f32 %v5371_v57, %v5323_v22 }
 0x1df   : > { %v1820_v56 = vsel %vm244_vm4, %v1785_v43, 0.0  ;;  %1686 = vst.msk [vmem:[#allocation3 + $0x38] sm:$0xff] %vm244_vm4, %v1654_v13  ;;  %v1653_v61 = vadd.f32 %v1518_v55, %v1159_v1  ;;  %v1788_v4 = vmul.f32 %v1654_v13, %v1654_v13  ;;  %v1724_v59 = vsel %vm244_vm4, %v1654_v13, 0.0 }
 0x1e0   : > { %v1821_v3 = vadd.f32 %v1820_v56, %v1819_v17  ;;  %v1721_v30 = vadd.f32 %v1720_v45, %v1719_v14  ;;  %v4449_v33 = vpop.f32.mrf.mxu0  ;;  %v1194_v14 = vadd.f32 %v5373_v60, %v5325_v23  ;;  %v5427_v17 = vpop.f32.mrf.mxu1 }
 0x1e1   : > { %1685 = vst.msk [vmem:[#allocation3 + $0x30] sm:$0xff] %vm244_vm4, %v1653_v61  ;;  %v1722_v19 = vsel %vm244_vm4, %v1653_v61, 0.0  ;;  %v1787_v47 = vmul.f32 %v1653_v61, %v1653_v61  ;;  %v1656_v37 = vadd.f32 %v4449_v33, %v1174_v16  ;;  %v1826_v1 = vsel %vm244_vm4, %v1788_v4, 0.0 }
 0x1e2   : > { %v1723_v39 = vadd.f32 %v1722_v19, %v1721_v30  ;;  %v1823_v54 = vadd.f32 %v1822_v35, %v1821_v3  ;;  %v1528_v58 = vpop.f32.mrf.mxu0  ;;  %v1189_v16 = vadd.f32 %v5376_v7, %v5327_v24  ;;  %v5434_v3 = vpop.f32.mrf.mxu1  ;;  %v1204_v24 = vadd.f32 %v5380_v18, %v5329_v25 }
 0x1e3   : > { %v1824_v10 = vsel %vm244_vm4, %v1787_v47, 0.0  ;;  %1688 = vst.msk [vmem:[#allocation3 + $0x48] sm:$0xff] %vm244_vm4, %v1656_v37  ;;  %v1655_v41 = vadd.f32 %v1528_v58, %v1169_v62  ;;  %v1790_v8 = vmul.f32 %v1656_v37, %v1656_v37  ;;  %v1728_v22 = vsel %vm244_vm4, %v1656_v37, 0.0 }
 0x1e4   : > { %v1825_v2 = vadd.f32 %v1824_v10, %v1823_v54  ;;  %v1725_v5 = vadd.f32 %v1724_v59, %v1723_v39  ;;  %v4452_v6 = vpop.f32.mrf.mxu0  ;;  %v1199_v39 = vadd.f32 %v5390_v63, %v5331_v26  ;;  %v1228_v10 = vpop.f32.mrf.mxu1 }
 0x1e5   : > { %1687 = vst.msk [vmem:[#allocation3 + $0x40] sm:$0xff] %vm244_vm4, %v1655_v41  ;;  %v1726_v21 = vsel %vm244_vm4, %v1655_v41, 0.0  ;;  %v1789_v51 = vmul.f32 %v1655_v41, %v1655_v41  ;;  %v1658_v12 = vadd.f32 %v4452_v6, %v1184_v20  ;;  %v1830_v23 = vsel %vm244_vm4, %v1790_v8, 0.0 }
 0x1e6   : > { %v1727_v15 = vadd.f32 %v1726_v21, %v1725_v5  ;;  %v1827_v43 = vadd.f32 %v1826_v1, %v1825_v2  ;;  %v1538_v13 = vpop.f32.mrf.mxu0  ;;  %v1214_v6 = vadd.f32 %v5397_v11, %v5333_v27  ;;  %v4418_v26 = vpop.f32.mrf.mxu1 }
 0x1e7   : > { %v1828_v57 = vsel %vm244_vm4, %v1789_v51, 0.0  ;;  %1690 = vst.msk [vmem:[#allocation3 + $0x58] sm:$0xff] %vm244_vm4, %v1658_v12  ;;  %v1657_v55 = vadd.f32 %v1538_v13, %v1179_v0  ;;  %v1792_v56 = vmul.f32 %v1658_v12, %v1658_v12  ;;  %v1732_v7 = vsel %vm244_vm4, %v1658_v12, 0.0 }
 0x1e8   : > { %v1829_v45 = vadd.f32 %v1828_v57, %v1827_v43  ;;  %v1729_v61 = vadd.f32 %v1728_v22, %v1727_v15  ;;  %v4455_v62 = vpop.f32.mrf.mxu0  ;;  %v1209_v51 = vadd.f32 %v5408_v9, %v5335_v28 }
 0x1e9   : > { %1689 = vst.msk [vmem:[#allocation3 + $0x50] sm:$0xff] %vm244_vm4, %v1657_v55  ;;  %v1730_v60 = vsel %vm244_vm4, %v1657_v55, 0.0  ;;  %v1791_v4 = vmul.f32 %v1657_v55, %v1657_v55  ;;  %v1660_v30 = vadd.f32 %v4455_v62, %v1194_v14  ;;  %v1834_v54 = vsel %vm244_vm4, %v1792_v56, 0.0  ;;  %v1238_v56 = vpop.f32.mrf.mxu1 }
 0x1ea   : > { %v1731_v33 = vadd.f32 %v1730_v60, %v1729_v61  ;;  %v1831_v35 = vadd.f32 %v1830_v23, %v1829_v45  ;;  %v1548_v19 = vpop.f32.mrf.mxu0  ;;  %v1224_v45 = vadd.f32 %v5415_v49, %v5337_v29  ;;  %v1219_v62 = vadd.f32 %v5427_v17, %v5339_v31 }
 0x1eb   : > { %v1832_v47 = vsel %vm244_vm4, %v1791_v4, 0.0  ;;  %1692 = vst.msk [vmem:[#allocation3 + $0x68] sm:$0xff] %vm244_vm4, %v1660_v30  ;;  %v1659_v37 = vadd.f32 %v1548_v19, %v1189_v16  ;;  %v1794_v41 = vmul.f32 %v1660_v30, %v1660_v30  ;;  %v1736_v63 = vsel %vm244_vm4, %v1660_v30, 0.0 }
 0x1ec   : > { %v1833_v58 = vadd.f32 %v1832_v47, %v1831_v35  ;;  %v1733_v20 = vadd.f32 %v1732_v7, %v1731_v33  ;;  %v4458_v59 = vpop.f32.mrf.mxu0  ;;  %v4421_v33 = vpop.f32.mrf.mxu1 }
 0x1ed   : > { %1691 = vst.msk [vmem:[#allocation3 + $0x60] sm:$0xff] %vm244_vm4, %v1659_v37  ;;  %v1734_v25 = vsel %vm244_vm4, %v1659_v37, 0.0  ;;  %v1793_v18 = vmul.f32 %v1659_v37, %v1659_v37  ;;  %v1662_v0 = vadd.f32 %v4458_v59, %v1204_v24  ;;  %v1838_v14 = vsel %vm244_vm4, %v1794_v41, 0.0 }
 0x1ee   : > { %v1735_v1 = vadd.f32 %v1734_v25, %v1733_v20  ;;  %v1835_v2 = vadd.f32 %v1834_v54, %v1833_v58  ;;  %v1558_v5 = vpop.f32.mrf.mxu0  ;;  %v1234_v37 = vadd.f32 %v5434_v3, %v5341_v32  ;;  %v1229_v54 = vadd.f32 %v1228_v10, %v5343_v34  ;;  %v1248_v25 = vpop.f32.mrf.mxu1 }
 0x1ef   : > { %v1836_v8 = vsel %vm244_vm4, %v1793_v18, 0.0  ;;  %1694 = vst.msk [vmem:[#allocation3 + $0x78] sm:$0xff] %vm244_vm4, %v1662_v0  ;;  %v1661_v21 = vadd.f32 %v1558_v5, %v1199_v39  ;;  %v1796_v15 = vmul.f32 %v1662_v0, %v1662_v0  ;;  %v1740_v28 = vsel %vm244_vm4, %v1662_v0, 0.0 }
 0x1f0   : > { %v1837_v12 = vadd.f32 %v1836_v8, %v1835_v2  ;;  %v1737_v43 = vadd.f32 %v1736_v63, %v1735_v1  ;;  %v4461_v13 = vpop.f32.mrf.mxu0  ;;  %v4424_v63 = vpop.f32.mrf.mxu1 }
 0x1f1   : > { %1693 = vst.msk [vmem:[#allocation3 + $0x70] sm:$0xff] %vm244_vm4, %v1661_v21  ;;  %v1738_v27 = vsel %vm244_vm4, %v1661_v21, 0.0  ;;  %v1795_v11 = vmul.f32 %v1661_v21, %v1661_v21  ;;  %v1664_v22 = vadd.f32 %v4461_v13, %v1214_v6  ;;  %v1842_v23 = vsel %vm244_vm4, %v1796_v15, 0.0 }
 0x1f2   : > { %v1739_v57 = vadd.f32 %v1738_v27, %v1737_v43  ;;  %v1839_v55 = vadd.f32 %v1838_v14, %v1837_v12  ;;  %v1568_v16 = vpop.f32.mrf.mxu0  ;;  %v1244_v6 = vadd.f32 %v4418_v26, %v5345_v36  ;;  %v1239_v21 = vadd.f32 %v1238_v56, %v5347_v38 }
 0x1f3   : > { %v1840_v9 = vsel %vm244_vm4, %v1795_v11, 0.0  ;;  %1696 = vst.msk [vmem:[#allocation3 + $0x88] sm:$0xff] %vm244_vm4, %v1664_v22  ;;  %v1663_v61 = vadd.f32 %v1568_v16, %v1209_v51  ;;  %v1798_v35 = vmul.f32 %v1664_v22, %v1664_v22  ;;  %v1744_v31 = vsel %vm244_vm4, %v1664_v22, 0.0 }
 0x1f4   : > { %v1841_v60 = vadd.f32 %v1840_v9, %v1839_v55  ;;  %v1741_v4 = vadd.f32 %v1740_v28, %v1739_v57  ;;  %v4464_v30 = vpop.f32.mrf.mxu0  ;;  %v1254_v57 = vadd.f32 %v4421_v33, %v5349_v40  ;;  %v1258_v55 = vpop.f32.mrf.mxu1  ;;  %v1249_v56 = vadd.f32 %v1248_v25, %v5351_v42 }
 0x1f5   : > { %1695 = vst.msk [vmem:[#allocation3 + $0x80] sm:$0xff] %vm244_vm4, %v1663_v61  ;;  %v1742_v29 = vsel %vm244_vm4, %v1663_v61, 0.0  ;;  %v1797_v49 = vmul.f32 %v1663_v61, %v1663_v61  ;;  %v1666_v19 = vadd.f32 %v4464_v30, %v1224_v45  ;;  %v1846_v18 = vsel %vm244_vm4, %v1798_v35, 0.0 }
 0x1f6   : > { %v1743_v24 = vadd.f32 %v1742_v29, %v1741_v4  ;;  %v1843_v7 = vadd.f32 %v1842_v23, %v1841_v60  ;;  %v1578_v47 = vpop.f32.mrf.mxu0  ;;  %v4427_v23 = vpop.f32.mrf.mxu1 }
 0x1f7   : > { %v1844_v17 = vsel %vm244_vm4, %v1797_v49, 0.0  ;;  %1698 = vst.msk [vmem:[#allocation3 + $0x98] sm:$0xff] %vm244_vm4, %v1666_v19  ;;  %v1665_v39 = vadd.f32 %v1578_v47, %v1219_v62  ;;  %v1800_v20 = vmul.f32 %v1666_v19, %v1666_v19  ;;  %v1748_v34 = vsel %vm244_vm4, %v1666_v19, 0.0 }
 0x1f8   : > { %v1845_v58 = vadd.f32 %v1844_v17, %v1843_v7  ;;  %v1745_v59 = vadd.f32 %v1744_v31, %v1743_v24  ;;  %v4467_v41 = vpop.f32.mrf.mxu0  ;;  %v1264_v49 = vadd.f32 %v4424_v63, %v5353_v44  ;;  %v1259_v7 = vadd.f32 %v1258_v55, %v5355_v46 }
 0x1f9   : > { %1697 = vst.msk [vmem:[#allocation3 + $0x90] sm:$0xff] %vm244_vm4, %v1665_v39  ;;  %v1746_v32 = vsel %vm244_vm4, %v1665_v39, 0.0  ;;  %v1799_v3 = vmul.f32 %v1665_v39, %v1665_v39  ;;  %v1668_v0 = vadd.f32 %v4467_v41, %v1234_v37  ;;  %v1850_v51 = vsel %vm244_vm4, %v1800_v20, 0.0  ;;  %v1268_v39 = vpop.f32.mrf.mxu1 }
 0x1fa   : > { %v1747_v1 = vadd.f32 %v1746_v32, %v1745_v59  ;;  %v1847_v2 = vadd.f32 %v1846_v18, %v1845_v58  ;;  %v1588_v5 = vpop.f32.mrf.mxu0  ;;  %v1274_v18 = vadd.f32 %v4427_v23, %v5359_v48 }
 0x1fb   : > { %v1848_v10 = vsel %vm244_vm4, %v1799_v3, 0.0  ;;  %1700 = vst.msk [vmem:[#allocation3 + $0xa8] sm:$0xff] %vm244_vm4, %v1668_v0  ;;  %v1667_v8 = vadd.f32 %v1588_v5, %v1229_v54  ;;  %v1802_v13 = vmul.f32 %v1668_v0, %v1668_v0  ;;  %v1752_v38 = vsel %vm244_vm4, %v1668_v0, 0.0  ;;  %v4430_v32 = vpop.f32.mrf.mxu1 }
 0x1fc   : > { %v1849_v12 = vadd.f32 %v1848_v10, %v1847_v2  ;;  %v1749_v15 = vadd.f32 %v1748_v34, %v1747_v1  ;;  %v4470_v43 = vpop.f32.mrf.mxu0  ;;  %v1269_v1 = vadd.f32 %v1268_v39, %v5363_v50 }
 0x1fd   : > { %1699 = vst.msk [vmem:[#allocation3 + $0xa0] sm:$0xff] %vm244_vm4, %v1667_v8  ;;  %v1750_v36 = vsel %vm244_vm4, %v1667_v8, 0.0  ;;  %v1801_v26 = vmul.f32 %v1667_v8, %v1667_v8  ;;  %v1670_v14 = vadd.f32 %v4470_v43, %v1244_v6  ;;  %v1854_v60 = vsel %vm244_vm4, %v1802_v13, 0.0 }
 0x1fe   : > { %v1751_v27 = vadd.f32 %v1750_v36, %v1749_v15  ;;  %v1851_v11 = vadd.f32 %v1850_v51, %v1849_v12  ;;  %v1598_v22 = vpop.f32.mrf.mxu0  ;;  %v1278_v15 = vpop.f32.mrf.mxu1  ;;  %v1284_v43 = vadd.f32 %v4430_v32, %v5367_v52 }
 0x1ff   : > { %v1852_v16 = vsel %vm244_vm4, %v1801_v26, 0.0  ;;  %1702 = vst.msk [vmem:[#allocation3 + $0xb8] sm:$0xff] %vm244_vm4, %v1670_v14  ;;  %v1669_v45 = vadd.f32 %v1598_v22, %v1239_v21  ;;  %v1804_v9 = vmul.f32 %v1670_v14, %v1670_v14  ;;  %v1756_v42 = vsel %vm244_vm4, %v1670_v14, 0.0 }
 0x200   : > { %v1853_v28 = vadd.f32 %v1852_v16, %v1851_v11  ;;  %v1753_v61 = vadd.f32 %v1752_v38, %v1751_v27  ;;  %v4473_v62 = vpop.f32.mrf.mxu0  ;;  %v1279_v26 = vadd.f32 %v1278_v15, %v5369_v53 }
 0x201   : > { %1701 = vst.msk [vmem:[#allocation3 + $0xb0] sm:$0xff] %vm244_vm4, %v1669_v45  ;;  %v1754_v40 = vsel %vm244_vm4, %v1669_v45, 0.0  ;;  %v1803_v4 = vmul.f32 %v1669_v45, %v1669_v45  ;;  %v1672_v30 = vadd.f32 %v4473_v62, %v1254_v57  ;;  %v1858_v47 = vsel %vm244_vm4, %v1804_v9, 0.0 }
 0x202   : > { %v1755_v33 = vadd.f32 %v1754_v40, %v1753_v61  ;;  %v1855_v35 = vadd.f32 %v1854_v60, %v1853_v28  ;;  %v1608_v29 = vpop.f32.mrf.mxu0 }
 0x203   : > { %v1856_v19 = vsel %vm244_vm4, %v1803_v4, 0.0  ;;  %1704 = vst.msk [vmem:[#allocation3 + $0xc8] sm:$0xff] %vm244_vm4, %v1672_v30  ;;  %v1671_v24 = vadd.f32 %v1608_v29, %v1249_v56  ;;  %v1806_v54 = vmul.f32 %v1672_v30, %v1672_v30  ;;  %v1760_v46 = vsel %vm244_vm4, %v1672_v30, 0.0 }
 0x204   : > { %v1857_v37 = vadd.f32 %v1856_v19, %v1855_v35  ;;  %v1757_v31 = vadd.f32 %v1756_v42, %v1755_v33  ;;  %v4476_v17 = vpop.f32.mrf.mxu0 }
 0x205   : > { %1703 = vst.msk [vmem:[#allocation3 + $0xc0] sm:$0xff] %vm244_vm4, %v1671_v24  ;;  %v1758_v44 = vsel %vm244_vm4, %v1671_v24, 0.0  ;;  %v1805_v58 = vmul.f32 %v1671_v24, %v1671_v24  ;;  %v1674_v20 = vadd.f32 %v4476_v17, %v1264_v49  ;;  %v1862_v34 = vsel %vm244_vm4, %v1806_v54, 0.0 }
 0x206   : > { %v1759_v59 = vadd.f32 %v1758_v44, %v1757_v31  ;;  %v1859_v41 = vadd.f32 %v1858_v47, %v1857_v37  ;;  %v1618_v25 = vpop.f32.mrf.mxu0 }
 0x207   : > { %v1860_v3 = vsel %vm244_vm4, %v1805_v58, 0.0  ;;  %1706 = vst.msk [vmem:[#allocation3 + $0xd8] sm:$0xff] %vm244_vm4, %v1674_v20  ;;  %v1673_v0 = vadd.f32 %v1618_v25, %v1259_v7  ;;  %v1808_v5 = vmul.f32 %v1674_v20, %v1674_v20  ;;  %v1764_v50 = vsel %vm244_vm4, %v1674_v20, 0.0 }
 0x208   : > { %v1861_v2 = vadd.f32 %v1860_v3, %v1859_v41  ;;  %v1761_v6 = vadd.f32 %v1760_v46, %v1759_v59  ;;  %v4479_v63 = vpop.f32.mrf.mxu0 }
 0x209   : > { %1705 = vst.msk [vmem:[#allocation3 + $0xd0] sm:$0xff] %vm244_vm4, %v1673_v0  ;;  %v1762_v48 = vsel %vm244_vm4, %v1673_v0, 0.0  ;;  %v1807_v10 = vmul.f32 %v1673_v0, %v1673_v0  ;;  %v1676_v8 = vadd.f32 %v4479_v63, %v1274_v18  ;;  %v1866_v14 = vsel %vm244_vm4, %v1808_v5, 0.0  ;;  %v5535_v5 = vld [vmem:[#allocation3 + $0x18] sm:$0xff]  ;;  %v5539_v63 = vld [vmem:[#allocation3 + $0x28] sm:$0xff] }
 0x20a   : > { %v1763_v21 = vadd.f32 %v1762_v48, %v1761_v6  ;;  %v1863_v51 = vadd.f32 %v1862_v34, %v1861_v2  ;;  %v1628_v12 = vpop.f32.mrf.mxu0  ;;  %v5533_v2 = vld [vmem:[#allocation3] sm:$0xff]  ;;  %v5537_v6 = vld [vmem:[#allocation3 + $0x10] sm:$0xff]  ;;  %v5543_v48 = vld [vmem:[#allocation3 + $0x38] sm:$0xff] }
 0x20b   : > { %v1864_v13 = vsel %vm244_vm4, %v1807_v10, 0.0  ;;  %1708 = vst.msk [vmem:[#allocation3 + $0xe8] sm:$0xff] %vm244_vm4, %v1676_v8  ;;  %v1675_v36 = vadd.f32 %v1628_v12, %v1269_v1  ;;  %v1810_v57 = vmul.f32 %v1676_v8, %v1676_v8  ;;  %v1768_v28 = vsel %vm244_vm4, %v1676_v8, 0.0  ;;  %v5531_v1 = vld [vmem:[#allocation3 + $0x8] sm:$0xff]  ;;  %v5541_v34 = vld [vmem:[#allocation3 + $0x20] sm:$0xff]  ;;  %v5545_v10 = vld [vmem:[#allocation3 + $0x30] sm:$0xff] }
 0x20c   : > { %v1865_v27 = vadd.f32 %v1864_v13, %v1863_v51  ;;  %v1765_v11 = vadd.f32 %v1764_v50, %v1763_v21  ;;  %v4482_v22 = vpop.f32.mrf.mxu0  ;;  %v5547_v8 = vld [vmem:[#allocation3 + $0x48] sm:$0xff]  ;;  %v5549_v21 = vld [vmem:[#allocation3 + $0x40] sm:$0xff]  ;;  %v5551_v51 = vld [vmem:[#allocation3 + $0x58] sm:$0xff] }
 0x20d   : > { %1707 = vst.msk [vmem:[#allocation3 + $0xe0] sm:$0xff] %vm244_vm4, %v1675_v36  ;;  %v1766_v55 = vsel %vm244_vm4, %v1675_v36, 0.0  ;;  %v1809_v52 = vmul.f32 %v1675_v36, %v1675_v36  ;;  %v1678_v38 = vadd.f32 %v4482_v22, %v1284_v43  ;;  %v1870_v23 = vsel %vm244_vm4, %v1810_v57, 0.0  ;;  %v5553_v12 = vld [vmem:[#allocation3 + $0x50] sm:$0xff]  ;;  %v5563_v36 = vld [vmem:[#allocation3 + $0x68] sm:$0xff] }
 0x20e   : > { %v1767_v16 = vadd.f32 %v1766_v55, %v1765_v11  ;;  %v1867_v45 = vadd.f32 %v1866_v14, %v1865_v27  ;;  %v1638_v56 = vpop.f32.mrf.mxu0  ;;  %v5567_v14 = vld [vmem:[#allocation3 + $0x78] sm:$0xff]  ;;  %v5569_v27 = vld [vmem:[#allocation3 + $0x70] sm:$0xff] }
 0x20f   : > { %v1868_v9 = vsel %vm244_vm4, %v1809_v52, 0.0  ;;  %1710 = vst.msk [vmem:[#allocation3 + $0xf8] sm:$0xff] %vm244_vm4, %v1678_v38  ;;  %v1677_v53 = vadd.f32 %v1638_v56, %v1279_v26  ;;  %v1812_v60 = vmul.f32 %v1678_v38, %v1678_v38  ;;  %v1772_v35 = vsel %vm244_vm4, %v1678_v38, 0.0  ;;  %v5565_v26 = vld [vmem:[#allocation3 + $0x60] sm:$0xff]  ;;  %v5579_v52 = vld [vmem:[#allocation3 + $0x88] sm:$0xff] }
 0x210   : > { %v1869_v61 = vadd.f32 %v1868_v9, %v1867_v45  ;;  %v1769_v62 = vadd.f32 %v1768_v28, %v1767_v16  ;;  %v5581_v38 = vld [vmem:[#allocation3 + $0x80] sm:$0xff]  ;;  %v5583_v16 = vld [vmem:[#allocation3 + $0x98] sm:$0xff] }
 0x211   : > { %1709 = vst.msk [vmem:[#allocation3 + $0xf0] sm:$0xff] %vm244_vm4, %v1677_v53  ;;  %v1770_v40 = vsel %vm244_vm4, %v1677_v53, 0.0  ;;  %v1811_v4 = vmul.f32 %v1677_v53, %v1677_v53  ;;  %v1874_v19 = vsel %vm244_vm4, %v1812_v60, 0.0  ;;  %v5593_v53 = vld [vmem:[#allocation3 + $0x90] sm:$0xff] }
 0x212   : > { %v1771_v30 = vadd.f32 %v1770_v40, %v1769_v62  ;;  %v1871_v33 = vadd.f32 %v1870_v23, %v1869_v61  ;;  %v5595_v61 = vld [vmem:[#allocation3 + $0xa8] sm:$0xff]  ;;  %v5597_v62 = vld [vmem:[#allocation3 + $0xa0] sm:$0xff] }
 0x213   : > { %v1872_v29 = vsel %vm244_vm4, %v1811_v4, 0.0 }
 0x214   : > { %v1773_v49 = vadd.f32 %v1772_v35, %v1771_v30  ;;  %v1873_v42 = vadd.f32 %v1872_v29, %v1871_v33  ;;  %v5607_v30 = vld [vmem:[#allocation3 + $0xb8] sm:$0xff]  ;;  %v5609_v33 = vld [vmem:[#allocation3 + $0xb0] sm:$0xff]  ;;  %v2371_v35 = vld [vmem:[%s6772_s2 + $0x8] sm:$0xf] }
 0x215   : > { %4535 = vmatprep.subr.msk.mxu0 %vm734_vm2, %v2371_v35 }
 0x216   : > { %v1774_v24 = vrot.slane %v1773_v49, 4  ;;  %v1875_v7 = vadd.f32 %v1874_v19, %v1873_v42  ;;  %4536 = vmatpush3.msk.msra.mxu0 %vm734_vm2, %v2371_v35 }
 0x218   : > { %v1775_v47 = vadd.f32 %v1774_v24, %v1773_v49  ;;  %v1876_v37 = vrot.slane %v1875_v7, 4  ;;  %v5622_v24 = vld [vmem:[#allocation3 + $0xc8] sm:$0xff] }
 0x21a   : > { %v1776_v31 = vrot.slane %v1775_v47, 2  ;;  %v1877_v17 = vadd.f32 %v1876_v37, %v1875_v7  ;;  %v5624_v7 = vld [vmem:[#allocation3 + $0xc0] sm:$0xff] }
 0x21c   : > { %v1777_v39 = vadd.f32 %v1776_v31, %v1775_v47  ;;  %v1878_v54 = vrot.slane %v1877_v17, 2  ;;  %v2370_v47 = vld [vmem:[%s6772_s2] sm:$0xff] }
 0x21d   : > { %4537 = vmatprep.subr.mxu0 %v2370_v47 }
 0x21e   : > { %v1778_v44 = vrot.slane %v1777_v39, 1  ;;  %v1879_v58 = vadd.f32 %v1878_v54, %v1877_v17  ;;  %v5638_v54 = vld [vmem:[#allocation3 + $0xd8] sm:$0xff]  ;;  %4538 = vmatpush3.msra.mxu0 %v2370_v47 }
 0x220   : > { %v1779_v20 = vadd.f32 %v1778_v44, %v1777_v39  ;;  %v1880_v59 = vrot.slane %v1879_v58, 1  ;;  %v5640_v44 = vld [vmem:[#allocation3 + $0xd0] sm:$0xff] }
 0x222   : > { %v1881_v41 = vadd.f32 %v1880_v59, %v1879_v58  ;;  %v5527_v25 = vmul.f32 0.00390625, %v1779_v20  ;;  %v5642_v58 = vld [vmem:[#allocation3 + $0xe8] sm:$0xff] }
 0x224   : > { %v1884_v18 = vmul.f32 0.00390625, %v1881_v41  ;;  %v1885_v32 = vmul.f32 %v5527_v25, %v5527_v25  ;;  %v1923_v15 = vsub.f32 %v5531_v1, %v5527_v25  ;;  %v1922_v43 = vsub.f32 %v5533_v2, %v5527_v25 }
 0x225   : > { %v1925_v50 = vsub.f32 %v5535_v5, %v5527_v25  ;;  %v1924_v13 = vsub.f32 %v5537_v6, %v5527_v25  ;;  %v1927_v11 = vsub.f32 %v5539_v63, %v5527_v25  ;;  %v1926_v22 = vsub.f32 %v5541_v34, %v5527_v25  ;;  %v4017_v63 = vld [vmem:[%s6772_s2 + $0x18] sm:$0xf]  ;;  %v2338_v34 = vld [vmem:[#allocation2] sm:$0xff]  ;;  %v4016_v6 = vld [vmem:[%s6772_s2 + $0x10] sm:$0xff] }
 0x226   : > { %v1886_v46 = vsub.f32 %v1884_v18, %v1885_v32  ;;  %v1929_v57 = vsub.f32 %v5543_v48, %v5527_v25  ;;  %v1928_v55 = vsub.f32 %v5545_v10, %v5527_v25  ;;  %v1931_v45 = vsub.f32 %v5547_v8, %v5527_v25  ;;  %v5653_v32 = vld [vmem:[#allocation3 + $0xe0] sm:$0xff]  ;;  %v2339_v48 = vld [vmem:[#allocation2 + $0x8] sm:$0xff]  ;;  %4483 = vmatprep.subr.msk.mxu1 %vm734_vm2, %v4017_v63 }
 0x227   : > { %v1930_v56 = vsub.f32 %v5549_v21, %v5527_v25  ;;  %v1933_v28 = vsub.f32 %v5551_v51, %v5527_v25  ;;  %v1932_v9 = vsub.f32 %v5553_v12, %v5527_v25  ;;  %v1935_v23 = vsub.f32 %v5563_v36, %v5527_v25  ;;  %4539 = vmatprep.mubr.msk.f32.mxu0 %vm171_vm3, %v2338_v34 }
 0x228   : > { %v1887_v3 = vmax.f32 %v1886_v46, 0.0  ;;  %v1934_v60 = vsub.f32 %v5565_v26, %v5527_v25  ;;  %v1937_v40 = vsub.f32 %v5567_v14, %v5527_v25  ;;  %v1936_v4 = vsub.f32 %v5569_v27, %v5527_v25  ;;  %v5655_v46 = vld [vmem:[#allocation3 + $0xf8] sm:$0xff]  ;;  %4484 = vmatpush3.msk.msra.mxu1 %vm734_vm2, %v4017_v63  ;;  %4540 = vmatmul.mubr.msk.f32.vlgmr.msra.gmra.mxu0 %vm171_vm3, %v2339_v48 }
 0x229   : > { %v1939_v29 = vsub.f32 %v5579_v52, %v5527_v25  ;;  %v1938_v49 = vsub.f32 %v5581_v38, %v5527_v25  ;;  %v1941_v42 = vsub.f32 %v5583_v16, %v5527_v25  ;;  %v1940_v19 = vsub.f32 %v5593_v53, %v5527_v25  ;;  %4485 = vmatprep.subr.mxu1 %v4016_v6 }
 0x22a   : > { %v1888_v0 = vadd.f32 1e-05, %v1887_v3  ;;  %v1943_v37 = vsub.f32 %v5595_v61, %v5527_v25  ;;  %v1942_v31 = vsub.f32 %v5597_v62, %v5527_v25  ;;  %v1945_v17 = vsub.f32 %v5607_v30, %v5527_v25  ;;  %v5657_v3 = vld [vmem:[#allocation3 + $0xf0] sm:$0xff]  ;;  %4486 = vmatpush3.msra.mxu1 %v4016_v6 }
 0x22b   : > { %v1944_v39 = vsub.f32 %v5609_v33, %v5527_v25  ;;  %v1947_v20 = vsub.f32 %v5622_v24, %v5527_v25  ;;  %v6777_v24 = vsub.f32 %v5640_v44, %v5527_v25  ;;  %v6779_v6 = vsub.f32 %v5653_v32, %v5527_v25 }
 0x22c   : > { %4650 = vrsqrt.f32 %v1888_v0  ;;  %v6780_v34 = vsub.f32 %v5655_v46, %v5527_v25 }
 0x239   : > { %v5659_v0 = vpop.eup %4650 }
 0x23a   : > { %v1955_v10 = vmul.f32 %v5659_v0, %v1923_v15  ;;  %v1954_v35 = vmul.f32 %v5659_v0, %v1922_v43  ;;  %v1957_v1 = vmul.f32 %v5659_v0, %v1925_v50  ;;  %v1956_v2 = vmul.f32 %v5659_v0, %v1924_v13 }
 0x23b   : > { %v1959_v5 = vmul.f32 %v5659_v0, %v1927_v11  ;;  %v1958_v47 = vmul.f32 %v5659_v0, %v1926_v22  ;;  %v1961_v18 = vmul.f32 %v5659_v0, %v1929_v57  ;;  %v1960_v15 = vmul.f32 %v5659_v0, %v1928_v55 }
 0x23c   : > { %v1987_v43 = vmax.f32 %v1955_v10, 0.0  ;;  %v1986_v50 = vmax.f32 %v1954_v35, 0.0  ;;  %v5685_v41 = vmax.f32 %v1957_v1, 0.0  ;;  %v5687_v13 = vmax.f32 %v1956_v2, 0.0 }
 0x23d   : > { %v5691_v59 = vmax.f32 %v1959_v5, 0.0  ;;  %v5693_v11 = vmax.f32 %v1958_v47, 0.0  ;;  %v5695_v22 = vmax.f32 %v1961_v18, 0.0  ;;  %v5697_v57 = vmax.f32 %v1960_v15, 0.0 }
 0x23e   : > { %2084 = vrot.lane.b32.xlu1 %v1987_v43, %s4664_s28  ;;  %2019 = vst.msk [vmem:[#allocation2 + $0x19] sm:$0x7f] %vm246_vm5, %v1987_v43  ;;  %2082 = vrot.lane.b32.xlu0 %v1986_v50, %s4664_s28  ;;  %2021 = vst.msk [vmem:[#allocation2 + $0x29] sm:$0x7f] %vm246_vm5, %v5685_v41  ;;  %v1963_v55 = vmul.f32 %v5659_v0, %v1931_v45  ;;  %v1962_v18 = vmul.f32 %v5659_v0, %v1930_v56 }
 0x23f   : > { %2018 = vst.msk [vmem:[#allocation2 + $0x11] sm:$0xff] %vm244_vm4, %v1986_v50  ;;  %2020 = vst.msk [vmem:[#allocation2 + $0x21] sm:$0xff] %vm244_vm4, %v5687_v13  ;;  %v1965_v1 = vmul.f32 %v5659_v0, %v1933_v28  ;;  %v1964_v8 = vmul.f32 %v5659_v0, %v1932_v9  ;;  %v1967_v21 = vmul.f32 %v5659_v0, %v1935_v23 }
 0x240   : > { %2023 = vst.msk [vmem:[#allocation2 + $0x39] sm:$0x7f] %vm246_vm5, %v5691_v59  ;;  %2025 = vst.msk [vmem:[#allocation2 + $0x49] sm:$0x7f] %vm246_vm5, %v5695_v22  ;;  %v1966_v51 = vmul.f32 %v5659_v0, %v1934_v60  ;;  %v1969_v45 = vmul.f32 %v5659_v0, %v1937_v40  ;;  %v5743_v56 = vmax.f32 %v1963_v55, 0.0  ;;  %v5745_v12 = vmax.f32 %v1962_v18, 0.0 }
 0x241   : > { %2022 = vst.msk [vmem:[#allocation2 + $0x31] sm:$0xff] %vm244_vm4, %v5693_v11  ;;  %2024 = vst.msk [vmem:[#allocation2 + $0x41] sm:$0xff] %vm244_vm4, %v5697_v57  ;;  %v5747_v28 = vmax.f32 %v1965_v1, 0.0  ;;  %v1968_v36 = vmul.f32 %v5659_v0, %v1936_v4  ;;  %v5753_v26 = vmax.f32 %v1964_v8, 0.0  ;;  %v5755_v9 = vmax.f32 %v1967_v21, 0.0  ;;  %v4084_v1 = vld [vmem:[%s6772_s2 + $0x20] sm:$0xff] }
 0x242   : > { %v5757_v23 = vmax.f32 %v1966_v51, 0.0  ;;  %v5759_v14 = vmax.f32 %v1969_v45, 0.0  ;;  %2212 = vrot.lane.b32.xlu1 %v1987_v43, %s4663_s27  ;;  %2210 = vrot.lane.b32.xlu0 %v1986_v50, %s4663_s27  ;;  %2027 = vst.msk [vmem:[#allocation2 + $0x59] sm:$0x7f] %vm246_vm5, %v5743_v56  ;;  %v1971_v60 = vmul.f32 %v5659_v0, %v1939_v29  ;;  %v1970_v40 = vmul.f32 %v5659_v0, %v1938_v49 }
 0x243   : > { %2026 = vst.msk [vmem:[#allocation2 + $0x51] sm:$0xff] %vm244_vm4, %v5745_v12  ;;  %v5769_v27 = vmax.f32 %v1968_v36, 0.0  ;;  %v1973_v4 = vmul.f32 %v5659_v0, %v1941_v42  ;;  %2028 = vst.msk [vmem:[#allocation2 + $0x61] sm:$0xff] %vm244_vm4, %v5753_v26  ;;  %v1972_v52 = vmul.f32 %v5659_v0, %v1940_v19  ;;  %v1975_v38 = vmul.f32 %v5659_v0, %v1943_v37 }
 0x244   : > { %2029 = vst.msk [vmem:[#allocation2 + $0x69] sm:$0x7f] %vm246_vm5, %v5747_v28  ;;  %2031 = vst.msk [vmem:[#allocation2 + $0x79] sm:$0x7f] %vm246_vm5, %v5755_v9  ;;  %v1974_v16 = vmul.f32 %v5659_v0, %v1942_v31  ;;  %v1977_v29 = vmul.f32 %v5659_v0, %v1945_v17  ;;  %v5809_v53 = vmax.f32 %v1971_v60, 0.0  ;;  %v5811_v49 = vmax.f32 %v1970_v40, 0.0 }
 0x245   : > { %2030 = vst.msk [vmem:[#allocation2 + $0x71] sm:$0xff] %vm244_vm4, %v5757_v23  ;;  %2032 = vst.msk [vmem:[#allocation2 + $0x81] sm:$0xff] %vm244_vm4, %v5769_v27  ;;  %v5813_v61 = vmax.f32 %v1973_v4, 0.0  ;;  %v1976_v62 = vmul.f32 %v5659_v0, %v1944_v39  ;;  %v5819_v42 = vmax.f32 %v1972_v52, 0.0  ;;  %v5821_v19 = vmax.f32 %v1975_v38, 0.0 }
 0x246   : > { %2033 = vst.msk [vmem:[#allocation2 + $0x89] sm:$0x7f] %vm246_vm5, %v5759_v14  ;;  %v5823_v30 = vmax.f32 %v1974_v16, 0.0  ;;  %v5825_v37 = vmax.f32 %v1977_v29, 0.0  ;;  %2088 = vrot.lane.b32.xlu1 %v5685_v41, %s4664_s28  ;;  %2086 = vrot.lane.b32.xlu0 %v5687_v13, %s4664_s28  ;;  %2035 = vst.msk [vmem:[#allocation2 + $0x99] sm:$0x7f] %vm246_vm5, %v5809_v53  ;;  %v1979_v31 = vmul.f32 %v5659_v0, %v1947_v20 }
 0x247   : > { %2034 = vst.msk [vmem:[#allocation2 + $0x91] sm:$0xff] %vm244_vm4, %v5811_v49  ;;  %v5837_v33 = vmax.f32 %v1976_v62, 0.0  ;;  %v6775_v17 = vsub.f32 %v5624_v7, %v5527_v25  ;;  %v6776_v2 = vsub.f32 %v5638_v54, %v5527_v25  ;;  %2036 = vst.msk [vmem:[#allocation2 + $0xa1] sm:$0xff] %vm244_vm4, %v5819_v42  ;;  %v1980_v7 = vmul.f32 %v5659_v0, %v6777_v24 }
 0x248   : > { %2037 = vst.msk [vmem:[#allocation2 + $0xa9] sm:$0x7f] %vm246_vm5, %v5813_v61  ;;  %2039 = vst.msk [vmem:[#allocation2 + $0xb9] sm:$0x7f] %vm246_vm5, %v5821_v19  ;;  %v6778_v54 = vsub.f32 %v5642_v58, %v5527_v25  ;;  %v1982_v63 = vmul.f32 %v5659_v0, %v6779_v6  ;;  %v1985_v48 = vmul.f32 %v5659_v0, %v6780_v34  ;;  %v2011_v44 = vmax.f32 %v1979_v31, 0.0 }
 0x249   : > { %v1978_v39 = vmul.f32 %v5659_v0, %v6775_v17  ;;  %v1981_v5 = vmul.f32 %v5659_v0, %v6776_v2  ;;  %2038 = vst.msk [vmem:[#allocation2 + $0xb1] sm:$0xff] %vm244_vm4, %v5823_v30  ;;  %2040 = vst.msk [vmem:[#allocation2 + $0xc1] sm:$0xff] %vm244_vm4, %v5837_v33  ;;  %v6781_v58 = vsub.f32 %v5657_v3, %v5527_v25  ;;  %v5883_v32 = vmax.f32 %v1980_v7, 0.0 }
 0x24a   : > { %2041 = vst.msk [vmem:[#allocation2 + $0xc9] sm:$0x7f] %vm246_vm5, %v5825_v37  ;;  %v1983_v20 = vmul.f32 %v5659_v0, %v6778_v54  ;;  %v5887_v43 = vmax.f32 %v1982_v63, 0.0  ;;  %v5889_v46 = vmax.f32 %v1985_v48, 0.0  ;;  %2216 = vrot.lane.b32.xlu1 %v5685_v41, %s4663_s27  ;;  %2214 = vrot.lane.b32.xlu0 %v5687_v13, %s4663_s27  ;;  %2043 = vst.msk [vmem:[#allocation2 + $0xd9] sm:$0x7f] %vm246_vm5, %v2011_v44 }
 0x24b   : > { %v2010_v10 = vmax.f32 %v1978_v39, 0.0  ;;  %v5877_v35 = vmax.f32 %v1981_v5, 0.0  ;;  %v1984_v47 = vmul.f32 %v5659_v0, %v6781_v58  ;;  %2044 = vst.msk [vmem:[#allocation2 + $0xe1] sm:$0xff] %vm244_vm4, %v5883_v32 }
 0x24c   : > { %v5885_v15 = vmax.f32 %v1983_v20, 0.0  ;;  %2046 = vst.msk [vmem:[#allocation2 + $0xf1] sm:$0xff] %vm244_vm4, %v5887_v43 }
 0x24d   : > { %2042 = vst.msk [vmem:[#allocation2 + $0xd1] sm:$0xff] %vm244_vm4, %v2010_v10  ;;  %v5899_v25 = vmax.f32 %v1984_v47, 0.0 }
 0x24e   : > { %2045 = vst.msk [vmem:[#allocation2 + $0xe9] sm:$0x7f] %vm246_vm5, %v5877_v35  ;;  %2047 = vst.msk [vmem:[#allocation2 + $0xf9] sm:$0x7f] %vm246_vm5, %v5885_v15  ;;  %2092 = vrot.lane.b32.xlu1 %v5691_v59, %s4664_s28  ;;  %2090 = vrot.lane.b32.xlu0 %v5693_v11, %s4664_s28 }
 0x24f   : > { %2049 = vst.msk [vmem:[#allocation2 + $0x109] sm:$0x7f] %vm246_vm5, %v5889_v46 }
 0x250   : > { %2048 = vst.msk [vmem:[#allocation2 + $0x101] sm:$0xff] %vm244_vm4, %v5899_v25 }
 0x252   : > { %2220 = vrot.lane.b32.xlu1 %v5691_v59, %s4663_s27  ;;  %2218 = vrot.lane.b32.xlu0 %v5693_v11, %s4663_s27  ;;  %v4085_v59 = vld [vmem:[%s6772_s2 + $0x28] sm:$0xf] }
 0x253   : > { %4587 = vmatprep.subr.msk.mxu1 %vm734_vm2, %v4085_v59 }
 0x256   : > { %2096 = vrot.lane.b32.xlu1 %v5695_v22, %s4664_s28  ;;  %2094 = vrot.lane.b32.xlu0 %v5697_v57, %s4664_s28 }
 0x25a   : > { %2224 = vrot.lane.b32.xlu1 %v5695_v22, %s4663_s27  ;;  %2222 = vrot.lane.b32.xlu0 %v5697_v57, %s4663_s27 }
 0x25e   : > { %2100 = vrot.lane.b32.xlu1 %v5743_v56, %s4664_s28  ;;  %2098 = vrot.lane.b32.xlu0 %v5745_v12, %s4664_s28 }
 0x262   : > { %2228 = vrot.lane.b32.xlu1 %v5743_v56, %s4663_s27  ;;  %2226 = vrot.lane.b32.xlu0 %v5745_v12, %s4663_s27 }
 0x266   : > { %2104 = vrot.lane.b32.xlu1 %v5747_v28, %s4664_s28  ;;  %2102 = vrot.lane.b32.xlu0 %v5753_v26, %s4664_s28 }
 0x26a   : > { %2232 = vrot.lane.b32.xlu1 %v5747_v28, %s4663_s27  ;;  %2230 = vrot.lane.b32.xlu0 %v5753_v26, %s4663_s27 }
 0x26e   : > { %2108 = vrot.lane.b32.xlu1 %v5755_v9, %s4664_s28  ;;  %2106 = vrot.lane.b32.xlu0 %v5757_v23, %s4664_s28 }
 0x272   : > { %2236 = vrot.lane.b32.xlu1 %v5755_v9, %s4663_s27  ;;  %2234 = vrot.lane.b32.xlu0 %v5757_v23, %s4663_s27 }
 0x276   : > { %2112 = vrot.lane.b32.xlu1 %v5759_v14, %s4664_s28  ;;  %2110 = vrot.lane.b32.xlu0 %v5769_v27, %s4664_s28 }
 0x27a   : > { %2240 = vrot.lane.b32.xlu1 %v5759_v14, %s4663_s27  ;;  %2238 = vrot.lane.b32.xlu0 %v5769_v27, %s4663_s27 }
 0x27e   : > { %2116 = vrot.lane.b32.xlu1 %v5809_v53, %s4664_s28  ;;  %2114 = vrot.lane.b32.xlu0 %v5811_v49, %s4664_s28 }
 0x282   : > { %2244 = vrot.lane.b32.xlu1 %v5809_v53, %s4663_s27  ;;  %2242 = vrot.lane.b32.xlu0 %v5811_v49, %s4663_s27 }
 0x286   : > { %2120 = vrot.lane.b32.xlu1 %v5813_v61, %s4664_s28  ;;  %2118 = vrot.lane.b32.xlu0 %v5819_v42, %s4664_s28 }
 0x28a   : > { %2248 = vrot.lane.b32.xlu1 %v5813_v61, %s4663_s27  ;;  %2246 = vrot.lane.b32.xlu0 %v5819_v42, %s4663_s27 }
 0x28e   : > { %2124 = vrot.lane.b32.xlu1 %v5821_v19, %s4664_s28  ;;  %2122 = vrot.lane.b32.xlu0 %v5823_v30, %s4664_s28 }
 0x292   : > { %2252 = vrot.lane.b32.xlu1 %v5821_v19, %s4663_s27  ;;  %2250 = vrot.lane.b32.xlu0 %v5823_v30, %s4663_s27 }
 0x296   : > { %2128 = vrot.lane.b32.xlu1 %v5825_v37, %s4664_s28  ;;  %2126 = vrot.lane.b32.xlu0 %v5837_v33, %s4664_s28 }
 0x29a   : > { %2256 = vrot.lane.b32.xlu1 %v5825_v37, %s4663_s27  ;;  %2254 = vrot.lane.b32.xlu0 %v5837_v33, %s4663_s27 }
 0x29e   : > { %2132 = vrot.lane.b32.xlu1 %v2011_v44, %s4664_s28  ;;  %2130 = vrot.lane.b32.xlu0 %v2010_v10, %s4664_s28 }
 0x2a2   : > { %2260 = vrot.lane.b32.xlu1 %v2011_v44, %s4663_s27  ;;  %2258 = vrot.lane.b32.xlu0 %v2010_v10, %s4663_s27 }
 0x2a6   : > { %2136 = vrot.lane.b32.xlu1 %v5877_v35, %s4664_s28  ;;  %2134 = vrot.lane.b32.xlu0 %v5883_v32, %s4664_s28 }
 0x2aa   : > { %2264 = vrot.lane.b32.xlu1 %v5877_v35, %s4663_s27  ;;  %2262 = vrot.lane.b32.xlu0 %v5883_v32, %s4663_s27 }
 0x2ae   : > { %2140 = vrot.lane.b32.xlu1 %v5885_v15, %s4664_s28  ;;  %2138 = vrot.lane.b32.xlu0 %v5887_v43, %s4664_s28 }
 0x2b0   : > { %v2085_v41 = vpop.permute.xlu1 %2084  ;;  %v2083_v3 = vpop.permute.xlu0 %2082 }
 0x2b1   : > { %2179 = vst.msk [vmem:[#allocation2 + $0x18] sm:$0xff] %vm406_vm6, %v2085_v41  ;;  %2178 = vst.msk [vmem:[#allocation2 + $0x10] sm:$0xff] %vm406_vm6, %v2083_v3 }
 0x2b2   : > { %2268 = vrot.lane.b32.xlu1 %v5885_v15, %s4663_s27  ;;  %2266 = vrot.lane.b32.xlu0 %v5887_v43, %s4663_s27 }
 0x2b4   : > { %v2213_v0 = vpop.permute.xlu1 %2212  ;;  %v2211_v50 = vpop.permute.xlu0 %2210 }
 0x2b5   : > { %2307 = vst.msk [vmem:[#allocation2 + $0x17] sm:$0xff] %vm537_vm8, %v2213_v0 }
 0x2b6   : > { %2306 = vst.msk [vmem:[#allocation2 + $0xf] sm:$0xfe] %vm535_vm7, %v2211_v50  ;;  %2144 = vrot.lane.b32.xlu1 %v5889_v46, %s4664_s28  ;;  %2142 = vrot.lane.b32.xlu0 %v5899_v25, %s4664_s28 }
 0x2b8   : > { %v2089_v13 = vpop.permute.xlu1 %2088  ;;  %v2087_v11 = vpop.permute.xlu0 %2086 }
 0x2b9   : > { %2181 = vst.msk [vmem:[#allocation2 + $0x28] sm:$0xff] %vm406_vm6, %v2089_v13  ;;  %2180 = vst.msk [vmem:[#allocation2 + $0x20] sm:$0xff] %vm406_vm6, %v2087_v11 }
 0x2ba   : > { %2272 = vrot.lane.b32.xlu1 %v5889_v46, %s4663_s27  ;;  %2270 = vrot.lane.b32.xlu0 %v5899_v25, %s4663_s27 }
 0x2bc   : > { %v2217_v22 = vpop.permute.xlu1 %2216  ;;  %v2215_v57 = vpop.permute.xlu0 %2214  ;;  %v2373_v18 = vld [vmem:[#allocation2 + $0x18] sm:$0xff] }
 0x2bd   : > { %v2372_v55 = vld [vmem:[#allocation2 + $0x10] sm:$0xff]  ;;  %2309 = vst.msk [vmem:[#allocation2 + $0x27] sm:$0xff] %vm537_vm8, %v2217_v22 }
 0x2be   : > { %2308 = vst.msk [vmem:[#allocation2 + $0x1f] sm:$0xfe] %vm535_vm7, %v2215_v57  ;;  %4487 = vmatprep.mubr.msk.f32.mxu1 %vm171_vm3, %v2372_v55  ;;  %4542 = vmatprep.mubr.msk.f32.mxu0 %vm171_vm3, %v2372_v55 }
 0x2bf   : > { %4488 = vmatmul.mubr.msk.f32.vlgmr.msra.gmra.mxu1 %vm171_vm3, %v2373_v18  ;;  %4543 = vmatmul.mubr.msk.f32.gmra.mxu0 %vm171_vm3, %v2373_v18 }
 0x2c0   : > { %4588 = vmatpush3.msk.msra.mxu1 %vm734_vm2, %v4085_v59  ;;  %v2093_v8 = vpop.permute.xlu1 %2092  ;;  %v2091_v21 = vpop.permute.xlu0 %2090 }
 0x2c1   : > { %4589 = vmatprep.subr.mxu1 %v4084_v1  ;;  %2183 = vst.msk [vmem:[#allocation2 + $0x38] sm:$0xff] %vm406_vm6, %v2093_v8  ;;  %2182 = vst.msk [vmem:[#allocation2 + $0x30] sm:$0xff] %vm406_vm6, %v2091_v21 }
 0x2c2   : > { %4590 = vmatpush3.msra.mxu1 %v4084_v1 }
 0x2c4   : > { %v2221_v51 = vpop.permute.xlu1 %2220  ;;  %v2219_v45 = vpop.permute.xlu0 %2218  ;;  %v6043_v12 = vld [vmem:[#allocation2 + $0x28] sm:$0xff] }
 0x2c5   : > { %v6041_v56 = vld [vmem:[#allocation2 + $0x20] sm:$0xff]  ;;  %2311 = vst.msk [vmem:[#allocation2 + $0x37] sm:$0xff] %vm537_vm8, %v2221_v51 }
 0x2c6   : > { %2310 = vst.msk [vmem:[#allocation2 + $0x2f] sm:$0xfe] %vm535_vm7, %v2219_v45  ;;  %4490 = vmatprep.mubr.msk.f32.mxu1 %vm171_vm3, %v6041_v56  ;;  %4545 = vmatprep.mubr.msk.f32.mxu0 %vm171_vm3, %v6041_v56 }
 0x2c7   : > { %4491 = vmatmul.mubr.msk.f32.gmra.mxu1 %vm171_vm3, %v6043_v12  ;;  %4546 = vmatmul.mubr.msk.f32.gmra.mxu0 %vm171_vm3, %v6043_v12 }
 0x2c8   : > { %v2097_v28 = vpop.permute.xlu1 %2096  ;;  %v2095_v36 = vpop.permute.xlu0 %2094 }
 0x2c9   : > { %2185 = vst.msk [vmem:[#allocation2 + $0x48] sm:$0xff] %vm406_vm6, %v2097_v28  ;;  %2184 = vst.msk [vmem:[#allocation2 + $0x40] sm:$0xff] %vm406_vm6, %v2095_v36 }
 0x2cc   : > { %v2225_v26 = vpop.permute.xlu1 %2224  ;;  %v2223_v9 = vpop.permute.xlu0 %2222  ;;  %v6059_v14 = vld [vmem:[#allocation2 + $0x38] sm:$0xff] }
 0x2cd   : > { %v6057_v23 = vld [vmem:[#allocation2 + $0x30] sm:$0xff]  ;;  %2313 = vst.msk [vmem:[#allocation2 + $0x47] sm:$0xff] %vm537_vm8, %v2225_v26 }
 0x2ce   : > { %2312 = vst.msk [vmem:[#allocation2 + $0x3f] sm:$0xfe] %vm535_vm7, %v2223_v9  ;;  %4493 = vmatprep.mubr.msk.f32.mxu1 %vm171_vm3, %v6057_v23  ;;  %4548 = vmatprep.mubr.msk.f32.mxu0 %vm171_vm3, %v6057_v23 }
 0x2cf   : > { %4494 = vmatmul.mubr.msk.f32.gmra.mxu1 %vm171_vm3, %v6059_v14  ;;  %4549 = vmatmul.mubr.msk.f32.gmra.mxu0 %vm171_vm3, %v6059_v14 }
 0x2d0   : > { %v2101_v27 = vpop.permute.xlu1 %2100  ;;  %v2099_v60 = vpop.permute.xlu0 %2098 }
 0x2d1   : > { %2187 = vst.msk [vmem:[#allocation2 + $0x58] sm:$0xff] %vm406_vm6, %v2101_v27  ;;  %2186 = vst.msk [vmem:[#allocation2 + $0x50] sm:$0xff] %vm406_vm6, %v2099_v60 }
 0x2d4   : > { %v2229_v40 = vpop.permute.xlu1 %2228  ;;  %v2227_v4 = vpop.permute.xlu0 %2226  ;;  %v6075_v38 = vld [vmem:[#allocation2 + $0x48] sm:$0xff] }
 0x2d5   : > { %v6073_v52 = vld [vmem:[#allocation2 + $0x40] sm:$0xff]  ;;  %2315 = vst.msk [vmem:[#allocation2 + $0x57] sm:$0xff] %vm537_vm8, %v2229_v40 }
 0x2d6   : > { %2314 = vst.msk [vmem:[#allocation2 + $0x4f] sm:$0xfe] %vm535_vm7, %v2227_v4  ;;  %4496 = vmatprep.mubr.msk.f32.mxu1 %vm171_vm3, %v6073_v52  ;;  %4551 = vmatprep.mubr.msk.f32.mxu0 %vm171_vm3, %v6073_v52 }
 0x2d7   : > { %4497 = vmatmul.mubr.msk.f32.gmra.mxu1 %vm171_vm3, %v6075_v38  ;;  %4552 = vmatmul.mubr.msk.f32.gmra.mxu0 %vm171_vm3, %v6075_v38 }
 0x2d8   : > { %v2105_v16 = vpop.permute.xlu1 %2104  ;;  %v2103_v29 = vpop.permute.xlu0 %2102 }
 0x2d9   : > { %2189 = vst.msk [vmem:[#allocation2 + $0x68] sm:$0xff] %vm406_vm6, %v2105_v16  ;;  %2188 = vst.msk [vmem:[#allocation2 + $0x60] sm:$0xff] %vm406_vm6, %v2103_v29 }
 0x2dc   : > { %v2233_v53 = vpop.permute.xlu1 %2232  ;;  %v2231_v49 = vpop.permute.xlu0 %2230  ;;  %v6091_v62 = vld [vmem:[#allocation2 + $0x58] sm:$0xff] }
 0x2dd   : > { %v6089_v61 = vld [vmem:[#allocation2 + $0x50] sm:$0xff]  ;;  %2317 = vst.msk [vmem:[#allocation2 + $0x67] sm:$0xff] %vm537_vm8, %v2233_v53 }
 0x2de   : > { %2316 = vst.msk [vmem:[#allocation2 + $0x5f] sm:$0xfe] %vm535_vm7, %v2231_v49  ;;  %4499 = vmatprep.mubr.msk.f32.mxu1 %vm171_vm3, %v6089_v61  ;;  %4554 = vmatprep.mubr.msk.f32.mxu0 %vm171_vm3, %v6089_v61 }
 0x2df   : > { %4500 = vmatmul.mubr.msk.f32.gmra.mxu1 %vm171_vm3, %v6091_v62  ;;  %4555 = vmatmul.mubr.msk.f32.gmra.mxu0 %vm171_vm3, %v6091_v62 }
 0x2e0   : > { %v2109_v42 = vpop.permute.xlu1 %2108  ;;  %v2107_v19 = vpop.permute.xlu0 %2106 }
 0x2e1   : > { %2191 = vst.msk [vmem:[#allocation2 + $0x78] sm:$0xff] %vm406_vm6, %v2109_v42  ;;  %2190 = vst.msk [vmem:[#allocation2 + $0x70] sm:$0xff] %vm406_vm6, %v2107_v19 }
 0x2e4   : > { %v2237_v30 = vpop.permute.xlu1 %2236  ;;  %v2235_v37 = vpop.permute.xlu0 %2234  ;;  %v6107_v31 = vld [vmem:[#allocation2 + $0x68] sm:$0xff] }
 0x2e5   : > { %v6105_v33 = vld [vmem:[#allocation2 + $0x60] sm:$0xff]  ;;  %2319 = vst.msk [vmem:[#allocation2 + $0x77] sm:$0xff] %vm537_vm8, %v2237_v30 }
 0x2e6   : > { %2318 = vst.msk [vmem:[#allocation2 + $0x6f] sm:$0xfe] %vm535_vm7, %v2235_v37  ;;  %4502 = vmatprep.mubr.msk.f32.mxu1 %vm171_vm3, %v6105_v33  ;;  %4557 = vmatprep.mubr.msk.f32.mxu0 %vm171_vm3, %v6105_v33 }
 0x2e7   : > { %4503 = vmatmul.mubr.msk.f32.gmra.mxu1 %vm171_vm3, %v6107_v31  ;;  %4558 = vmatmul.mubr.msk.f32.gmra.mxu0 %vm171_vm3, %v6107_v31 }
 0x2e8   : > { %v2113_v17 = vpop.permute.xlu1 %2112  ;;  %v2111_v39 = vpop.permute.xlu0 %2110 }
 0x2e9   : > { %2193 = vst.msk [vmem:[#allocation2 + $0x88] sm:$0xff] %vm406_vm6, %v2113_v17  ;;  %2192 = vst.msk [vmem:[#allocation2 + $0x80] sm:$0xff] %vm406_vm6, %v2111_v39 }
 0x2ec   : > { %v2241_v2 = vpop.permute.xlu1 %2240  ;;  %v2239_v5 = vpop.permute.xlu0 %2238  ;;  %v6123_v7 = vld [vmem:[#allocation2 + $0x78] sm:$0xff] }
 0x2ed   : > { %v6121_v24 = vld [vmem:[#allocation2 + $0x70] sm:$0xff]  ;;  %2321 = vst.msk [vmem:[#allocation2 + $0x87] sm:$0xff] %vm537_vm8, %v2241_v2 }
 0x2ee   : > { %2320 = vst.msk [vmem:[#allocation2 + $0x7f] sm:$0xfe] %vm535_vm7, %v2239_v5  ;;  %4505 = vmatprep.mubr.msk.f32.mxu1 %vm171_vm3, %v6121_v24  ;;  %4560 = vmatprep.mubr.msk.f32.mxu0 %vm171_vm3, %v6121_v24 }
 0x2ef   : > { %4506 = vmatmul.mubr.msk.f32.gmra.mxu1 %vm171_vm3, %v6123_v7  ;;  %4561 = vmatmul.mubr.msk.f32.gmra.mxu0 %vm171_vm3, %v6123_v7 }
 0x2f0   : > { %v2117_v54 = vpop.permute.xlu1 %2116  ;;  %v2115_v20 = vpop.permute.xlu0 %2114 }
 0x2f1   : > { %2195 = vst.msk [vmem:[#allocation2 + $0x98] sm:$0xff] %vm406_vm6, %v2117_v54  ;;  %2194 = vst.msk [vmem:[#allocation2 + $0x90] sm:$0xff] %vm406_vm6, %v2115_v20 }
 0x2f4   : > { %v2245_v6 = vpop.permute.xlu1 %2244  ;;  %v2243_v63 = vpop.permute.xlu0 %2242  ;;  %v6139_v48 = vld [vmem:[#allocation2 + $0x88] sm:$0xff] }
 0x2f5   : > { %v6137_v34 = vld [vmem:[#allocation2 + $0x80] sm:$0xff]  ;;  %2323 = vst.msk [vmem:[#allocation2 + $0x97] sm:$0xff] %vm537_vm8, %v2245_v6 }
 0x2f6   : > { %2322 = vst.msk [vmem:[#allocation2 + $0x8f] sm:$0xfe] %vm535_vm7, %v2243_v63  ;;  %4508 = vmatprep.mubr.msk.f32.mxu1 %vm171_vm3, %v6137_v34  ;;  %4563 = vmatprep.mubr.msk.f32.mxu0 %vm171_vm3, %v6137_v34 }
 0x2f7   : > { %4509 = vmatmul.mubr.msk.f32.gmra.mxu1 %vm171_vm3, %v6139_v48  ;;  %4564 = vmatmul.mubr.msk.f32.gmra.mxu0 %vm171_vm3, %v6139_v48 }
 0x2f8   : > { %v2121_v44 = vpop.permute.xlu1 %2120  ;;  %v2119_v10 = vpop.permute.xlu0 %2118 }
 0x2f9   : > { %2197 = vst.msk [vmem:[#allocation2 + $0xa8] sm:$0xff] %vm406_vm6, %v2121_v44  ;;  %2196 = vst.msk [vmem:[#allocation2 + $0xa0] sm:$0xff] %vm406_vm6, %v2119_v10  ;;  %v4541_v10 = vpop.f32.mrf.mxu0 }
 0x2fc   : > { %v2249_v35 = vpop.permute.xlu1 %2248  ;;  %v2247_v58 = vpop.permute.xlu0 %2246  ;;  %v6155_v32 = vld [vmem:[#allocation2 + $0x98] sm:$0xff] }
 0x2fd   : > { %v6153_v47 = vld [vmem:[#allocation2 + $0x90] sm:$0xff]  ;;  %2325 = vst.msk [vmem:[#allocation2 + $0xa7] sm:$0xff] %vm537_vm8, %v2249_v35 }
 0x2fe   : > { %2324 = vst.msk [vmem:[#allocation2 + $0x9f] sm:$0xfe] %vm535_vm7, %v2247_v58  ;;  %4511 = vmatprep.mubr.msk.f32.mxu1 %vm171_vm3, %v6153_v47  ;;  %4566 = vmatprep.mubr.msk.f32.mxu0 %vm171_vm3, %v6153_v47 }
 0x2ff   : > { %4512 = vmatmul.mubr.msk.f32.gmra.mxu1 %vm171_vm3, %v6155_v32  ;;  %4567 = vmatmul.mubr.msk.f32.gmra.mxu0 %vm171_vm3, %v6155_v32 }
 0x300   : > { %v2125_v15 = vpop.permute.xlu1 %2124  ;;  %v2123_v43 = vpop.permute.xlu0 %2122 }
 0x301   : > { %2199 = vst.msk [vmem:[#allocation2 + $0xb8] sm:$0xff] %vm406_vm6, %v2125_v15  ;;  %2198 = vst.msk [vmem:[#allocation2 + $0xb0] sm:$0xff] %vm406_vm6, %v2123_v43 }
 0x304   : > { %v2253_v46 = vpop.permute.xlu1 %2252  ;;  %v2251_v25 = vpop.permute.xlu0 %2250  ;;  %v6171_v41 = vld [vmem:[#allocation2 + $0xa8] sm:$0xff] }
 0x305   : > { %v6169_v59 = vld [vmem:[#allocation2 + $0xa0] sm:$0xff]  ;;  %2327 = vst.msk [vmem:[#allocation2 + $0xb7] sm:$0xff] %vm537_vm8, %v2253_v46 }
 0x306   : > { %2326 = vst.msk [vmem:[#allocation2 + $0xaf] sm:$0xfe] %vm535_vm7, %v2251_v25  ;;  %4514 = vmatprep.mubr.msk.f32.mxu1 %vm171_vm3, %v6169_v59  ;;  %4569 = vmatprep.mubr.msk.f32.mxu0 %vm171_vm3, %v6169_v59 }
 0x307   : > { %4515 = vmatmul.mubr.msk.f32.gmra.mxu1 %vm171_vm3, %v6171_v41  ;;  %4570 = vmatmul.mubr.msk.f32.gmra.mxu0 %vm171_vm3, %v6171_v41 }
 0x308   : > { %v2129_v3 = vpop.permute.xlu1 %2128  ;;  %v2127_v0 = vpop.permute.xlu0 %2126 }
 0x309   : > { %2201 = vst.msk [vmem:[#allocation2 + $0xc8] sm:$0xff] %vm406_vm6, %v2129_v3  ;;  %2200 = vst.msk [vmem:[#allocation2 + $0xc0] sm:$0xff] %vm406_vm6, %v2127_v0 }
 0x30c   : > { %v2257_v50 = vpop.permute.xlu1 %2256  ;;  %v2255_v13 = vpop.permute.xlu0 %2254  ;;  %v6187_v22 = vld [vmem:[#allocation2 + $0xb8] sm:$0xff] }
 0x30d   : > { %v6185_v11 = vld [vmem:[#allocation2 + $0xb0] sm:$0xff]  ;;  %2329 = vst.msk [vmem:[#allocation2 + $0xc7] sm:$0xff] %vm537_vm8, %v2257_v50 }
 0x30e   : > { %2328 = vst.msk [vmem:[#allocation2 + $0xbf] sm:$0xfe] %vm535_vm7, %v2255_v13  ;;  %4517 = vmatprep.mubr.msk.f32.mxu1 %vm171_vm3, %v6185_v11  ;;  %4572 = vmatprep.mubr.msk.f32.mxu0 %vm171_vm3, %v6185_v11 }
 0x30f   : > { %4518 = vmatmul.mubr.msk.f32.gmra.mxu1 %vm171_vm3, %v6187_v22  ;;  %4573 = vmatmul.mubr.msk.f32.gmra.mxu0 %vm171_vm3, %v6187_v22 }
 0x310   : > { %v2133_v57 = vpop.permute.xlu1 %2132  ;;  %v2131_v55 = vpop.permute.xlu0 %2130 }
 0x311   : > { %2203 = vst.msk [vmem:[#allocation2 + $0xd8] sm:$0xff] %vm406_vm6, %v2133_v57  ;;  %2202 = vst.msk [vmem:[#allocation2 + $0xd0] sm:$0xff] %vm406_vm6, %v2131_v55 }
 0x314   : > { %v2261_v18 = vpop.permute.xlu1 %2260  ;;  %v2259_v1 = vpop.permute.xlu0 %2258  ;;  %v6203_v21 = vld [vmem:[#allocation2 + $0xc8] sm:$0xff] }
 0x315   : > { %v6201_v8 = vld [vmem:[#allocation2 + $0xc0] sm:$0xff]  ;;  %2331 = vst.msk [vmem:[#allocation2 + $0xd7] sm:$0xff] %vm537_vm8, %v2261_v18 }
 0x316   : > { %2330 = vst.msk [vmem:[#allocation2 + $0xcf] sm:$0xfe] %vm535_vm7, %v2259_v1  ;;  %4520 = vmatprep.mubr.msk.f32.mxu1 %vm171_vm3, %v6201_v8  ;;  %4575 = vmatprep.mubr.msk.f32.mxu0 %vm171_vm3, %v6201_v8 }
 0x317   : > { %4521 = vmatmul.mubr.msk.f32.gmra.mxu1 %vm171_vm3, %v6203_v21  ;;  %4576 = vmatmul.mubr.msk.f32.gmra.mxu0 %vm171_vm3, %v6203_v21 }
 0x318   : > { %v2137_v51 = vpop.permute.xlu1 %2136  ;;  %v2135_v45 = vpop.permute.xlu0 %2134 }
 0x319   : > { %2205 = vst.msk [vmem:[#allocation2 + $0xe8] sm:$0xff] %vm406_vm6, %v2137_v51  ;;  %2204 = vst.msk [vmem:[#allocation2 + $0xe0] sm:$0xff] %vm406_vm6, %v2135_v45 }
 0x31c   : > { %v2265_v28 = vpop.permute.xlu1 %2264  ;;  %v2263_v36 = vpop.permute.xlu0 %2262  ;;  %v2397_v9 = vld [vmem:[#allocation2 + $0xd8] sm:$0xff] }
 0x31d   : > { %v2396_v26 = vld [vmem:[#allocation2 + $0xd0] sm:$0xff]  ;;  %2333 = vst.msk [vmem:[#allocation2 + $0xe7] sm:$0xff] %vm537_vm8, %v2265_v28 }
 0x31e   : > { %2332 = vst.msk [vmem:[#allocation2 + $0xdf] sm:$0xfe] %vm535_vm7, %v2263_v36  ;;  %4523 = vmatprep.mubr.msk.f32.mxu1 %vm171_vm3, %v2396_v26  ;;  %4578 = vmatprep.mubr.msk.f32.mxu0 %vm171_vm3, %v2396_v26 }
 0x31f   : > { %4524 = vmatmul.mubr.msk.f32.gmra.mxu1 %vm171_vm3, %v2397_v9  ;;  %4579 = vmatmul.mubr.msk.f32.gmra.mxu0 %vm171_vm3, %v2397_v9 }
 0x320   : > { %v2141_v27 = vpop.permute.xlu1 %2140  ;;  %v2139_v60 = vpop.permute.xlu0 %2138 }
 0x321   : > { %2207 = vst.msk [vmem:[#allocation2 + $0xf8] sm:$0xff] %vm406_vm6, %v2141_v27  ;;  %2206 = vst.msk [vmem:[#allocation2 + $0xf0] sm:$0xff] %vm406_vm6, %v2139_v60 }
 0x324   : > { %v2269_v40 = vpop.permute.xlu1 %2268  ;;  %v2267_v4 = vpop.permute.xlu0 %2266  ;;  %v2399_v29 = vld [vmem:[#allocation2 + $0xe8] sm:$0xff] }
 0x325   : > { %v2398_v16 = vld [vmem:[#allocation2 + $0xe0] sm:$0xff]  ;;  %2335 = vst.msk [vmem:[#allocation2 + $0xf7] sm:$0xff] %vm537_vm8, %v2269_v40 }
 0x326   : > { %2334 = vst.msk [vmem:[#allocation2 + $0xef] sm:$0xfe] %vm535_vm7, %v2267_v4  ;;  %4526 = vmatprep.mubr.msk.f32.mxu1 %vm171_vm3, %v2398_v16  ;;  %4581 = vmatprep.mubr.msk.f32.mxu0 %vm171_vm3, %v2398_v16 }
 0x327   : > { %4527 = vmatmul.mubr.msk.f32.gmra.mxu1 %vm171_vm3, %v2399_v29  ;;  %4582 = vmatmul.mubr.msk.f32.gmra.mxu0 %vm171_vm3, %v2399_v29 }
 0x328   : > { %v2145_v53 = vpop.permute.xlu1 %2144  ;;  %v2143_v49 = vpop.permute.xlu0 %2142 }
 0x329   : > { %2209 = vst.msk [vmem:[#allocation2 + $0x108] sm:$0xff] %vm406_vm6, %v2145_v53  ;;  %2208 = vst.msk [vmem:[#allocation2 + $0x100] sm:$0xff] %vm406_vm6, %v2143_v49 }
 0x32c   : > { %v2273_v42 = vpop.permute.xlu1 %2272  ;;  %v2271_v19 = vpop.permute.xlu0 %2270  ;;  %v2401_v37 = vld [vmem:[#allocation2 + $0xf8] sm:$0xff] }
 0x32d   : > { %v2400_v30 = vld [vmem:[#allocation2 + $0xf0] sm:$0xff]  ;;  %2337 = vst.msk [vmem:[#allocation2 + $0x107] sm:$0xff] %vm537_vm8, %v2273_v42 }
 0x32e   : > { %2336 = vst.msk [vmem:[#allocation2 + $0xff] sm:$0xfe] %vm535_vm7, %v2271_v19  ;;  %4529 = vmatprep.mubr.msk.f32.mxu1 %vm171_vm3, %v2400_v30  ;;  %4584 = vmatprep.mubr.msk.f32.mxu0 %vm171_vm3, %v2400_v30 }
 0x32f   : > { %4530 = vmatmul.mubr.msk.f32.gmra.mxu1 %vm171_vm3, %v2401_v37  ;;  %4585 = vmatmul.mubr.msk.f32.gmra.mxu0 %vm171_vm3, %v2401_v37 }
 0x334   : > { %v2403_v39 = vld [vmem:[#allocation2 + $0x108] sm:$0xff] }
 0x335   : > { %v2402_v17 = vld [vmem:[#allocation2 + $0x100] sm:$0xff] }
 0x336   : > { %4532 = vmatprep.mubr.msk.f32.mxu1 %vm171_vm3, %v2402_v17 }
 0x337   : > { %4533 = vmatmul.mubr.msk.f32.gmra.mxu1 %vm171_vm3, %v2403_v39 }
 0x338   : > { %4591 = vmatprep.mubr.msk.f32.mxu1 %vm171_vm3, %v6041_v56  ;;  %v3085_v56 = vld [vmem:[#allocation2 + $0x110] sm:$0xff] }
 0x33b   : > { %4592 = vmatmul.mubr.msk.f32.vlgmr.msra.gmra.mxu1 %vm171_vm3, %v6043_v12  ;;  %v3086_v12 = vld [vmem:[#allocation2 + $0x118] sm:$0xff] }
 0x33c   : > { %4594 = vmatprep.mubr.msk.f32.mxu1 %vm171_vm3, %v6057_v23 }
 0x33f   : > { %4595 = vmatmul.mubr.msk.f32.gmra.mxu1 %vm171_vm3, %v6059_v14 }
 0x340   : > { %4597 = vmatprep.mubr.msk.f32.mxu1 %vm171_vm3, %v6073_v52 }
 0x343   : > { %4598 = vmatmul.mubr.msk.f32.gmra.mxu1 %vm171_vm3, %v6075_v38 }
 0x344   : > { %4600 = vmatprep.mubr.msk.f32.mxu1 %vm171_vm3, %v6089_v61 }
 0x347   : > { %4601 = vmatmul.mubr.msk.f32.gmra.mxu1 %vm171_vm3, %v6091_v62 }
 0x348   : > { %4603 = vmatprep.mubr.msk.f32.mxu1 %vm171_vm3, %v6105_v33 }
 0x34b   : > { %4604 = vmatmul.mubr.msk.f32.gmra.mxu1 %vm171_vm3, %v6107_v31 }
 0x34c   : > { %4606 = vmatprep.mubr.msk.f32.mxu1 %vm171_vm3, %v6121_v24 }
 0x34f   : > { %4607 = vmatmul.mubr.msk.f32.gmra.mxu1 %vm171_vm3, %v6123_v7 }
 0x350   : > { %4609 = vmatprep.mubr.msk.f32.mxu1 %vm171_vm3, %v6137_v34 }
 0x353   : > { %4610 = vmatmul.mubr.msk.f32.gmra.mxu1 %vm171_vm3, %v6139_v48 }
 0x354   : > { %4612 = vmatprep.mubr.msk.f32.mxu1 %vm171_vm3, %v6153_v47  ;;  %v2896_v47 = vpop.f32.mrf.mxu0 }
 0x357   : > { %4613 = vmatmul.mubr.msk.f32.gmra.mxu1 %vm171_vm3, %v6155_v32 }
 0x358   : > { %4615 = vmatprep.mubr.msk.f32.mxu1 %vm171_vm3, %v6169_v59 }
 0x35b   : > { %4616 = vmatmul.mubr.msk.f32.gmra.mxu1 %vm171_vm3, %v6171_v41 }
 0x35c   : > { %4618 = vmatprep.mubr.msk.f32.mxu1 %vm171_vm3, %v6185_v11 }
 0x35f   : > { %4619 = vmatmul.mubr.msk.f32.gmra.mxu1 %vm171_vm3, %v6187_v22 }
 0x360   : > { %4621 = vmatprep.mubr.msk.f32.mxu1 %vm171_vm3, %v6201_v8 }
 0x363   : > { %4622 = vmatmul.mubr.msk.f32.gmra.mxu1 %vm171_vm3, %v6203_v21 }
 0x364   : > { %4624 = vmatprep.mubr.msk.f32.mxu1 %vm171_vm3, %v2396_v26 }
 0x367   : > { %4625 = vmatmul.mubr.msk.f32.gmra.mxu1 %vm171_vm3, %v2397_v9 }
 0x368   : > { %4627 = vmatprep.mubr.msk.f32.mxu1 %vm171_vm3, %v2398_v16 }
 0x36b   : > { %4628 = vmatmul.mubr.msk.f32.gmra.mxu1 %vm171_vm3, %v2399_v29 }
 0x36c   : > { %4630 = vmatprep.mubr.msk.f32.mxu1 %vm171_vm3, %v2400_v30 }
 0x36f   : > { %4631 = vmatmul.mubr.msk.f32.gmra.mxu1 %vm171_vm3, %v2401_v37 }
 0x370   : > { %4633 = vmatprep.mubr.msk.f32.mxu1 %vm171_vm3, %v2402_v17 }
 0x373   : > { %4634 = vmatmul.mubr.msk.f32.gmra.mxu1 %vm171_vm3, %v2403_v39 }
 0x374   : > { %4636 = vmatprep.mubr.msk.f32.mxu1 %vm171_vm3, %v3085_v56 }
 0x377   : > { %4637 = vmatmul.mubr.msk.f32.gmra.mxu1 %vm171_vm3, %v3086_v12 }
 0x37f   : > { %v4489_v23 = vpop.f32.mrf.mxu1  ;;  %v4544_v15 = vpop.f32.mrf.mxu0 }
 0x380   : > { %v2902_v45 = vadd.f32 %v4541_v10, %v4489_v23 }
 0x381   : > { %v2572_v14 = vpop.f32.mrf.mxu1  ;;  %v2906_v46 = vpop.f32.mrf.mxu0 }
 0x382   : > { %v2897_v26 = vadd.f32 %v2896_v47, %v2572_v14 }
 0x387   : > { %v4492_v52 = vpop.f32.mrf.mxu1  ;;  %v4547_v59 = vpop.f32.mrf.mxu0 }
 0x388   : > { %v2912_v40 = vadd.f32 %v4544_v15, %v4492_v52 }
 0x389   : > { %v2582_v38 = vpop.f32.mrf.mxu1  ;;  %v2916_v3 = vpop.f32.mrf.mxu0 }
 0x38a   : > { %v2907_v16 = vadd.f32 %v2906_v46, %v2582_v38 }
 0x38f   : > { %v4495_v61 = vpop.f32.mrf.mxu1  ;;  %v4550_v50 = vpop.f32.mrf.mxu0 }
 0x390   : > { %v2922_v17 = vadd.f32 %v4547_v59, %v4495_v61 }
 0x391   : > { %v6295_v62 = vpop.f32.mrf.mxu1  ;;  %v2926_v11 = vpop.f32.mrf.mxu0 }
 0x392   : > { %v2917_v14 = vadd.f32 %v2916_v3, %v6295_v62 }
 0x397   : > { %v6297_v33 = vpop.f32.mrf.mxu1  ;;  %v6341_v57 = vpop.f32.mrf.mxu0 }
 0x399   : > { %v6299_v31 = vpop.f32.mrf.mxu1  ;;  %v6345_v18 = vpop.f32.mrf.mxu0 }
 0x39f   : > { %v6301_v2 = vpop.f32.mrf.mxu1  ;;  %v6349_v8 = vpop.f32.mrf.mxu0 }
 0x3a1   : > { %v6303_v5 = vpop.f32.mrf.mxu1  ;;  %v6355_v28 = vpop.f32.mrf.mxu0 }
 0x3a7   : > { %v6305_v24 = vpop.f32.mrf.mxu1  ;;  %v6357_v9 = vpop.f32.mrf.mxu0 }
 0x3a9   : > { %v6307_v7 = vpop.f32.mrf.mxu1  ;;  %v6360_v53 = vpop.f32.mrf.mxu0 }
 0x3af   : > { %v6309_v54 = vpop.f32.mrf.mxu1  ;;  %v6364_v39 = vpop.f32.mrf.mxu0 }
 0x3b1   : > { %v6311_v20 = vpop.f32.mrf.mxu1 }
 0x3b7   : > { %v6313_v6 = vpop.f32.mrf.mxu1 }
 0x3b9   : > { %v6315_v63 = vpop.f32.mrf.mxu1 }
 0x3bf   : > { %v6317_v34 = vpop.f32.mrf.mxu1 }
 0x3c1   : > { %v6319_v48 = vpop.f32.mrf.mxu1 }
 0x3c7   : > { %v6321_v44 = vpop.f32.mrf.mxu1 }
 0x3c9   : > { %v6323_v35 = vpop.f32.mrf.mxu1 }
 0x3cf   : > { %v6325_v58 = vpop.f32.mrf.mxu1 }
 0x3d1   : > { %v6327_v32 = vpop.f32.mrf.mxu1 }
 0x3d7   : > { %v6329_v43 = vpop.f32.mrf.mxu1 }
 0x3d9   : > { %v6331_v25 = vpop.f32.mrf.mxu1 }
 0x3df   : > { %v6333_v41 = vpop.f32.mrf.mxu1 }
 0x3e1   : > { %v6335_v0 = vpop.f32.mrf.mxu1 }
 0x3e7   : > { %v6337_v13 = vpop.f32.mrf.mxu1 }
 0x3e9   : > { %v6339_v22 = vpop.f32.mrf.mxu1 }
 0x3ef   : > { %v6343_v55 = vpop.f32.mrf.mxu1 }
 0x3f1   : > { %v6347_v1 = vpop.f32.mrf.mxu1 }
 0x3f7   : > { %v6351_v21 = vpop.f32.mrf.mxu1 }
 0x3f9   : > { %v6353_v51 = vpop.f32.mrf.mxu1 }
 0x3fb   : > { %v4593_v36 = vpop.f32.mrf.mxu1 }
 0x3fc   : > { %v3415_v27 = vadd.f32 %v4593_v36, %v2902_v45 }
 0x3fd   : > { %v3255_v60 = vpop.f32.mrf.mxu1 }
 0x3fe   : > { %3447 = vst.msk [vmem:[#allocation3 + $0x8] sm:$0xff] %vm244_vm4, %v3415_v27  ;;  %v3414_v4 = vadd.f32 %v3255_v60, %v2897_v26  ;;  %v3549_v49 = vmul.f32 %v3415_v27, %v3415_v27  ;;  %v3479_v56 = vsel %vm244_vm4, %v3415_v27, 0.0  ;;  %v2932_v26 = vadd.f32 %v4550_v50, %v6297_v33  ;;  %v6374_v27 = vpop.f32.mrf.mxu0 }
 0x3ff   : > { %v4596_v29 = vpop.f32.mrf.mxu1 }
 0x400   : > { %3446 = vst.msk [vmem:[#allocation3] sm:$0xff] %vm244_vm4, %v3414_v4  ;;  %v3478_v42 = vsel %vm244_vm4, %v3414_v4, 0.0  ;;  %v3548_v19 = vmul.f32 %v3414_v4, %v3414_v4  ;;  %v3417_v30 = vadd.f32 %v4596_v29, %v2912_v40  ;;  %v3581_v47 = vsel %vm244_vm4, %v3549_v49, 0.0 }
 0x401   : > { %v3265_v37 = vpop.f32.mrf.mxu1  ;;  %v3480_v52 = vadd.f32 %v3479_v56, %v3478_v42  ;;  %v2927_v40 = vadd.f32 %v2926_v11, %v6299_v31  ;;  %v6381_v42 = vpop.f32.mrf.mxu0  ;;  %v2942_v31 = vadd.f32 %v6341_v57, %v6301_v2 }
 0x402   : > { %v3580_v12 = vsel %vm244_vm4, %v3548_v19, 0.0  ;;  %3449 = vst.msk [vmem:[#allocation3 + $0x18] sm:$0xff] %vm244_vm4, %v3417_v30  ;;  %v3416_v23 = vadd.f32 %v3265_v37, %v2907_v16  ;;  %v3551_v38 = vmul.f32 %v3417_v30, %v3417_v30  ;;  %v3483_v62 = vsel %vm244_vm4, %v3417_v30, 0.0 }
 0x403   : > { %v4599_v10 = vpop.f32.mrf.mxu1  ;;  %v3582_v59 = vadd.f32 %v3581_v47, %v3580_v12 }
 0x404   : > { %3448 = vst.msk [vmem:[#allocation3 + $0x10] sm:$0xff] %vm244_vm4, %v3416_v23  ;;  %v3481_v61 = vsel %vm244_vm4, %v3416_v23, 0.0  ;;  %v3550_v15 = vmul.f32 %v3416_v23, %v3416_v23  ;;  %v3419_v46 = vadd.f32 %v4599_v10, %v2922_v17  ;;  %v3585_v4 = vsel %vm244_vm4, %v3551_v38, 0.0 }
 0x405   : > { %v3482_v45 = vadd.f32 %v3481_v61, %v3480_v52  ;;  %v3275_v36 = vpop.f32.mrf.mxu1  ;;  %v6392_v61 = vpop.f32.mrf.mxu0 }
 0x406   : > { %v3583_v3 = vsel %vm244_vm4, %v3550_v15, 0.0  ;;  %3451 = vst.msk [vmem:[#allocation3 + $0x28] sm:$0xff] %vm244_vm4, %v3419_v46  ;;  %v3418_v60 = vadd.f32 %v3275_v36, %v2917_v14  ;;  %v3553_v19 = vmul.f32 %v3419_v46, %v3419_v46  ;;  %v3487_v11 = vsel %vm244_vm4, %v3419_v46, 0.0 }
 0x407   : > { %v3584_v16 = vadd.f32 %v3583_v3, %v3582_v59  ;;  %v3484_v29 = vadd.f32 %v3483_v62, %v3482_v45  ;;  %v4602_v49 = vpop.f32.mrf.mxu1  ;;  %v2937_v14 = vadd.f32 %v6345_v18, %v6303_v5  ;;  %v2952_v5 = vadd.f32 %v6349_v8, %v6305_v24  ;;  %v6399_v18 = vpop.f32.mrf.mxu0 }
 0x408   : > { %3450 = vst.msk [vmem:[#allocation3 + $0x20] sm:$0xff] %vm244_vm4, %v3418_v60  ;;  %v3485_v33 = vsel %vm244_vm4, %v3418_v60, 0.0  ;;  %v3552_v50 = vmul.f32 %v3418_v60, %v3418_v60  ;;  %v3421_v30 = vadd.f32 %v4602_v49, %v2932_v26  ;;  %v3589_v15 = vsel %vm244_vm4, %v3553_v19, 0.0 }
 0x409   : > { %v3486_v37 = vadd.f32 %v3485_v33, %v3484_v29  ;;  %v3586_v17 = vadd.f32 %v3585_v4, %v3584_v16  ;;  %v3285_v56 = vpop.f32.mrf.mxu1  ;;  %v2947_v60 = vadd.f32 %v6355_v28, %v6307_v7 }
 0x40a   : > { %v3587_v12 = vsel %vm244_vm4, %v3552_v50, 0.0  ;;  %3453 = vst.msk [vmem:[#allocation3 + $0x38] sm:$0xff] %vm244_vm4, %v3421_v30  ;;  %v3420_v23 = vadd.f32 %v3285_v56, %v2927_v40  ;;  %v3555_v38 = vmul.f32 %v3421_v30, %v3421_v30  ;;  %v3491_v26 = vsel %vm244_vm4, %v3421_v30, 0.0 }
 0x40b   : > { %v3588_v52 = vadd.f32 %v3587_v12, %v3586_v17  ;;  %v3488_v10 = vadd.f32 %v3487_v11, %v3486_v37  ;;  %v4605_v47 = vpop.f32.mrf.mxu1  ;;  %v2962_v37 = vadd.f32 %v6357_v9, %v6309_v54  ;;  %v6411_v17 = vpop.f32.mrf.mxu0 }
 0x40c   : > { %3452 = vst.msk [vmem:[#allocation3 + $0x30] sm:$0xff] %vm244_vm4, %v3420_v23  ;;  %v3489_v2 = vsel %vm244_vm4, %v3420_v23, 0.0  ;;  %v3554_v57 = vmul.f32 %v3420_v23, %v3420_v23  ;;  %v3423_v46 = vadd.f32 %v4605_v47, %v2942_v31  ;;  %v3593_v40 = vsel %vm244_vm4, %v3555_v38, 0.0 }
 0x40d   : > { %v3490_v59 = vadd.f32 %v3489_v2, %v3488_v10  ;;  %v3590_v45 = vadd.f32 %v3589_v15, %v3588_v52  ;;  %v3295_v36 = vpop.f32.mrf.mxu1  ;;  %v2957_v31 = vadd.f32 %v6360_v53, %v6311_v20  ;;  %v6418_v52 = vpop.f32.mrf.mxu0  ;;  %v2972_v20 = vadd.f32 %v6364_v39, %v6313_v6 }
 0x40e   : > { %v3591_v62 = vsel %vm244_vm4, %v3554_v57, 0.0  ;;  %3455 = vst.msk [vmem:[#allocation3 + $0x48] sm:$0xff] %vm244_vm4, %v3423_v46  ;;  %v3422_v3 = vadd.f32 %v3295_v36, %v2937_v14  ;;  %v3557_v49 = vmul.f32 %v3423_v46, %v3423_v46  ;;  %v3495_v7 = vsel %vm244_vm4, %v3423_v46, 0.0 }
 0x40f   : > { %v3592_v4 = vadd.f32 %v3591_v62, %v3590_v45  ;;  %v3492_v16 = vadd.f32 %v3491_v26, %v3490_v59  ;;  %v4608_v29 = vpop.f32.mrf.mxu1  ;;  %v2967_v59 = vadd.f32 %v6374_v27, %v6315_v63  ;;  %v2996_v62 = vpop.f32.mrf.mxu0 }
 0x410   : > { %3454 = vst.msk [vmem:[#allocation3 + $0x40] sm:$0xff] %vm244_vm4, %v3422_v3  ;;  %v3493_v24 = vsel %vm244_vm4, %v3422_v3, 0.0  ;;  %v3556_v8 = vmul.f32 %v3422_v3, %v3422_v3  ;;  %v3425_v19 = vadd.f32 %v4608_v29, %v2952_v5  ;;  %v3597_v54 = vsel %vm244_vm4, %v3557_v49, 0.0 }
 0x411   : > { %v3494_v33 = vadd.f32 %v3493_v24, %v3492_v16  ;;  %v3594_v50 = vadd.f32 %v3593_v40, %v3592_v4  ;;  %v3305_v30 = vpop.f32.mrf.mxu1  ;;  %v2982_v29 = vadd.f32 %v6381_v42, %v6317_v34  ;;  %v4574_v63 = vpop.f32.mrf.mxu0 }
 0x412   : > { %v3595_v28 = vsel %vm244_vm4, %v3556_v8, 0.0  ;;  %3457 = vst.msk [vmem:[#allocation3 + $0x58] sm:$0xff] %vm244_vm4, %v3425_v19  ;;  %v3424_v56 = vadd.f32 %v3305_v30, %v2947_v60  ;;  %v3559_v12 = vmul.f32 %v3425_v19, %v3425_v19  ;;  %v3499_v53 = vsel %vm244_vm4, %v3425_v19, 0.0 }
 0x413   : > { %v3596_v11 = vadd.f32 %v3595_v28, %v3594_v50  ;;  %v3496_v23 = vadd.f32 %v3495_v7, %v3494_v33  ;;  %v4611_v14 = vpop.f32.mrf.mxu1  ;;  %v2977_v8 = vadd.f32 %v6392_v61, %v6319_v48 }
 0x414   : > { %3456 = vst.msk [vmem:[#allocation3 + $0x50] sm:$0xff] %vm244_vm4, %v3424_v56  ;;  %v3497_v9 = vsel %vm244_vm4, %v3424_v56, 0.0  ;;  %v3558_v38 = vmul.f32 %v3424_v56, %v3424_v56  ;;  %v3427_v10 = vadd.f32 %v4611_v14, %v2962_v37  ;;  %v3601_v45 = vsel %vm244_vm4, %v3559_v12, 0.0  ;;  %v3006_v12 = vpop.f32.mrf.mxu0 }
 0x415   : > { %v3498_v47 = vadd.f32 %v3497_v9, %v3496_v23  ;;  %v3598_v15 = vadd.f32 %v3597_v54, %v3596_v11  ;;  %v3315_v2 = vpop.f32.mrf.mxu1  ;;  %v2992_v11 = vadd.f32 %v6399_v18, %v6321_v44  ;;  %v2987_v14 = vadd.f32 %v6411_v17, %v6323_v35 }
 0x416   : > { %v3599_v57 = vsel %vm244_vm4, %v3558_v38, 0.0  ;;  %3459 = vst.msk [vmem:[#allocation3 + $0x68] sm:$0xff] %vm244_vm4, %v3427_v10  ;;  %v3426_v46 = vadd.f32 %v3315_v2, %v2957_v31  ;;  %v3561_v3 = vmul.f32 %v3427_v10, %v3427_v10  ;;  %v3503_v27 = vsel %vm244_vm4, %v3427_v10, 0.0 }
 0x417   : > { %v3600_v36 = vadd.f32 %v3599_v57, %v3598_v15  ;;  %v3500_v5 = vadd.f32 %v3499_v53, %v3498_v47  ;;  %v4614_v26 = vpop.f32.mrf.mxu1  ;;  %v4577_v47 = vpop.f32.mrf.mxu0 }
 0x418   : > { %3458 = vst.msk [vmem:[#allocation3 + $0x60] sm:$0xff] %vm244_vm4, %v3426_v46  ;;  %v3501_v6 = vsel %vm244_vm4, %v3426_v46, 0.0  ;;  %v3560_v39 = vmul.f32 %v3426_v46, %v3426_v46  ;;  %v3429_v60 = vadd.f32 %v4614_v26, %v2972_v20  ;;  %v3605_v37 = vsel %vm244_vm4, %v3561_v3, 0.0 }
 0x419   : > { %v3502_v40 = vadd.f32 %v3501_v6, %v3500_v5  ;;  %v3602_v4 = vadd.f32 %v3601_v45, %v3600_v36  ;;  %v3325_v16 = vpop.f32.mrf.mxu1  ;;  %v3002_v46 = vadd.f32 %v6418_v52, %v6325_v58  ;;  %v2997_v45 = vadd.f32 %v2996_v62, %v6327_v32  ;;  %v3016_v6 = vpop.f32.mrf.mxu0 }
 0x41a   : > { %v3603_v49 = vsel %vm244_vm4, %v3560_v39, 0.0  ;;  %3461 = vst.msk [vmem:[#allocation3 + $0x78] sm:$0xff] %vm244_vm4, %v3429_v60  ;;  %v3428_v24 = vadd.f32 %v3325_v16, %v2967_v59  ;;  %v3563_v33 = vmul.f32 %v3429_v60, %v3429_v60  ;;  %v3507_v48 = vsel %vm244_vm4, %v3429_v60, 0.0 }
 0x41b   : > { %v3604_v19 = vadd.f32 %v3603_v49, %v3602_v4  ;;  %v3504_v50 = vadd.f32 %v3503_v27, %v3502_v40  ;;  %v4617_v30 = vpop.f32.mrf.mxu1  ;;  %v4580_v27 = vpop.f32.mrf.mxu0 }
 0x41c   : > { %3460 = vst.msk [vmem:[#allocation3 + $0x70] sm:$0xff] %vm244_vm4, %v3428_v24  ;;  %v3505_v34 = vsel %vm244_vm4, %v3428_v24, 0.0  ;;  %v3562_v42 = vmul.f32 %v3428_v24, %v3428_v24  ;;  %v3431_v7 = vadd.f32 %v4617_v30, %v2982_v29  ;;  %v3609_v54 = vsel %vm244_vm4, %v3563_v33, 0.0 }
 0x41d   : > { %v3506_v28 = vadd.f32 %v3505_v34, %v3504_v50  ;;  %v3606_v56 = vadd.f32 %v3605_v37, %v3604_v19  ;;  %v3335_v31 = vpop.f32.mrf.mxu1  ;;  %v3012_v29 = vadd.f32 %v4574_v63, %v6329_v43  ;;  %v3007_v24 = vadd.f32 %v3006_v12, %v6331_v25 }
 0x41e   : > { %v3607_v61 = vsel %vm244_vm4, %v3562_v42, 0.0  ;;  %3463 = vst.msk [vmem:[#allocation3 + $0x88] sm:$0xff] %vm244_vm4, %v3431_v7  ;;  %v3430_v23 = vadd.f32 %v3335_v31, %v2977_v8  ;;  %v3565_v15 = vmul.f32 %v3431_v7, %v3431_v7  ;;  %v3511_v35 = vsel %vm244_vm4, %v3431_v7, 0.0 }
 0x41f   : > { %v3608_v9 = vadd.f32 %v3607_v61, %v3606_v56  ;;  %v3508_v38 = vadd.f32 %v3507_v48, %v3506_v28  ;;  %v4620_v10 = vpop.f32.mrf.mxu1  ;;  %v3022_v28 = vadd.f32 %v4577_v47, %v6333_v41  ;;  %v3026_v56 = vpop.f32.mrf.mxu0  ;;  %v3017_v12 = vadd.f32 %v3016_v6, %v6335_v0 }
 0x420   : > { %3462 = vst.msk [vmem:[#allocation3 + $0x80] sm:$0xff] %vm244_vm4, %v3430_v23  ;;  %v3509_v44 = vsel %vm244_vm4, %v3430_v23, 0.0  ;;  %v3564_v18 = vmul.f32 %v3430_v23, %v3430_v23  ;;  %v3433_v2 = vadd.f32 %v4620_v10, %v2992_v11  ;;  %v3613_v39 = vsel %vm244_vm4, %v3565_v15, 0.0 }
 0x421   : > { %v3510_v20 = vadd.f32 %v3509_v44, %v3508_v38  ;;  %v3610_v53 = vadd.f32 %v3609_v54, %v3608_v9  ;;  %v3345_v57 = vpop.f32.mrf.mxu1  ;;  %v4583_v54 = vpop.f32.mrf.mxu0 }
 0x422   : > { %v3611_v17 = vsel %vm244_vm4, %v3564_v18, 0.0  ;;  %3465 = vst.msk [vmem:[#allocation3 + $0x98] sm:$0xff] %vm244_vm4, %v3433_v2  ;;  %v3432_v59 = vadd.f32 %v3345_v57, %v2987_v14  ;;  %v3567_v5 = vmul.f32 %v3433_v2, %v3433_v2  ;;  %v3515_v32 = vsel %vm244_vm4, %v3433_v2, 0.0 }
 0x423   : > { %v3612_v36 = vadd.f32 %v3611_v17, %v3610_v53  ;;  %v3512_v26 = vadd.f32 %v3511_v35, %v3510_v20  ;;  %v4623_v3 = vpop.f32.mrf.mxu1  ;;  %v3032_v18 = vadd.f32 %v4580_v27, %v6337_v13  ;;  %v3027_v53 = vadd.f32 %v3026_v56, %v6339_v22 }
 0x424   : > { %3464 = vst.msk [vmem:[#allocation3 + $0x90] sm:$0xff] %vm244_vm4, %v3432_v59  ;;  %v3513_v58 = vsel %vm244_vm4, %v3432_v59, 0.0  ;;  %v3566_v52 = vmul.f32 %v3432_v59, %v3432_v59  ;;  %v3435_v60 = vadd.f32 %v4623_v3, %v3002_v46  ;;  %v3617_v8 = vsel %vm244_vm4, %v3567_v5, 0.0  ;;  %v3036_v59 = vpop.f32.mrf.mxu0 }
 0x425   : > { %v3514_v40 = vadd.f32 %v3513_v58, %v3512_v26  ;;  %v3614_v4 = vadd.f32 %v3613_v39, %v3612_v36  ;;  %v3355_v16 = vpop.f32.mrf.mxu1  ;;  %v3042_v39 = vadd.f32 %v4583_v54, %v6343_v55 }
 0x426   : > { %v3615_v62 = vsel %vm244_vm4, %v3566_v52, 0.0  ;;  %3467 = vst.msk [vmem:[#allocation3 + $0xa8] sm:$0xff] %vm244_vm4, %v3435_v60  ;;  %v3434_v49 = vadd.f32 %v3355_v16, %v2997_v45  ;;  %v3569_v30 = vmul.f32 %v3435_v60, %v3435_v60  ;;  %v3519_v25 = vsel %vm244_vm4, %v3435_v60, 0.0  ;;  %v4586_v58 = vpop.f32.mrf.mxu0 }
 0x427   : > { %v3616_v19 = vadd.f32 %v3615_v62, %v3614_v4  ;;  %v3516_v33 = vadd.f32 %v3515_v32, %v3514_v40  ;;  %v4626_v50 = vpop.f32.mrf.mxu1  ;;  %v3037_v40 = vadd.f32 %v3036_v59, %v6347_v1 }
 0x428   : > { %3466 = vst.msk [vmem:[#allocation3 + $0xa0] sm:$0xff] %vm244_vm4, %v3434_v49  ;;  %v3517_v43 = vsel %vm244_vm4, %v3434_v49, 0.0  ;;  %v3568_v63 = vmul.f32 %v3434_v49, %v3434_v49  ;;  %v3437_v37 = vadd.f32 %v4626_v50, %v3012_v29  ;;  %v3621_v9 = vsel %vm244_vm4, %v3569_v30, 0.0 }
 0x429   : > { %v3518_v34 = vadd.f32 %v3517_v43, %v3516_v33  ;;  %v3618_v42 = vadd.f32 %v3617_v8, %v3616_v19  ;;  %v3365_v7 = vpop.f32.mrf.mxu1  ;;  %v3046_v33 = vpop.f32.mrf.mxu0  ;;  %v3052_v50 = vadd.f32 %v4586_v58, %v6351_v21 }
 0x42a   : > { %v3619_v31 = vsel %vm244_vm4, %v3568_v63, 0.0  ;;  %3469 = vst.msk [vmem:[#allocation3 + $0xb8] sm:$0xff] %vm244_vm4, %v3437_v37  ;;  %v3436_v11 = vadd.f32 %v3365_v7, %v3007_v24  ;;  %v3571_v61 = vmul.f32 %v3437_v37, %v3437_v37  ;;  %v3523_v0 = vsel %vm244_vm4, %v3437_v37, 0.0 }
 0x42b   : > { %v3620_v48 = vadd.f32 %v3619_v31, %v3618_v42  ;;  %v3520_v23 = vadd.f32 %v3519_v25, %v3518_v34  ;;  %v4629_v14 = vpop.f32.mrf.mxu1  ;;  %v3047_v63 = vadd.f32 %v3046_v33, %v6353_v51  ;;  %v6539_v33 = vld [vmem:[#allocation3 + $0x68] sm:$0xff] }
 0x42c   : > { %3468 = vst.msk [vmem:[#allocation3 + $0xb0] sm:$0xff] %vm244_vm4, %v3436_v11  ;;  %v3521_v41 = vsel %vm244_vm4, %v3436_v11, 0.0  ;;  %v3570_v38 = vmul.f32 %v3436_v11, %v3436_v11  ;;  %v3439_v10 = vadd.f32 %v4629_v14, %v3022_v28  ;;  %v3625_v57 = vsel %vm244_vm4, %v3571_v61, 0.0 }
 0x42d   : > { %v3522_v47 = vadd.f32 %v3521_v41, %v3520_v23  ;;  %v3622_v15 = vadd.f32 %v3621_v9, %v3620_v48  ;;  %v3375_v44 = vpop.f32.mrf.mxu1 }
 0x42e   : > { %v3623_v2 = vsel %vm244_vm4, %v3570_v38, 0.0  ;;  %3471 = vst.msk [vmem:[#allocation3 + $0xc8] sm:$0xff] %vm244_vm4, %v3439_v10  ;;  %v3438_v20 = vadd.f32 %v3375_v44, %v3017_v12  ;;  %v3573_v45 = vmul.f32 %v3439_v10, %v3439_v10  ;;  %v3527_v22 = vsel %vm244_vm4, %v3439_v10, 0.0 }
 0x42f   : > { %v3624_v46 = vadd.f32 %v3623_v2, %v3622_v15  ;;  %v3524_v35 = vadd.f32 %v3523_v0, %v3522_v47  ;;  %v4632_v17 = vpop.f32.mrf.mxu1 }
 0x430   : > { %3470 = vst.msk [vmem:[#allocation3 + $0xc0] sm:$0xff] %vm244_vm4, %v3438_v20  ;;  %v3525_v13 = vsel %vm244_vm4, %v3438_v20, 0.0  ;;  %v3572_v36 = vmul.f32 %v3438_v20, %v3438_v20  ;;  %v3441_v5 = vadd.f32 %v4632_v17, %v3032_v18  ;;  %v3629_v32 = vsel %vm244_vm4, %v3573_v45, 0.0 }
 0x431   : > { %v3526_v26 = vadd.f32 %v3525_v13, %v3524_v35  ;;  %v3626_v3 = vadd.f32 %v3625_v57, %v3624_v46  ;;  %v3385_v6 = vpop.f32.mrf.mxu1 }
 0x432   : > { %v3627_v52 = vsel %vm244_vm4, %v3572_v36, 0.0  ;;  %3473 = vst.msk [vmem:[#allocation3 + $0xd8] sm:$0xff] %vm244_vm4, %v3441_v5  ;;  %v3440_v60 = vadd.f32 %v3385_v6, %v3027_v53  ;;  %v3575_v16 = vmul.f32 %v3441_v5, %v3441_v5  ;;  %v3531_v1 = vsel %vm244_vm4, %v3441_v5, 0.0 }
 0x433   : > { %v3628_v4 = vadd.f32 %v3627_v52, %v3626_v3  ;;  %v3528_v29 = vadd.f32 %v3527_v22, %v3526_v26  ;;  %v4635_v27 = vpop.f32.mrf.mxu1 }
 0x434   : > { %3472 = vst.msk [vmem:[#allocation3 + $0xd0] sm:$0xff] %vm244_vm4, %v3440_v60  ;;  %v3529_v55 = vsel %vm244_vm4, %v3440_v60, 0.0  ;;  %v3574_v62 = vmul.f32 %v3440_v60, %v3440_v60  ;;  %v3443_v49 = vadd.f32 %v4635_v27, %v3042_v39  ;;  %v3633_v37 = vsel %vm244_vm4, %v3575_v16, 0.0  ;;  %v6519_v16 = vld [vmem:[#allocation3 + $0x18] sm:$0xff]  ;;  %v6523_v27 = vld [vmem:[#allocation3 + $0x28] sm:$0xff] }
 0x435   : > { %v3530_v24 = vadd.f32 %v3529_v55, %v3528_v29  ;;  %v3630_v8 = vadd.f32 %v3629_v32, %v3628_v4  ;;  %v3395_v19 = vpop.f32.mrf.mxu1  ;;  %v6517_v4 = vld [vmem:[#allocation3] sm:$0xff]  ;;  %v6521_v29 = vld [vmem:[#allocation3 + $0x10] sm:$0xff]  ;;  %v6527_v55 = vld [vmem:[#allocation3 + $0x38] sm:$0xff] }
 0x436   : > { %v3631_v30 = vsel %vm244_vm4, %v3574_v62, 0.0  ;;  %3475 = vst.msk [vmem:[#allocation3 + $0xe8] sm:$0xff] %vm244_vm4, %v3443_v49  ;;  %v3442_v43 = vadd.f32 %v3395_v19, %v3037_v40  ;;  %v3577_v28 = vmul.f32 %v3443_v49, %v3443_v49  ;;  %v3535_v48 = vsel %vm244_vm4, %v3443_v49, 0.0  ;;  %v6515_v40 = vld [vmem:[#allocation3 + $0x8] sm:$0xff]  ;;  %v6525_v32 = vld [vmem:[#allocation3 + $0x20] sm:$0xff]  ;;  %v6529_v62 = vld [vmem:[#allocation3 + $0x30] sm:$0xff] }
 0x437   : > { %v3632_v34 = vadd.f32 %v3631_v30, %v3630_v8  ;;  %v3532_v42 = vadd.f32 %v3531_v1, %v3530_v24  ;;  %v4638_v7 = vpop.f32.mrf.mxu1  ;;  %v6531_v49 = vld [vmem:[#allocation3 + $0x48] sm:$0xff]  ;;  %v6533_v24 = vld [vmem:[#allocation3 + $0x40] sm:$0xff]  ;;  %v6535_v8 = vld [vmem:[#allocation3 + $0x58] sm:$0xff] }
 0x438   : > { %3474 = vst.msk [vmem:[#allocation3 + $0xe0] sm:$0xff] %vm244_vm4, %v3442_v43  ;;  %v3533_v56 = vsel %vm244_vm4, %v3442_v43, 0.0  ;;  %v3576_v21 = vmul.f32 %v3442_v43, %v3442_v43  ;;  %v3445_v25 = vadd.f32 %v4638_v7, %v3052_v50  ;;  %v3637_v54 = vsel %vm244_vm4, %v3577_v28, 0.0  ;;  %v6537_v19 = vld [vmem:[#allocation3 + $0x50] sm:$0xff]  ;;  %v6541_v50 = vld [vmem:[#allocation3 + $0x60] sm:$0xff] }
 0x439   : > { %v3534_v31 = vadd.f32 %v3533_v56, %v3532_v42  ;;  %v3634_v11 = vadd.f32 %v3633_v37, %v3632_v34  ;;  %v3405_v12 = vpop.f32.mrf.mxu1  ;;  %v6551_v37 = vld [vmem:[#allocation3 + $0x78] sm:$0xff]  ;;  %v3671_v34 = vld [vmem:[#allocation3 + $0x70] sm:$0xff]  ;;  %v6553_v42 = vld [vmem:[#allocation3 + $0x88] sm:$0xff] }
 0x43a   : > { %v3635_v61 = vsel %vm244_vm4, %v3576_v21, 0.0  ;;  %3477 = vst.msk [vmem:[#allocation3 + $0xf8] sm:$0xff] %vm244_vm4, %v3445_v25  ;;  %v3444_v51 = vadd.f32 %v3405_v12, %v3047_v63  ;;  %v3579_v9 = vmul.f32 %v3445_v25, %v3445_v25  ;;  %v3539_v15 = vsel %vm244_vm4, %v3445_v25, 0.0  ;;  %v3673_v25 = vld [vmem:[#allocation3 + $0x80] sm:$0xff] }
 0x43b   : > { %v3636_v23 = vadd.f32 %v3635_v61, %v3634_v11  ;;  %v3536_v14 = vadd.f32 %v3535_v48, %v3534_v31  ;;  %v6563_v31 = vld [vmem:[#allocation3 + $0x98] sm:$0xff]  ;;  %v3675_v11 = vld [vmem:[#allocation3 + $0x90] sm:$0xff] }
 0x43c   : > { %3476 = vst.msk [vmem:[#allocation3 + $0xf0] sm:$0xff] %vm244_vm4, %v3444_v51  ;;  %v3537_v41 = vsel %vm244_vm4, %v3444_v51, 0.0  ;;  %v3578_v38 = vmul.f32 %v3444_v51, %v3444_v51  ;;  %v3641_v2 = vsel %vm244_vm4, %v3579_v9, 0.0 }
 0x43d   : > { %v3538_v10 = vadd.f32 %v3537_v41, %v3536_v14  ;;  %v3638_v47 = vadd.f32 %v3637_v54, %v3636_v23  ;;  %v6573_v23 = vld [vmem:[#allocation3 + $0xa8] sm:$0xff]  ;;  %v3677_v14 = vld [vmem:[#allocation3 + $0xa0] sm:$0xff]  ;;  %v6575_v54 = vld [vmem:[#allocation3 + $0xb8] sm:$0xff] }
 0x43e   : > { %v3639_v44 = vsel %vm244_vm4, %v3578_v38, 0.0 }
 0x43f   : > { %v3540_v18 = vadd.f32 %v3539_v15, %v3538_v10  ;;  %v3640_v0 = vadd.f32 %v3639_v44, %v3638_v47  ;;  %v3679_v47 = vld [vmem:[#allocation3 + $0xb0] sm:$0xff]  ;;  %v3682_v15 = vld [vmem:[#allocation3 + $0xc8] sm:$0xff]  ;;  %v3681_v44 = vld [vmem:[#allocation3 + $0xc0] sm:$0xff] }
 0x441   : > { %v3541_v20 = vrot.slane %v3540_v18, 4  ;;  %v3642_v53 = vadd.f32 %v3641_v2, %v3640_v0 }
 0x443   : > { %v3542_v57 = vadd.f32 %v3541_v20, %v3540_v18  ;;  %v3643_v46 = vrot.slane %v3642_v53, 4 }
 0x445   : > { %v3543_v35 = vrot.slane %v3542_v57, 2  ;;  %v3644_v17 = vadd.f32 %v3643_v46, %v3642_v53  ;;  %v3684_v53 = vld [vmem:[#allocation3 + $0xd8] sm:$0xff]  ;;  %v3686_v46 = vld [vmem:[#allocation3 + $0xe8] sm:$0xff] }
 0x447   : > { %v3544_v59 = vadd.f32 %v3543_v35, %v3542_v57  ;;  %v3645_v45 = vrot.slane %v3644_v17, 2  ;;  %v3683_v57 = vld [vmem:[#allocation3 + $0xd0] sm:$0xff] }
 0x449   : > { %v3545_v13 = vrot.slane %v3544_v59, 1  ;;  %v3646_v36 = vadd.f32 %v3645_v45, %v3644_v17 }
 0x44b   : > { %v3546_v5 = vadd.f32 %v3545_v13, %v3544_v59  ;;  %v3647_v26 = vrot.slane %v3646_v36, 1  ;;  %v3685_v13 = vld [vmem:[#allocation3 + $0xe0] sm:$0xff] }
 0x44d   : > { %v3648_v3 = vadd.f32 %v3647_v26, %v3646_v36  ;;  %v6511_v6 = vmul.f32 0.00390625, %v3546_v5  ;;  %v3688_v36 = vld [vmem:[#allocation3 + $0xf8] sm:$0xff]  ;;  %v3687_v5 = vld [vmem:[#allocation3 + $0xf0] sm:$0xff] }
 0x44f   : > { %v3651_v39 = vmul.f32 0.00390625, %v3648_v3  ;;  %v3652_v58 = vmul.f32 %v6511_v6, %v6511_v6  ;;  %v3689_v1 = vsub.f32 %v6517_v4, %v6511_v6  ;;  %v3690_v30 = vsub.f32 %v6515_v40, %v6511_v6 }
 0x450   : > { %v3691_v43 = vsub.f32 %v6521_v29, %v6511_v6  ;;  %v3692_v63 = vsub.f32 %v6519_v16, %v6511_v6  ;;  %v3693_v7 = vsub.f32 %v6525_v32, %v6511_v6  ;;  %v3694_v28 = vsub.f32 %v6523_v27, %v6511_v6 }
 0x451   : > { %v3653_v22 = vsub.f32 %v3651_v39, %v3652_v58  ;;  %v3695_v56 = vsub.f32 %v6529_v62, %v6511_v6  ;;  %v3696_v21 = vsub.f32 %v6527_v55, %v6511_v6  ;;  %v3697_v12 = vsub.f32 %v6533_v24, %v6511_v6 }
 0x452   : > { %v3698_v48 = vsub.f32 %v6531_v49, %v6511_v6  ;;  %v3699_v61 = vsub.f32 %v6537_v19, %v6511_v6  ;;  %v3700_v51 = vsub.f32 %v6535_v8, %v6511_v6  ;;  %v3701_v9 = vsub.f32 %v6541_v50, %v6511_v6 }
 0x453   : > { %v3654_v52 = vmax.f32 %v3653_v22, 0.0  ;;  %v3702_v41 = vsub.f32 %v6539_v33, %v6511_v6  ;;  %v3703_v38 = vsub.f32 %v3671_v34, %v6511_v6  ;;  %v3704_v10 = vsub.f32 %v6551_v37, %v6511_v6  ;;  %v3754_v37 = vld [vmem:[%s4755_s24 + $0x8] sm:$0xff]  ;;  %v3755_v34 = vld [vmem:[%s4755_s24 + $0x10] sm:$0xff] }
 0x454   : > { %v3705_v18 = vsub.f32 %v3673_v25, %v6511_v6  ;;  %v3706_v0 = vsub.f32 %v6553_v42, %v6511_v6  ;;  %v3707_v2 = vsub.f32 %v3675_v11, %v6511_v6  ;;  %v3708_v20 = vsub.f32 %v6563_v31, %v6511_v6  ;;  %v3756_v42 = vld [vmem:[%s4755_s24 + $0x18] sm:$0xff]  ;;  %v3757_v25 = vld [vmem:[%s4755_s24 + $0x20] sm:$0xff]  ;;  %v3758_v31 = vld [vmem:[%s4755_s24 + $0x28] sm:$0xff] }
 0x455   : > { %v3655_v60 = vadd.f32 1e-05, %v3654_v52  ;;  %v3709_v35 = vsub.f32 %v3677_v14, %v6511_v6  ;;  %v3710_v17 = vsub.f32 %v6573_v23, %v6511_v6  ;;  %v3711_v59 = vsub.f32 %v3679_v47, %v6511_v6  ;;  %v3759_v11 = vld [vmem:[%s4755_s24 + $0x30] sm:$0xff]  ;;  %v3761_v14 = vld [vmem:[%s4755_s24 + $0x40] sm:$0xff] }
 0x456   : > { %v3712_v45 = vsub.f32 %v6575_v54, %v6511_v6  ;;  %v3713_v26 = vsub.f32 %v3681_v44, %v6511_v6  ;;  %v3714_v3 = vsub.f32 %v3682_v15, %v6511_v6  ;;  %v3715_v39 = vsub.f32 %v3683_v57, %v6511_v6  ;;  %v3762_v54 = vld [vmem:[%s4755_s24 + $0x48] sm:$0xff]  ;;  %v3764_v15 = vld [vmem:[%s4755_s24 + $0x58] sm:$0xff]  ;;  %v3765_v44 = vld [vmem:[%s4755_s24 + $0x60] sm:$0xff] }
 0x457   : > { %4652 = vrsqrt.f32 %v3655_v60  ;;  %v3716_v58 = vsub.f32 %v3684_v53, %v6511_v6  ;;  %v3717_v52 = vsub.f32 %v3685_v13, %v6511_v6  ;;  %v3718_v60 = vsub.f32 %v3686_v46, %v6511_v6  ;;  %v3767_v57 = vld [vmem:[%s4755_s24 + $0x70] sm:$0xff]  ;;  %v3768_v46 = vld [vmem:[%s4755_s24 + $0x78] sm:$0xff] }
 0x458   : > { %v3719_v40 = vsub.f32 %v3687_v5, %v6511_v6  ;;  %v3720_v4 = vsub.f32 %v3688_v36, %v6511_v6 }
 0x464   : > { %v4653_v22 = vpop.eup %4652 }
 0x465   : > { %v3721_v16 = vmul.f32 %v4653_v22, %v3689_v1  ;;  %v3722_v29 = vmul.f32 %v4653_v22, %v3690_v30  ;;  %v3723_v27 = vmul.f32 %v4653_v22, %v3691_v43  ;;  %v3724_v32 = vmul.f32 %v4653_v22, %v3692_v63  ;;  %v3753_v63 = vld [vmem:[%s4755_s24] sm:$0xff] }
 0x466   : > { %v3725_v55 = vmul.f32 %v4653_v22, %v3693_v7  ;;  %v3726_v62 = vmul.f32 %v4653_v22, %v3694_v28  ;;  %v3727_v49 = vmul.f32 %v4653_v22, %v3695_v56  ;;  %v3728_v24 = vmul.f32 %v4653_v22, %v3696_v21 }
 0x467   : > { %v3729_v8 = vmul.f32 %v4653_v22, %v3697_v12  ;;  %v3730_v19 = vmul.f32 %v4653_v22, %v3698_v48  ;;  %v3731_v33 = vmul.f32 %v4653_v22, %v3699_v61  ;;  %v3732_v50 = vmul.f32 %v4653_v22, %v3700_v51  ;;  %v3760_v12 = vld [vmem:[%s4755_s24 + $0x38] sm:$0xff] }
 0x468   : > { %v6604_v6 = vmul.f32 %v4653_v22, %v3701_v9  ;;  %v6606_v1 = vmul.f32 %v4653_v22, %v3702_v41  ;;  %v6608_v30 = vmul.f32 %v4653_v22, %v3703_v38  ;;  %v6610_v43 = vmul.f32 %v4653_v22, %v3704_v10  ;;  %v3763_v9 = vld [vmem:[%s4755_s24 + $0x50] sm:$0xff] }
 0x469   : > { %v6616_v7 = vmul.f32 %v4653_v22, %v3705_v18  ;;  %v6618_v28 = vmul.f32 %v4653_v22, %v3706_v0  ;;  %v6620_v56 = vmul.f32 %v4653_v22, %v3707_v2  ;;  %v6622_v21 = vmul.f32 %v4653_v22, %v3708_v20  ;;  %v3766_v18 = vld [vmem:[%s4755_s24 + $0x68] sm:$0xff] }
 0x46a   : > { %v6628_v48 = vmul.f32 %v4653_v22, %v3709_v35  ;;  %v6630_v61 = vmul.f32 %v4653_v22, %v3710_v17  ;;  %v6632_v51 = vmul.f32 %v4653_v22, %v3711_v59  ;;  %v6634_v23 = vmul.f32 %v4653_v22, %v3712_v45  ;;  %v3769_v35 = vld [vmem:[%s4755_s24 + $0x80] sm:$0xff]  ;;  %v3770_v17 = vld [vmem:[%s4755_s24 + $0x88] sm:$0xff]  ;;  %v3771_v59 = vld [vmem:[%s4755_s24 + $0x90] sm:$0xff] }
 0x46b   : > { %v6639_v41 = vmul.f32 %v4653_v22, %v3713_v26  ;;  %v6641_v38 = vmul.f32 %v4653_v22, %v3714_v3  ;;  %v6643_v10 = vmul.f32 %v4653_v22, %v3715_v39  ;;  %v6645_v47 = vmul.f32 %v4653_v22, %v3716_v58  ;;  %v3772_v45 = vld [vmem:[%s4755_s24 + $0x98] sm:$0xff]  ;;  %v3773_v3 = vld [vmem:[%s4755_s24 + $0xa0] sm:$0xff]  ;;  %v3774_v39 = vld [vmem:[%s4755_s24 + $0xa8] sm:$0xff] }
 0x46c   : > { %v6657_v0 = vmul.f32 %v4653_v22, %v3717_v52  ;;  %v6659_v2 = vmul.f32 %v4653_v22, %v3718_v60  ;;  %v6661_v20 = vmul.f32 %v4653_v22, %v3719_v40  ;;  %v6663_v53 = vmul.f32 %v4653_v22, %v3720_v4  ;;  %v3775_v58 = vld [vmem:[%s4755_s24 + $0xb0] sm:$0xff]  ;;  %v3776_v4 = vld [vmem:[%s4755_s24 + $0xb8] sm:$0xff] }
 0x46d   : > { %v3785_v13 = vadd.f32 %v3753_v63, %v3721_v16  ;;  %v3786_v36 = vadd.f32 %v3754_v37, %v3722_v29  ;;  %v3787_v5 = vadd.f32 %v3755_v34, %v3723_v27  ;;  %v3788_v26 = vadd.f32 %v3756_v42, %v3724_v32  ;;  %v3778_v16 = vld [vmem:[%s4755_s24 + $0xc8] sm:$0xff] }
 0x46e   : > { %6782 = vst [vmem:[#allocation4_spill] sm:$0xff] %v6663_v53  ;;  %v3789_v22 = vadd.f32 %v3757_v25, %v3725_v55  ;;  %v3790_v52 = vadd.f32 %v3758_v31, %v3726_v62  ;;  %v3791_v60 = vadd.f32 %v3759_v11, %v3727_v49  ;;  %v3792_v40 = vadd.f32 %v3760_v12, %v3728_v24  ;;  %v3777_v53 = vld [vmem:[%s4755_s24 + $0xc0] sm:$0xff]  ;;  %v3779_v55 = vld [vmem:[%s4755_s24 + $0xd0] sm:$0xff]  ;;  %v3780_v62 = vld [vmem:[%s4755_s24 + $0xd8] sm:$0xff] }
 0x46f   : > { %v3793_v29 = vadd.f32 %v3761_v14, %v3729_v8  ;;  %v3794_v27 = vadd.f32 %v3762_v54, %v3730_v19  ;;  %v3795_v32 = vadd.f32 %v3763_v9, %v3731_v33  ;;  %v3796_v63 = vadd.f32 %v3764_v15, %v3732_v50  ;;  %3817 = vst.msk [vmem:[%s6655_s23] sm:$0xff] %vm244_vm4, %v3785_v13  ;;  %v3781_v49 = vld [vmem:[%s4755_s24 + $0xe0] sm:$0xff]  ;;  %v3782_v50 = vld [vmem:[%s4755_s24 + $0xe8] sm:$0xff] }
 0x470   : > { %3818 = vst.msk [vmem:[%s6655_s23 + $0x8] sm:$0xff] %vm244_vm4, %v3786_v36  ;;  %3819 = vst.msk [vmem:[%s6655_s23 + $0x10] sm:$0xff] %vm244_vm4, %v3787_v5  ;;  %v3797_v24 = vadd.f32 %v3765_v44, %v6604_v6  ;;  %v3798_v8 = vadd.f32 %v3766_v18, %v6606_v1  ;;  %v3799_v19 = vadd.f32 %v3767_v57, %v6608_v30  ;;  %v3783_v6 = vld [vmem:[%s4755_s24 + $0xf0] sm:$0xff]  ;;  %v3784_v1 = vld [vmem:[%s4755_s24 + $0xf8] sm:$0xff] }
 0x471   : > { %3820 = vst.msk [vmem:[%s6655_s23 + $0x18] sm:$0xff] %vm244_vm4, %v3788_v26  ;;  %v3800_v33 = vadd.f32 %v3768_v46, %v6610_v43  ;;  %3821 = vst.msk [vmem:[%s6655_s23 + $0x20] sm:$0xff] %vm244_vm4, %v3789_v22  ;;  %v3801_v30 = vadd.f32 %v3769_v35, %v6616_v7  ;;  %v3802_v37 = vadd.f32 %v3770_v17, %v6618_v28 }
 0x472   : > { %3822 = vst.msk [vmem:[%s6655_s23 + $0x28] sm:$0xff] %vm244_vm4, %v3790_v52  ;;  %3823 = vst.msk [vmem:[%s6655_s23 + $0x30] sm:$0xff] %vm244_vm4, %v3791_v60  ;;  %v3803_v43 = vadd.f32 %v3771_v59, %v6620_v56  ;;  %v3804_v34 = vadd.f32 %v3772_v45, %v6622_v21  ;;  %v3805_v42 = vadd.f32 %v3773_v3, %v6628_v48 }
 0x473   : > { %3824 = vst.msk [vmem:[%s6655_s23 + $0x38] sm:$0xff] %vm244_vm4, %v3792_v40  ;;  %3825 = vst.msk [vmem:[%s6655_s23 + $0x40] sm:$0xff] %vm244_vm4, %v3793_v29  ;;  %v3806_v7 = vadd.f32 %v3774_v39, %v6630_v61  ;;  %v3807_v28 = vadd.f32 %v3775_v58, %v6632_v51  ;;  %v3808_v56 = vadd.f32 %v3776_v4, %v6634_v23 }
 0x474   : > { %3826 = vst.msk [vmem:[%s6655_s23 + $0x48] sm:$0xff] %vm244_vm4, %v3794_v27  ;;  %3827 = vst.msk [vmem:[%s6655_s23 + $0x50] sm:$0xff] %vm244_vm4, %v3795_v32  ;;  %v3809_v21 = vadd.f32 %v3777_v53, %v6639_v41  ;;  %v3810_v25 = vadd.f32 %v3778_v16, %v6641_v38  ;;  %v3811_v31 = vadd.f32 %v3779_v55, %v6643_v10 }
 0x475   : > { %3828 = vst.msk [vmem:[%s6655_s23 + $0x58] sm:$0xff] %vm244_vm4, %v3796_v63  ;;  %3829 = vst.msk [vmem:[%s6655_s23 + $0x60] sm:$0xff] %vm244_vm4, %v3797_v24  ;;  %v3812_v11 = vadd.f32 %v3780_v62, %v6645_v47  ;;  %v3813_v12 = vadd.f32 %v3781_v49, %v6657_v0  ;;  %v3814_v48 = vadd.f32 %v3782_v50, %v6659_v2  ;;  %v6783_v51 = vld [vmem:[#allocation4_spill] sm:$0xff] }
 0x476   : > { %3830 = vst.msk [vmem:[%s6655_s23 + $0x68] sm:$0xff] %vm244_vm4, %v3798_v8  ;;  %3831 = vst.msk [vmem:[%s6655_s23 + $0x70] sm:$0xff] %vm244_vm4, %v3799_v19  ;;  %v3815_v61 = vadd.f32 %v3783_v6, %v6661_v20  ;;  %v3816_v23 = vadd.f32 %v3784_v1, %v6783_v51 }
 0x477   : > { %3832 = vst.msk [vmem:[%s6655_s23 + $0x78] sm:$0xff] %vm244_vm4, %v3800_v33  ;;  %3833 = vst.msk [vmem:[%s6655_s23 + $0x80] sm:$0xff] %vm244_vm4, %v3801_v30 }
 0x478   : > { %3834 = vst.msk [vmem:[%s6655_s23 + $0x88] sm:$0xff] %vm244_vm4, %v3802_v37  ;;  %3835 = vst.msk [vmem:[%s6655_s23 + $0x90] sm:$0xff] %vm244_vm4, %v3803_v43 }
 0x479   : > { %3836 = vst.msk [vmem:[%s6655_s23 + $0x98] sm:$0xff] %vm244_vm4, %v3804_v34  ;;  %3837 = vst.msk [vmem:[%s6655_s23 + $0xa0] sm:$0xff] %vm244_vm4, %v3805_v42 }
 0x47a   : > { %3838 = vst.msk [vmem:[%s6655_s23 + $0xa8] sm:$0xff] %vm244_vm4, %v3806_v7  ;;  %3839 = vst.msk [vmem:[%s6655_s23 + $0xb0] sm:$0xff] %vm244_vm4, %v3807_v28 }
 0x47b   : > { %3840 = vst.msk [vmem:[%s6655_s23 + $0xb8] sm:$0xff] %vm244_vm4, %v3808_v56  ;;  %3841 = vst.msk [vmem:[%s6655_s23 + $0xc0] sm:$0xff] %vm244_vm4, %v3809_v21 }
 0x47c   : > { %3842 = vst.msk [vmem:[%s6655_s23 + $0xc8] sm:$0xff] %vm244_vm4, %v3810_v25  ;;  %3843 = vst.msk [vmem:[%s6655_s23 + $0xd0] sm:$0xff] %vm244_vm4, %v3811_v31 }
 0x47d   : > { %3844 = vst.msk [vmem:[%s6655_s23 + $0xd8] sm:$0xff] %vm244_vm4, %v3812_v11  ;;  %3845 = vst.msk [vmem:[%s6655_s23 + $0xe0] sm:$0xff] %vm244_vm4, %v3813_v12 }
 0x47e   : > { %3846 = vst.msk [vmem:[%s6655_s23 + $0xe8] sm:$0xff] %vm244_vm4, %v3814_v48  ;;  %3847 = vst.msk [vmem:[%s6655_s23 + $0xf0] sm:$0xff] %vm244_vm4, %v3815_v61 }
 0x47f   : > { %3848 = vst.msk [vmem:[%s6655_s23 + $0xf8] sm:$0xff] %vm244_vm4, %v3816_v23 }
 0x480 PF: > { %s13_s12 = sadd.s32 1, %s4660_s12  }
 0x481   : > { %p10_p4 = scmp.ge.s32.totalorder %s13_s12, 4  }
 0x483   :  { %12 = sbr.rel (!%p10_p4) target bundleno = 1 (0x1), region = 69 }

</bundles_post_ra>
